<compile_context>
chip_gen: v5e
topology: v5e:2x2
jax: 0.10.0
libtpu: 0.0.40
codegen_flags: <defaults>
</compile_context>

<pallas_src>
import functools

import jax
import jax.numpy as jnp
from jax import lax
from jax.experimental import pallas as pl
from jax.experimental.pallas import tpu as pltpu


def _bottleneck_kernel(TH, W, Cin, P, Cout, LPAD,
                       x_ref, w1_ref, w2_ref, w3_ref, o_ref,
                       h1pad_ref, slab_ref):
    """One (batch, row-tile) step: conv1->relu->conv2->relu->conv3->+x->relu."""
    f32 = jnp.float32
    dt = x_ref.dtype
    t = pl.program_id(1)
    r0 = pl.multiple_of(t * TH, TH)          # first padded row of this tile

    # One-time (per batch element) zero of the conv1 scratch.  Only the two SAME
    # padding columns adjacent to the interior are ever read back, the interior is
    # fully rewritten every step, and t is a sequential ("arbitrary") axis.
    @pl.when(t == 0)
    def _():
        h1pad_ref[...] = jnp.zeros_like(h1pad_ref)

    # ---- conv1 (1x1, no bias) + relu over the TH interior rows AND both halo rows
    # in a single matmul.  x is host-padded with zero rows, so edge tiles get the
    # image zero padding for free (conv1(0) = 0, relu(0) = 0).
    xs = x_ref[pl.ds(r0, TH + 2), :, :]                      # (TH+2, W, Cin)
    h1 = jnp.dot(xs.reshape((TH + 2) * W, Cin), w1_ref[...],
                 preferred_element_type=f32)
    h1 = jnp.maximum(h1, 0.0)
    h1pad_ref[:, LPAD:LPAD + W, :] = h1.reshape(TH + 2, W, P).astype(dt)

    # ---- conv2 (3x3, stride=1, SAME) + relu as ONE im2col matmul --------------
    # Stage the 9 taps through a VMEM slab scratch; slab column ((dh*3+dw)*P + cin)
    # matches w2.reshape(9P, P) row ordering.
    for k in range(9):
        dh, dw = divmod(k, 3)
        tap = h1pad_ref[dh:dh + TH, LPAD - 1 + dw:LPAD - 1 + dw + W, :]
        slab_ref[:, k * P:(k + 1) * P] = tap.reshape(TH * W, P)
    h2 = jnp.maximum(jnp.dot(slab_ref[...], w2_ref[...],
                             preferred_element_type=f32), 0.0)

    # ---- conv3 (1x1, no bias) + residual add + relu ----------------------------
    h3 = jnp.dot(h2.astype(dt), w3_ref[...], preferred_element_type=f32)
    res = xs[1:TH + 1].reshape(TH * W, Cout).astype(f32)     # residual = x (interior rows)
    out = jnp.maximum(h3 + res, 0.0)
    o_ref[...] = out.reshape(TH, W, Cout).astype(o_ref.dtype)


def _pick_tile_h(H, W, Cin, Pp, Cout, itemsize, vmem_limit_bytes):
    """Largest row tile dividing H whose tile-dependent VMEM footprint fits the budget."""
    fixed = (2 * (H + 2) * W * Cin * itemsize                      # resident padded image (dbl-buffered over n)
             + (Cin * Pp + 9 * Pp * Pp + Pp * Cout) * itemsize)    # resident weights
    budget = max(vmem_limit_bytes - fixed - (8 << 20), 1 << 20)    # leave headroom

    def est(th):
        return ((th + 2) * (W + 16) * Pp * itemsize                # h1pad scratch
                + th * W * 9 * Pp * itemsize                       # im2col slab scratch
                + 2 * th * W * Cout * itemsize                     # double-buffered out tile
                + th * W * (Pp + Cout) * 4                         # live f32 matmul results
                + (th + 2) * W * Cin * 4)                          # conv1 input/result temps

    cands = [th for th in range(1, H + 1) if H % th == 0]
    fits = [th for th in cands if est(th) <= budget]
    aligned = [th for th in fits if (th * W) % 8 == 0]
    if aligned:
        return max(aligned)
    if fits:
        return max(fits)
    return min(cands)


def bottleneck_pallas(x_nhwc, w1, w2, w3, *, tile_h=None,
                      vmem_limit_bytes=64 * 1024 * 1024):
    N, H, W, Cin = x_nhwc.shape
    P = w1.shape[1]
    Cout = w3.shape[1]
    assert Cout == Cin, "downsample=None requires inplanes == 4*planes"
    assert w2.shape == (3, 3, P, P)
    dt = x_nhwc.dtype
    itemsize = jnp.dtype(dt).itemsize

    # Lane-dense bottleneck width: zero-pad P to a multiple of 128.  Exact: padded
    # w1 cols / w2 channels / w3 rows are zero, so padded channels never contribute.
    LANES = 128
    Pp = ((P + LANES - 1) // LANES) * LANES
    if Pp != P:
        w1 = jnp.pad(w1, ((0, 0), (0, Pp - P)))
        w2 = jnp.pad(w2, ((0, 0), (0, 0), (0, Pp - P), (0, Pp - P)))
        w3 = jnp.pad(w3, ((0, Pp - P), (0, 0)))
    w1 = w1.astype(dt)
    w2m = w2.reshape(9 * Pp, Pp).astype(dt)   # im2col weight matrix
    w3 = w3.astype(dt)

    if tile_h is None:
        tile_h = _pick_tile_h(H, W, Cin, Pp, Cout, itemsize, vmem_limit_bytes)
    assert H % tile_h == 0, "H must be divisible by tile_h"
    n_tiles = H // tile_h

    LPAD = 8  # interior of the conv1 scratch starts at an aligned sublane offset
    xp = jnp.pad(x_nhwc, ((0, 0), (1, 1), (0, 0), (0, 0)))   # zero rows top/bottom

    kernel = functools.partial(_bottleneck_kernel, tile_h, W, Cin, Pp, Cout, LPAD)
    return pl.pallas_call(
        kernel,
        out_shape=jax.ShapeDtypeStruct((N, H, W, Cout), dt),
        grid=(N, n_tiles),
        in_specs=[
            # Padded image resident per batch element; rows sliced inside the kernel
            # (tile + 2 halo rows).  TODO(synk): per-tile halo fetch (manual DMA or
            # pl.Element windows) would decouple VMEM use from H on v7x.
            pl.BlockSpec((None, H + 2, W, Cin), lambda n, t: (n, 0, 0, 0)),
            pl.BlockSpec((Cin, Pp), lambda n, t: (0, 0)),     # resident weights
            pl.BlockSpec((9 * Pp, Pp), lambda n, t: (0, 0)),
            pl.BlockSpec((Pp, Cout), lambda n, t: (0, 0)),
        ],
        out_specs=pl.BlockSpec((None, tile_h, W, Cout), lambda n, t: (n, t, 0, 0)),
        scratch_shapes=[
            pltpu.VMEM((tile_h + 2, W + 2 * LPAD, Pp), dt),   # padded conv1 output
            pltpu.VMEM((tile_h * W, 9 * Pp), dt),             # im2col slab
        ],
        compiler_params=pltpu.CompilerParams(
            dimension_semantics=("parallel", "arbitrary"),
            vmem_limit_bytes=vmem_limit_bytes),
    )(xp, w1, w2m, w3)


def bottleneck_ref(x_nhwc, w1, w2, w3):
    """Pure-JAX reference (NHWC convs) mirroring the PyTorch forward."""
    h1 = jax.nn.relu(jnp.einsum("nhwc,cp->nhwp", x_nhwc, w1))
    h2 = lax.conv_general_dilated(
        h1, w2, window_strides=(1, 1), padding="SAME",
        dimension_numbers=("NHWC", "HWIO", "NHWC"))
    h2 = jax.nn.relu(h2)
    h3 = jnp.einsum("nhwp,pc->nhwc", h2, w3)
    return jax.nn.relu(h3 + x_nhwc)


# TODO(synk): downsample submodule, stride>1 and non-'none' normalization variants are
# not implemented; module defaults (downsample=None, stride=1, normalization_type='none')
# make them identity / absent, which is what this kernel reproduces.

if __name__ == "__main__":
    key = jax.random.PRNGKey(0)
    N, H, W = 2, 16, 16
    planes = 32
    inplanes = planes * 4          # residual add requires inplanes == 4*planes (=128)

    kx, k1, k2, k3 = jax.random.split(key, 4)
    x = jax.random.normal(kx, (N, H, W, inplanes), jnp.float32)
    w1 = jax.random.normal(k1, (inplanes, planes), jnp.float32) / jnp.sqrt(float(inplanes))
    w2 = jax.random.normal(k2, (3, 3, planes, planes), jnp.float32) / jnp.sqrt(9.0 * planes)
    w3 = jax.random.normal(k3, (planes, inplanes), jnp.float32) / jnp.sqrt(float(planes))

    ref = bottleneck_ref(x, w1, w2, w3)

    # f32, auto-picked tile (single row tile at this size).
    out = jax.block_until_ready(bottleneck_pallas(x, w1, w2, w3))
    err = float(jnp.max(jnp.abs(out - ref)))
    assert jnp.allclose(out, ref, atol=1e-4, rtol=1e-4), f"auto-tile max abs err={err}"

    # f32, forced multi-tile (exercises the halo-row path).
    out8 = jax.block_until_ready(bottleneck_pallas(x, w1, w2, w3, tile_h=8))
    err8 = float(jnp.max(jnp.abs(out8 - ref)))
    assert jnp.allclose(out8, ref, atol=1e-4, rtol=1e-4), f"tile_h=8 max abs err={err8}"

    # bf16 smoke test: kernel honours the input dtype (bf16 MXU operands, f32 accum).
    out_bf16 = jax.block_until_ready(
        bottleneck_pallas(x.astype(jnp.bfloat16), w1, w2, w3, tile_h=8))
    assert out_bf16.dtype == jnp.bfloat16
    out_bf16_f32 = out_bf16.astype(jnp.float32)
    assert bool(jnp.all(jnp.isfinite(out_bf16_f32)))
    assert float(jnp.max(jnp.abs(out_bf16_f32 - ref))) < 1.0  # loose: bf16 rounding

    print("KERNEL_OK")
</pallas_src>

<mosaic_0001>
module attributes {stable_mosaic.version = 11 : i64} {
  func.func @_bottleneck_kernel(%arg0: i32, %arg1: i32, %arg2: memref<1x18x16x128xf32, #tpu.memory_space<vmem>>, %arg3: memref<128x128xf32, #tpu.memory_space<vmem>>, %arg4: memref<1152x128xf32, #tpu.memory_space<vmem>>, %arg5: memref<128x128xf32, #tpu.memory_space<vmem>>, %arg6: memref<1x16x16x128xf32, #tpu.memory_space<vmem>>, %arg7: memref<18x32x128xf32, #tpu.memory_space<vmem>>, %arg8: memref<256x1152xf32, #tpu.memory_space<vmem>>) attributes {dimension_semantics = [#tpu.dimension_semantics<parallel>, #tpu.dimension_semantics<arbitrary>], iteration_bounds = array<i64: 2, 1>, scalar_prefetch = 0 : i64, scratch_operands = 2 : i64, tpu.core_type = #tpu.core_type<tc>, window_params = [{transform_indices = @transform_0, window_bounds = array<i64: 1, 18, 16, 128>}, {pipeline_mode = #tpu.pipeline_mode<synchronous>, transform_indices = @transform_1, window_bounds = array<i64: 128, 128>}, {pipeline_mode = #tpu.pipeline_mode<synchronous>, transform_indices = @transform_2, window_bounds = array<i64: 1152, 128>}, {pipeline_mode = #tpu.pipeline_mode<synchronous>, transform_indices = @transform_3, window_bounds = array<i64: 128, 128>}, {transform_indices = @transform_4, window_bounds = array<i64: 1, 16, 16, 128>}]} {
    %c16_i32 = arith.constant 16 : i32
    %0 = arith.muli %arg1, %c16_i32 : i32
    %1 = tpu.assume_multiple %0, 16 : i32
    %c0_i32 = arith.constant 0 : i32
    %2 = arith.cmpi eq, %arg1, %c0_i32 : i32
    %3 = arith.extui %2 : i1 to i32
    %c0_i32_0 = arith.constant 0 : i32
    %4 = arith.cmpi ne, %3, %c0_i32_0 : i32
    scf.if %4 {
      %cst_55 = arith.constant 0.000000e+00 : f32
      %58 = vector.broadcast %cst_55 : f32 to vector<18x32x128xf32>
      %c0_56 = arith.constant 0 : index
      %c0_57 = arith.constant 0 : index
      %c0_58 = arith.constant 0 : index
      %59 = vector.load %arg7[%c0_56, %c0_57, %c0_58] : memref<18x32x128xf32, #tpu.memory_space<vmem>>, vector<18x32x128xf32>
      tpu.vector_store %arg7[%c0_56, %c0_57, %c0_58], %58 {strides = array<i32>} : memref<18x32x128xf32, #tpu.memory_space<vmem>>, vector<18x32x128xf32>,
    } else {
    }
    %c0 = arith.constant 0 : index
    %5 = arith.index_cast %1 : i32 to index
    %c0_1 = arith.constant 0 : index
    %c0_2 = arith.constant 0 : index
    %6 = vector.load %arg2[%c0, %5, %c0_1, %c0_2] : memref<1x18x16x128xf32, #tpu.memory_space<vmem>>, vector<1x18x16x128xf32>
    %7 = vector.shape_cast %6 : vector<1x18x16x128xf32> to vector<18x16x128xf32>
    %8 = vector.shape_cast %7 : vector<18x16x128xf32> to vector<288x128xf32>
    %c0_3 = arith.constant 0 : index
    %c0_4 = arith.constant 0 : index
    %9 = vector.load %arg3[%c0_3, %c0_4] : memref<128x128xf32, #tpu.memory_space<vmem>>, vector<128x128xf32>
    %cst = arith.constant dense<0.000000e+00> : vector<288x128xf32>
    %10 = tpu.matmul %8, %9, %cst {dimension_numbers = #tpu.dot_dimension_numbers<[1], [0], [0], [1], [0, 0, 1, 1], [], []>} : vector<288x128xf32>, vector<128x128xf32>, vector<288x128xf32> -> vector<288x128xf32>
    %cst_5 = arith.constant 0.000000e+00 : f32
    %11 = vector.broadcast %cst_5 : f32 to vector<288x128xf32>
    %12 = arith.maximumf %10, %11 : vector<288x128xf32>
    %13 = vector.shape_cast %12 : vector<288x128xf32> to vector<18x16x128xf32>
    %c0_6 = arith.constant 0 : index
    %c8 = arith.constant 8 : index
    %c0_7 = arith.constant 0 : index
    %14 = vector.load %arg7[%c0_6, %c8, %c0_7] : memref<18x32x128xf32, #tpu.memory_space<vmem>>, vector<18x16x128xf32>
    tpu.vector_store %arg7[%c0_6, %c8, %c0_7], %13 {strides = array<i32>} : memref<18x32x128xf32, #tpu.memory_space<vmem>>, vector<18x16x128xf32>,
    %c0_8 = arith.constant 0 : index
    %c7 = arith.constant 7 : index
    %c0_9 = arith.constant 0 : index
    %15 = vector.load %arg7[%c0_8, %c7, %c0_9] : memref<18x32x128xf32, #tpu.memory_space<vmem>>, vector<16x16x128xf32>
    %16 = vector.shape_cast %15 : vector<16x16x128xf32> to vector<256x128xf32>
    %c0_10 = arith.constant 0 : index
    %c0_11 = arith.constant 0 : index
    %17 = vector.load %arg8[%c0_10, %c0_11] : memref<256x1152xf32, #tpu.memory_space<vmem>>, vector<256x128xf32>
    tpu.vector_store %arg8[%c0_10, %c0_11], %16 {strides = array<i32>} : memref<256x1152xf32, #tpu.memory_space<vmem>>, vector<256x128xf32>,
    %c0_12 = arith.constant 0 : index
    %c8_13 = arith.constant 8 : index
    %c0_14 = arith.constant 0 : index
    %18 = vector.load %arg7[%c0_12, %c8_13, %c0_14] : memref<18x32x128xf32, #tpu.memory_space<vmem>>, vector<16x16x128xf32>
    %19 = vector.shape_cast %18 : vector<16x16x128xf32> to vector<256x128xf32>
    %c0_15 = arith.constant 0 : index
    %c128 = arith.constant 128 : index
    %20 = vector.load %arg8[%c0_15, %c128] : memref<256x1152xf32, #tpu.memory_space<vmem>>, vector<256x128xf32>
    tpu.vector_store %arg8[%c0_15, %c128], %19 {strides = array<i32>} : memref<256x1152xf32, #tpu.memory_space<vmem>>, vector<256x128xf32>,
    %c0_16 = arith.constant 0 : index
    %c9 = arith.constant 9 : index
    %c0_17 = arith.constant 0 : index
    %21 = vector.load %arg7[%c0_16, %c9, %c0_17] : memref<18x32x128xf32, #tpu.memory_space<vmem>>, vector<16x16x128xf32>
    %22 = vector.shape_cast %21 : vector<16x16x128xf32> to vector<256x128xf32>
    %c0_18 = arith.constant 0 : index
    %c256 = arith.constant 256 : index
    %23 = vector.load %arg8[%c0_18, %c256] : memref<256x1152xf32, #tpu.memory_space<vmem>>, vector<256x128xf32>
    tpu.vector_store %arg8[%c0_18, %c256], %22 {strides = array<i32>} : memref<256x1152xf32, #tpu.memory_space<vmem>>, vector<256x128xf32>,
    %c1 = arith.constant 1 : index
    %c7_19 = arith.constant 7 : index
    %c0_20 = arith.constant 0 : index
    %24 = vector.load %arg7[%c1, %c7_19, %c0_20] : memref<18x32x128xf32, #tpu.memory_space<vmem>>, vector<16x16x128xf32>
    %25 = vector.shape_cast %24 : vector<16x16x128xf32> to vector<256x128xf32>
    %c0_21 = arith.constant 0 : index
    %c384 = arith.constant 384 : index
    %26 = vector.load %arg8[%c0_21, %c384] : memref<256x1152xf32, #tpu.memory_space<vmem>>, vector<256x128xf32>
    tpu.vector_store %arg8[%c0_21, %c384], %25 {strides = array<i32>} : memref<256x1152xf32, #tpu.memory_space<vmem>>, vector<256x128xf32>,
    %c1_22 = arith.constant 1 : index
    %c8_23 = arith.constant 8 : index
    %c0_24 = arith.constant 0 : index
    %27 = vector.load %arg7[%c1_22, %c8_23, %c0_24] : memref<18x32x128xf32, #tpu.memory_space<vmem>>, vector<16x16x128xf32>
    %28 = vector.shape_cast %27 : vector<16x16x128xf32> to vector<256x128xf32>
    %c0_25 = arith.constant 0 : index
    %c512 = arith.constant 512 : index
    %29 = vector.load %arg8[%c0_25, %c512] : memref<256x1152xf32, #tpu.memory_space<vmem>>, vector<256x128xf32>
    tpu.vector_store %arg8[%c0_25, %c512], %28 {strides = array<i32>} : memref<256x1152xf32, #tpu.memory_space<vmem>>, vector<256x128xf32>,
    %c1_26 = arith.constant 1 : index
    %c9_27 = arith.constant 9 : index
    %c0_28 = arith.constant 0 : index
    %30 = vector.load %arg7[%c1_26, %c9_27, %c0_28] : memref<18x32x128xf32, #tpu.memory_space<vmem>>, vector<16x16x128xf32>
    %31 = vector.shape_cast %30 : vector<16x16x128xf32> to vector<256x128xf32>
    %c0_29 = arith.constant 0 : index
    %c640 = arith.constant 640 : index
    %32 = vector.load %arg8[%c0_29, %c640] : memref<256x1152xf32, #tpu.memory_space<vmem>>, vector<256x128xf32>
    tpu.vector_store %arg8[%c0_29, %c640], %31 {strides = array<i32>} : memref<256x1152xf32, #tpu.memory_space<vmem>>, vector<256x128xf32>,
    %c2 = arith.constant 2 : index
    %c7_30 = arith.constant 7 : index
    %c0_31 = arith.constant 0 : index
    %33 = vector.load %arg7[%c2, %c7_30, %c0_31] : memref<18x32x128xf32, #tpu.memory_space<vmem>>, vector<16x16x128xf32>
    %34 = vector.shape_cast %33 : vector<16x16x128xf32> to vector<256x128xf32>
    %c0_32 = arith.constant 0 : index
    %c768 = arith.constant 768 : index
    %35 = vector.load %arg8[%c0_32, %c768] : memref<256x1152xf32, #tpu.memory_space<vmem>>, vector<256x128xf32>
    tpu.vector_store %arg8[%c0_32, %c768], %34 {strides = array<i32>} : memref<256x1152xf32, #tpu.memory_space<vmem>>, vector<256x128xf32>,
    %c2_33 = arith.constant 2 : index
    %c8_34 = arith.constant 8 : index
    %c0_35 = arith.constant 0 : index
    %36 = vector.load %arg7[%c2_33, %c8_34, %c0_35] : memref<18x32x128xf32, #tpu.memory_space<vmem>>, vector<16x16x128xf32>
    %37 = vector.shape_cast %36 : vector<16x16x128xf32> to vector<256x128xf32>
    %c0_36 = arith.constant 0 : index
    %c896 = arith.constant 896 : index
    %38 = vector.load %arg8[%c0_36, %c896] : memref<256x1152xf32, #tpu.memory_space<vmem>>, vector<256x128xf32>
    tpu.vector_store %arg8[%c0_36, %c896], %37 {strides = array<i32>} : memref<256x1152xf32, #tpu.memory_space<vmem>>, vector<256x128xf32>,
    %c2_37 = arith.constant 2 : index
    %c9_38 = arith.constant 9 : index
    %c0_39 = arith.constant 0 : index
    %39 = vector.load %arg7[%c2_37, %c9_38, %c0_39] : memref<18x32x128xf32, #tpu.memory_space<vmem>>, vector<16x16x128xf32>
    %40 = vector.shape_cast %39 : vector<16x16x128xf32> to vector<256x128xf32>
    %c0_40 = arith.constant 0 : index
    %c1024 = arith.constant 1024 : index
    %41 = vector.load %arg8[%c0_40, %c1024] : memref<256x1152xf32, #tpu.memory_space<vmem>>, vector<256x128xf32>
    tpu.vector_store %arg8[%c0_40, %c1024], %40 {strides = array<i32>} : memref<256x1152xf32, #tpu.memory_space<vmem>>, vector<256x128xf32>,
    %c0_41 = arith.constant 0 : index
    %c0_42 = arith.constant 0 : index
    %42 = vector.load %arg8[%c0_41, %c0_42] : memref<256x1152xf32, #tpu.memory_space<vmem>>, vector<256x1152xf32>
    %c0_43 = arith.constant 0 : index
    %c0_44 = arith.constant 0 : index
    %43 = vector.load %arg4[%c0_43, %c0_44] : memref<1152x128xf32, #tpu.memory_space<vmem>>, vector<1152x128xf32>
    %cst_45 = arith.constant dense<0.000000e+00> : vector<256x128xf32>
    %44 = tpu.matmul %42, %43, %cst_45 {dimension_numbers = #tpu.dot_dimension_numbers<[1], [0], [0], [1], [0, 0, 1, 1], [], []>} : vector<256x1152xf32>, vector<1152x128xf32>, vector<256x128xf32> -> vector<256x128xf32>
    %cst_46 = arith.constant 0.000000e+00 : f32
    %45 = vector.broadcast %cst_46 : f32 to vector<256x128xf32>
    %46 = arith.maximumf %44, %45 : vector<256x128xf32>
    %c0_47 = arith.constant 0 : index
    %c0_48 = arith.constant 0 : index
    %47 = vector.load %arg5[%c0_47, %c0_48] : memref<128x128xf32, #tpu.memory_space<vmem>>, vector<128x128xf32>
    %cst_49 = arith.constant dense<0.000000e+00> : vector<256x128xf32>
    %48 = tpu.matmul %46, %47, %cst_49 {dimension_numbers = #tpu.dot_dimension_numbers<[1], [0], [0], [1], [0, 0, 1, 1], [], []>} : vector<256x128xf32>, vector<128x128xf32>, vector<256x128xf32> -> vector<256x128xf32>
    %49 = vector.extract_strided_slice %7 {offsets = [1, 0, 0], sizes = [16, 16, 128], strides = [1, 1, 1]} : vector<18x16x128xf32> to vector<16x16x128xf32>
    %50 = vector.shape_cast %49 : vector<16x16x128xf32> to vector<256x128xf32>
    %51 = arith.addf %48, %50 : vector<256x128xf32>
    %cst_50 = arith.constant 0.000000e+00 : f32
    %52 = vector.broadcast %cst_50 : f32 to vector<256x128xf32>
    %53 = arith.maximumf %51, %52 : vector<256x128xf32>
    %54 = vector.shape_cast %53 : vector<256x128xf32> to vector<16x16x128xf32>
    %c0_51 = arith.constant 0 : index
    %c0_52 = arith.constant 0 : index
    %c0_53 = arith.constant 0 : index
    %c0_54 = arith.constant 0 : index
    %55 = vector.load %arg6[%c0_51, %c0_52, %c0_53, %c0_54] : memref<1x16x16x128xf32, #tpu.memory_space<vmem>>, vector<1x16x16x128xf32>
    %56 = vector.shape_cast %55 : vector<1x16x16x128xf32> to vector<16x16x128xf32>
    %57 = vector.shape_cast %54 : vector<16x16x128xf32> to vector<1x16x16x128xf32>
    tpu.vector_store %arg6[%c0_51, %c0_52, %c0_53, %c0_54], %57 {strides = array<i32>} : memref<1x16x16x128xf32, #tpu.memory_space<vmem>>, vector<1x16x16x128xf32>,
    return
  }
  func.func @transform_0(%arg0: i32, %arg1: i32) -> (i32, i32, i32, i32) {
    %c0_i32 = arith.constant 0 : i32
    %c0_i32_0 = arith.constant 0 : i32
    %c0_i32_1 = arith.constant 0 : i32
    %c0_i32_2 = arith.constant 0 : i32
    return %arg0, %c0_i32, %c0_i32_0, %c0_i32_1 : i32, i32, i32, i32
  }
  func.func @transform_1(%arg0: i32, %arg1: i32) -> (i32, i32) {
    %c0_i32 = arith.constant 0 : i32
    %c0_i32_0 = arith.constant 0 : i32
    %c0_i32_1 = arith.constant 0 : i32
    return %c0_i32, %c0_i32_0 : i32, i32
  }
  func.func @transform_2(%arg0: i32, %arg1: i32) -> (i32, i32) {
    %c0_i32 = arith.constant 0 : i32
    %c0_i32_0 = arith.constant 0 : i32
    %c0_i32_1 = arith.constant 0 : i32
    return %c0_i32, %c0_i32_0 : i32, i32
  }
  func.func @transform_3(%arg0: i32, %arg1: i32) -> (i32, i32) {
    %c0_i32 = arith.constant 0 : i32
    %c0_i32_0 = arith.constant 0 : i32
    %c0_i32_1 = arith.constant 0 : i32
    return %c0_i32, %c0_i32_0 : i32, i32
  }
  func.func @transform_4(%arg0: i32, %arg1: i32) -> (i32, i32, i32, i32) {
    %c0_i32 = arith.constant 0 : i32
    %c0_i32_0 = arith.constant 0 : i32
    %c0_i32_1 = arith.constant 0 : i32
    return %arg0, %arg1, %c0_i32, %c0_i32_0 : i32, i32, i32, i32
  }
}

</mosaic_0001>

<bundles_post_ra>
// kernel: tpu_custom_call.1
= control target key start
LH: loop header
LB: loop body
LE: loop exit
PB: predicated region body
PF: predicated region fallthrough
CT: control target
= control target key end

     0   :  { %s4503_s0 = inlined_call_operand.hbm [shape: f32[2,18,16,128], index: 0, kind: input, shape index: {}]   ;;  %s4504_s1 = inlined_call_operand.hbm [shape: f32[128,128], index: 1, kind: input, shape index: {}]   ;;  %s4505_s2 = inlined_call_operand.hbm [shape: f32[1152,128], index: 2, kind: input, shape index: {}]   ;;  %s4506_s3 = inlined_call_operand.hbm [shape: f32[128,128], index: 3, kind: input, shape index: {}]   ;;  %s4507_s4 = inlined_call_operand.hbm [shape: f32[2,16,16,128], index: 4, kind: output, shape index: {}]  }
   0x1   :  { %4528 = sst [smem:[#allocation52_spill]] %s4504_s1 }
   0x2   :  { %9 = vsyncpa [#allocation5], 0 }
   0x3   :  { %11 = vsyncpa [#allocation5 + $0x1], 0 }
   0x4   :  { %12 = vsyncpa [#allocation8], 0 }
   0x5   :  { %13 = vsyncpa [#allocation11], 0 }
   0x6   :  { %14 = vsyncpa [#allocation6], 0 }
   0x7   :  { %16 = vsyncpa [#allocation6 + $0x1], 0  ;;  %s3442_s15 = smov 0   ;;  %s3444_s16 = smov 0  }
   0x8   :  { %s3446_s17 = smov 0   ;;  %s3448_s18 = smov 0  }
   0x9   :  { %s3450_s19 = smov 0   ;;  %s3452_s20 = smov 0  }
   0xa LB: > { %s2997_s21 = sadd.s32 4294967295, %s3407_s20   ;;  %s2998_s22 = sadd.s32 4294967294, %s3407_s20   ;;  %s3407_s20 = sphi %s3452_s20, %s22_s20   ;;  %s3403_s19 = sphi %s3450_s19, %s4614_s19   ;;  %s3399_s18 = sphi %s3448_s18, %s4613_s18   ;;  %s3395_s17 = sphi %s3446_s17, %s4612_s17   ;;  %s3391_s16 = sphi %s3444_s16, %s4611_s16   ;;  %s3387_s15 = sphi %s3442_s15, %s4610_s15  }
   0xb   : > { %p54_p0 = scmp.ne.s32.totalorder %s3391_s16, %s3387_s15  ;;  %p3476_p1 = scmp.eq.s32.totalorder %s2997_s21, 0 }
   0xc   : > { %p3480_p2 = scmp.eq.s32.totalorder %s2997_s21, 1  ;;  %p149_p3 = scmp.eq.s32.totalorder %s2998_s22, 1 }
   0xd   : > { %p3486_p4 = por %p3476_p1, %p54_p0  ;;  %p2999_p5 = scmp.ge.s32.totalorder %s3407_s20, 1 }
   0xe   : > { %p3491_p6 = por %p149_p3, %p54_p0  ;;  %p156_p7 = scmp.lt.s32.totalorder %s3407_s20, 3 }
   0xf   : > { %s4533_s1 = sld [smem:[#allocation52_spill]]  ;;  %s3409_s5 = smov [#allocation7]  }
  0x10   : > { %p3499_p8 = pnand %p2999_p5, %p156_p7  ;;  %s169_s6 = sshll.u32 %s3409_s5, 4  ;;  %s170_s6 = int_to_ptr.vmem [resolvable:$true] %s169_s6 }
  0x11   : > { %p3003_p11 = scmp.ge.s32.totalorder %s3407_s20, 2  ;;  %s181_s10 = sshll.u32 %s4505_s2, 4  ;;  %s182_s10 = int_to_ptr.hbm [resolvable:$true] %s181_s10 }
  0x12   : > { %p3083_p9 = pneg %p3499_p8  ;;  %s4508_s11 = smov 128  }
  0x13   : > { %s3411_s12 = smov 8   ;;  %s3412_s13 = smov [#allocation9]  }
  0x14   : > { %p3507_p10 = pnand %p3083_p9, %p3476_p1  ;;  %s183_s14 = sshll.u32 %s3412_s13, 4  ;;  %s184_s14 = int_to_ptr.vmem [resolvable:$true] %s183_s14 }
  0x15   : > { %s167_s29 = sshll.u32 %s4533_s1, 4  ;;  %s195_s27 = sshll.u32 %s4506_s3, 4  ;;  %s168_s29 = int_to_ptr.hbm [resolvable:$true] %s167_s29  ;;  %s196_s27 = int_to_ptr.hbm [resolvable:$true] %s195_s27 }
  0x16   : > { %3086 = dma.hbm_to_vmem [thread:$0]  (!%p3507_p10), %s168_s29, 2048, %s170_s6, [#allocation8], %s4508_s11, %s4508_s11, %s3411_s12  }
  0x17   : > { %3089 = dma.hbm_to_vmem [thread:$0]  (!%p3507_p10), %s182_s10, 18432, %s184_s14, [#allocation8], %s4508_s11, %s4508_s11, %s3411_s12  }
  0x18   : > { %s3413_s28 = smov [#allocation10]   ;;  %s34_s29 = sadd.s32 1, %s3403_s19 }
  0x19   : > { %s197_s5 = sshll.u32 %s3413_s28, 4  ;;  %p36_p12 = scmp.ge.s32.totalorder %s34_s29, 2  ;;  %s198_s5 = int_to_ptr.vmem [resolvable:$true] %s197_s5 }
  0x1a   : > { %3092 = dma.hbm_to_vmem [thread:$0]  (!%p3507_p10), %s196_s27, 2048, %s198_s5, [#allocation11], %s4508_s11, %s4508_s11, %s3411_s12  }
  0x1b   : > { %s41_s6 = sadd.s32 1, %s3395_s17  ;;  %p48_p13 = scmp.ne.s32.totalorder %s3395_s17, %s3391_s16 }
  0x1c   : > { %p49_p0 = scmp.eq.s32.totalorder %s3407_s20, 0  ;;  %s4616_s29 = smov (%p36_p12, %s34_s29), 0 }
  0x1d   : > { %p3542_p5 = por %p3480_p2, %p48_p13  ;;  %s38_s7 = ssub.s32 %s3403_s19, %s4616_s29 }
  0x1e   : > { %p50_p3 = por %p49_p0, %p48_p13  ;;  %p3104_p7 = scmp.lt.s32.totalorder %s3407_s20, 2 }
  0x1f   : > { %p39_p9 = scmp.eq.s32.totalorder %s38_s7, 0  ;;  %s211_s9 = sand.u32 1, %s3395_s17  }
  0x20   : > { %s3064_s10 = smul.u32 288, %s211_s9  ;;  %p3094_p10 = pnand %p3104_p7, %p50_p3 }
  0x21   : > { %s3551_s13 = scalar_select %p39_p9, %s3395_s17, %s41_s6  }
  0x22   : > { %s3065_s14 = smul.u32 288, %s3403_s19  ;;  %s215_s21 = scalar_lea.vmem [#allocation4], %s3064_s10 }
  0x23   : > { %s223_s22 = sshll.u32 %s215_s21, 4  ;;  %s212_s11 = scalar_lea.sflag [#allocation5], %s211_s9  ;;  %s224_s22 = int_to_ptr.vmem [resolvable:$true] %s223_s22 }
  0x24   : > { %s220_s5 = scalar_lea.hbm %s4503_s0, %s3065_s14  ;;  %s4537_s1 = smov 128  }
  0x25   : > { %s221_s24 = sshll.u32 %s220_s5, 4  ;;  %235 = sbr.rel (%p3499_p8) target bundleno = 1251 (0x4e3), region = 36  ;;  %s222_s24 = int_to_ptr.hbm [resolvable:$true] %s221_s24 }
  0x26   : > { %3096 = dma.hbm_to_vmem [thread:$0]  (!%p3094_p10), %s222_s24, 4608, %s224_s22, %s212_s11, %s4537_s1, %s4537_s1, %s3411_s12  }
  0x2a   : > { %s3563_s6 = sand.u32 1, %s3391_s16  }
  0x2b   : > { %s3066_s7 = smul.u32 288, %s3563_s6  ;;  %s238_s10 = scalar_lea.sflag [#allocation5], %s3563_s6 }
  0x2d   : > { %s3567_s14 = scalar_lea.vmem [#allocation4], %s3066_s7 }
  0x2e   : > { %3370 = dma.done.wait (%p3486_p4), %s238_s10, 4608  }
  0x2f   : > { %3372 = vsyncadd (%p3486_p4), %s238_s10, 4294962688 }
  0x30   : > { %3374 = dma.done.wait (%p3476_p1), [#allocation8], 20480  }
  0x31   : > { %3376 = vsyncadd (%p3476_p1), [#allocation8], 4294946816 }
  0x32   : > { %3378 = dma.done.wait (%p3476_p1), [#allocation11], 2048  }
  0x33   : > { %3380 = vsyncadd (%p3476_p1), [#allocation11], 4294965248  ;;  %v413_v0 = vld [vmem:[#allocation7 + $0x78] sm:$0xff]  ;;  %v412_v1 = vld [vmem:[#allocation7 + $0x70] sm:$0xff]  ;;  %v3414_v28 = vmov 0.0   ;;  %s3009_s1 = sshll.u32 %s3563_s6, 8 }
  0x34   : > { %414 = vmatpush.msra.mxu0 %v413_v0  ;;  %v411_v2 = vld [vmem:[#allocation7 + $0x68] sm:$0xff]  ;;  %v410_v3 = vld [vmem:[#allocation7 + $0x60] sm:$0xff]  ;;  %v409_v4 = vld [vmem:[#allocation7 + $0x58] sm:$0xff]  ;;  %288 = vst [vmem:[#allocation2] sm:$0xff] %v3414_v28  ;;  %s4373_s23 = scalar_lea.vmem [#allocation12], %s3009_s1  ;;  %s3015_s25 = sshll.u32 %s3399_s18, 8 }
  0x35   : > { %v408_v5 = vld [vmem:[#allocation7 + $0x50] sm:$0xff]  ;;  %v407_v6 = vld [vmem:[#allocation7 + $0x48] sm:$0xff]  ;;  %v406_v7 = vld [vmem:[#allocation7 + $0x40] sm:$0xff]  ;;  %291 = vst [vmem:[#allocation2 + $0x18] sm:$0xff] %v3414_v28  ;;  %s2878_s12 = scalar_lea.hbm %s4507_s4, %s3015_s25  ;;  %s2879_s9 = sshll.u32 %s4373_s23, 4  ;;  %s2880_s9 = int_to_ptr.vmem [resolvable:$true] %s2879_s9 }
  0x36   : > { %415 = vmatpush.msra.mxu0 %v412_v1  ;;  %v405_v8 = vld [vmem:[#allocation7 + $0x38] sm:$0xff]  ;;  %v404_v9 = vld [vmem:[#allocation7 + $0x30] sm:$0xff]  ;;  %v403_v10 = vld [vmem:[#allocation7 + $0x28] sm:$0xff]  ;;  %292 = vst [vmem:[#allocation2 + $0x20] sm:$0xff] %v3414_v28  ;;  %s2881_s21 = sshll.u32 %s2878_s12, 4  ;;  %s2864_s22 = scalar_lea.sflag [#allocation6], %s3563_s6  ;;  %s2882_s21 = int_to_ptr.hbm [resolvable:$true] %s2881_s21 }
  0x37   : > { %v402_v11 = vld [vmem:[#allocation7 + $0x20] sm:$0xff]  ;;  %v401_v12 = vld [vmem:[#allocation7 + $0x18] sm:$0xff]  ;;  %v400_v13 = vld [vmem:[#allocation7 + $0x10] sm:$0xff]  ;;  %295 = vst [vmem:[#allocation2 + $0x38] sm:$0xff] %v3414_v28  ;;  %s3331_s27 = sshra.s32 %s2882_s21, 4  ;;  %s3337_s24 = scalar_lea.hbm %s4507_s4, 512  ;;  %s3332_s27 = int_to_ptr.hbm [resolvable:$true] %s3331_s27 }
  0x38   : > { %416 = vmatpush.msra.mxu0 %v411_v2  ;;  %v399_v14 = vld [vmem:[#allocation7 + $0x8] sm:$0xff]  ;;  %v398_v15 = vld [vmem:[#allocation7] sm:$0xff]  ;;  %v364_v18 = vld [vmem:[%s3567_s14 + $0x10] sm:$0xff]  ;;  %296 = vst [vmem:[#allocation2 + $0x40] sm:$0xff] %v3414_v28  ;;  %s3333_s18 = scalar_lea.hbm %s3332_s27, 256  ;;  %p3338_p8 = scmp.lt.s32.totalorder %s3332_s27, %s4507_s4 }
  0x39   : > { %v362_v16 = vld [vmem:[%s3567_s14] sm:$0xff]  ;;  %v363_v17 = vld [vmem:[%s3567_s14 + $0x8] sm:$0xff]  ;;  %v365_v19 = vld [vmem:[%s3567_s14 + $0x18] sm:$0xff]  ;;  %299 = vst [vmem:[#allocation2 + $0x58] sm:$0xff] %v3414_v28  ;;  %p3334_p1 = scmp.ne.s32.totalorder %s3332_s27, %s3333_s18  ;;  %p3339_p12 = scmp.lt.s32.totalorder %s3337_s24, %s3333_s18 }
  0x3a   : > { %417 = vmatpush.msra.mxu0 %v410_v3  ;;  %v366_v20 = vld [vmem:[%s3567_s14 + $0x20] sm:$0xff]  ;;  %v367_v21 = vld [vmem:[%s3567_s14 + $0x28] sm:$0xff]  ;;  %v368_v22 = vld [vmem:[%s3567_s14 + $0x30] sm:$0xff]  ;;  %300 = vst [vmem:[#allocation2 + $0x60] sm:$0xff] %v3414_v28 }
  0x3b   : > { %v369_v23 = vld [vmem:[%s3567_s14 + $0x38] sm:$0xff]  ;;  %v370_v24 = vld [vmem:[%s3567_s14 + $0x40] sm:$0xff]  ;;  %v371_v25 = vld [vmem:[%s3567_s14 + $0x48] sm:$0xff]  ;;  %303 = vst [vmem:[#allocation2 + $0x78] sm:$0xff] %v3414_v28  ;;  %p3335_p2 = pnand %p3334_p1, %p3542_p5  ;;  %p3340_p13 = por %p3339_p12, %p3338_p8 }
  0x3c   : > { %418 = vmatpush.msra.mxu0 %v409_v4  ;;  %v372_v26 = vld [vmem:[%s3567_s14 + $0x50] sm:$0xff]  ;;  %v373_v27 = vld [vmem:[%s3567_s14 + $0x58] sm:$0xff]  ;;  %v374_v29 = vld [vmem:[%s3567_s14 + $0x60] sm:$0xff]  ;;  %304 = vst [vmem:[#allocation2 + $0x80] sm:$0xff] %v3414_v28 }
  0x3d   : > { %307 = vst [vmem:[#allocation2 + $0x98] sm:$0xff] %v3414_v28  ;;  %v375_v30 = vld [vmem:[%s3567_s14 + $0x68] sm:$0xff]  ;;  %v376_v31 = vld [vmem:[%s3567_s14 + $0x70] sm:$0xff]  ;;  %v377_v32 = vld [vmem:[%s3567_s14 + $0x78] sm:$0xff]  ;;  %p3336_p4 = pneg %p3335_p2 }
  0x3e   : > { %419 = vmatpush.msra.mxu0 %v408_v5  ;;  %308 = vst [vmem:[#allocation2 + $0xa0] sm:$0xff] %v3414_v28  ;;  %v3597_v33 = vld [vmem:[#allocation9 + $0xf8] sm:$0xff]  ;;  %v3600_v34 = vld [vmem:[#allocation9 + $0xf0] sm:$0xff]  ;;  %v3603_v35 = vld [vmem:[#allocation9 + $0xe8] sm:$0xff] }
  0x3f   : > { %311 = vst [vmem:[#allocation2 + $0xb8] sm:$0xff] %v3414_v28  ;;  %3032 = vmatpush.msra.mxu2 %v3597_v33  ;;  %v378_v37 = vld [vmem:[%s3567_s14 + $0x80] sm:$0xff]  ;;  %v1492_v40 = vld [vmem:[#allocation9 + $0x78] sm:$0xff]  ;;  %v1491_v42 = vld [vmem:[#allocation9 + $0x70] sm:$0xff]  ;;  %p3341_p0 = pnand %p3340_p13, %p3336_p4 }
  0x40   : > { %420 = vmatpush.msra.mxu0 %v407_v6  ;;  %312 = vst [vmem:[#allocation2 + $0xc0] sm:$0xff] %v3414_v28  ;;  %v3607_v39 = vld [vmem:[#allocation9 + $0xe0] sm:$0xff]  ;;  %v3610_v41 = vld [vmem:[#allocation9 + $0x178] sm:$0xff]  ;;  %3016 = vmatpush.msra.mxu1 %v1492_v40  ;;  %v3613_v43 = vld [vmem:[#allocation9 + $0x170] sm:$0xff] }
  0x41   : > { %315 = vst [vmem:[#allocation2 + $0xd8] sm:$0xff] %v3414_v28  ;;  %3033 = vmatpush.msra.mxu2 %v3600_v34  ;;  %3048 = vmatpush.msra.mxu3 %v3610_v41  ;;  %v3615_v44 = vld [vmem:[#allocation9 + $0xd8] sm:$0xff]  ;;  %v3618_v45 = vld [vmem:[#allocation9 + $0xd0] sm:$0xff]  ;;  %v1490_v46 = vld [vmem:[#allocation9 + $0x68] sm:$0xff] }
  0x42   : > { %421 = vmatpush.msra.mxu0 %v406_v7  ;;  %316 = vst [vmem:[#allocation2 + $0xe0] sm:$0xff] %v3414_v28  ;;  %3017 = vmatpush.msra.mxu1 %v1491_v42  ;;  %v3621_v47 = vld [vmem:[#allocation9 + $0x168] sm:$0xff]  ;;  %v1489_v52 = vld [vmem:[#allocation9 + $0x60] sm:$0xff]  ;;  %v1488_v55 = vld [vmem:[#allocation9 + $0x58] sm:$0xff] }
  0x43   : > { %319 = vst [vmem:[#allocation2 + $0xf8] sm:$0xff] %v3414_v28  ;;  %3034 = vmatpush.msra.mxu2 %v3603_v35  ;;  %3049 = vmatpush.msra.mxu3 %v3613_v43  ;;  %v3624_v48 = vld [vmem:[#allocation9 + $0xc8] sm:$0xff]  ;;  %v3631_v53 = vld [vmem:[#allocation9 + $0x160] sm:$0xff]  ;;  %v3639_v56 = vld [vmem:[#allocation9 + $0x158] sm:$0xff] }
  0x44   : > { %422 = vmatpush.msra.mxu0 %v405_v8  ;;  %320 = vst [vmem:[#allocation2 + $0x100] sm:$0xff] %v3414_v28  ;;  %v379_v50 = vld [vmem:[%s3567_s14 + $0x88] sm:$0xff]  ;;  %3018 = vmatpush.msra.mxu1 %v1490_v46  ;;  %v3634_v54 = vld [vmem:[#allocation9 + $0xc0] sm:$0xff]  ;;  %v1487_v57 = vld [vmem:[#allocation9 + $0x50] sm:$0xff] }
  0x45   : > { %323 = vst [vmem:[#allocation2 + $0x118] sm:$0xff] %v3414_v28  ;;  %3035 = vmatpush.msra.mxu2 %v3607_v39  ;;  %3050 = vmatpush.msra.mxu3 %v3621_v47  ;;  %v3643_v58 = vld [vmem:[#allocation9 + $0x150] sm:$0xff]  ;;  %v3645_v59 = vld [vmem:[#allocation9 + $0xb8] sm:$0xff]  ;;  %v1486_v61 = vld [vmem:[#allocation9 + $0x48] sm:$0xff] }
  0x46   : > { %423 = vmatpush.msra.mxu0 %v404_v9  ;;  %324 = vst [vmem:[#allocation2 + $0x120] sm:$0xff] %v3414_v28  ;;  %3019 = vmatpush.msra.mxu1 %v1489_v52  ;;  %v3648_v60 = vld [vmem:[#allocation9 + $0xb0] sm:$0xff]  ;;  %v3651_v62 = vld [vmem:[#allocation9 + $0x148] sm:$0xff]  ;;  %v1485_v3 = vld [vmem:[#allocation9 + $0x40] sm:$0xff] }
  0x47   : > { %327 = vst [vmem:[#allocation2 + $0x138] sm:$0xff] %v3414_v28  ;;  %3036 = vmatpush.msra.mxu2 %v3615_v44  ;;  %3051 = vmatpush.msra.mxu3 %v3631_v53  ;;  %v3654_v63 = vld [vmem:[#allocation9 + $0xa8] sm:$0xff]  ;;  %v380_v1 = vld [vmem:[%s3567_s14 + $0x90] sm:$0xff]  ;;  %v3661_v4 = vld [vmem:[#allocation9 + $0x140] sm:$0xff] }
  0x48   : > { %424 = vmatpush.msra.mxu0 %v403_v10  ;;  %328 = vst [vmem:[#allocation2 + $0x140] sm:$0xff] %v3414_v28  ;;  %3020 = vmatpush.msra.mxu1 %v1488_v55  ;;  %v3664_v5 = vld [vmem:[#allocation9 + $0xa0] sm:$0xff]  ;;  %v1484_v6 = vld [vmem:[#allocation9 + $0x38] sm:$0xff]  ;;  %v1483_v8 = vld [vmem:[#allocation9 + $0x30] sm:$0xff] }
  0x49   : > { %331 = vst [vmem:[#allocation2 + $0x158] sm:$0xff] %v3414_v28  ;;  %3037 = vmatpush.msra.mxu2 %v3618_v45  ;;  %3052 = vmatpush.msra.mxu3 %v3639_v56  ;;  %v3669_v7 = vld [vmem:[#allocation9 + $0x138] sm:$0xff]  ;;  %v3673_v9 = vld [vmem:[#allocation9 + $0x130] sm:$0xff] }
  0x4a   : > { %425 = vmatpush.msra.mxu0 %v402_v11  ;;  %332 = vst [vmem:[#allocation2 + $0x160] sm:$0xff] %v3414_v28  ;;  %3021 = vmatpush.msra.mxu1 %v1487_v57  ;;  %v3675_v10 = vld [vmem:[#allocation9 + $0x98] sm:$0xff]  ;;  %v3678_v11 = vld [vmem:[#allocation9 + $0x90] sm:$0xff] }
  0x4b   : > { %335 = vst [vmem:[#allocation2 + $0x178] sm:$0xff] %v3414_v28  ;;  %3038 = vmatpush.msra.mxu2 %v3624_v48  ;;  %3053 = vmatpush.msra.mxu3 %v3643_v58 }
  0x4c   : > { %426 = vmatpush.msra.mxu0 %v401_v12  ;;  %336 = vst [vmem:[#allocation2 + $0x180] sm:$0xff] %v3414_v28  ;;  %3022 = vmatpush.msra.mxu1 %v1486_v61  ;;  %v1482_v12 = vld [vmem:[#allocation9 + $0x28] sm:$0xff] }
  0x4d   : > { %339 = vst [vmem:[#allocation2 + $0x198] sm:$0xff] %v3414_v28  ;;  %3039 = vmatpush.msra.mxu2 %v3634_v54  ;;  %3054 = vmatpush.msra.mxu3 %v3651_v62 }
  0x4e   : > { %427 = vmatpush.msra.mxu0 %v400_v13  ;;  %340 = vst [vmem:[#allocation2 + $0x1a0] sm:$0xff] %v3414_v28  ;;  %3023 = vmatpush.msra.mxu1 %v1485_v3  ;;  %v3681_v13 = vld [vmem:[#allocation9 + $0x128] sm:$0xff] }
  0x4f   : > { %343 = vst [vmem:[#allocation2 + $0x1b8] sm:$0xff] %v3414_v28  ;;  %3040 = vmatpush.msra.mxu2 %v3645_v59  ;;  %3055 = vmatpush.msra.mxu3 %v3661_v4 }
  0x50   : > { %428 = vmatpush.msra.mxu0 %v399_v14  ;;  %344 = vst [vmem:[#allocation2 + $0x1c0] sm:$0xff] %v3414_v28  ;;  %3024 = vmatpush.msra.mxu1 %v1484_v6  ;;  %v3684_v14 = vld [vmem:[#allocation9 + $0x88] sm:$0xff] }
  0x51   : > { %347 = vst [vmem:[#allocation2 + $0x1d8] sm:$0xff] %v3414_v28  ;;  %3041 = vmatpush.msra.mxu2 %v3648_v60  ;;  %3056 = vmatpush.msra.mxu3 %v3669_v7 }
  0x52   : > { %429 = vmatpush.msra.mxu0 %v398_v15  ;;  %348 = vst [vmem:[#allocation2 + $0x1e0] sm:$0xff] %v3414_v28  ;;  %3025 = vmatpush.msra.mxu1 %v1483_v8 }
  0x53   : > { %430 = vmatmul.f32.vlgmr.msra.gmra.mxu0 %v362_v16  ;;  %351 = vst [vmem:[#allocation2 + $0x1f8] sm:$0xff] %v3414_v28  ;;  %3042 = vmatpush.msra.mxu2 %v3654_v63  ;;  %v381_v16 = vld [vmem:[%s3567_s14 + $0x98] sm:$0xff] }
  0x54   : > { %352 = vst [vmem:[#allocation2 + $0x200] sm:$0xff] %v3414_v28  ;;  %1621 = vmatpush.msrb.mxu0 %v1492_v40  ;;  %3057 = vmatpush.msra.mxu3 %v3673_v9 }
  0x55   : > { %355 = vst [vmem:[#allocation2 + $0x218] sm:$0xff] %v3414_v28  ;;  %3043 = vmatpush.msra.mxu2 %v3664_v5  ;;  %3026 = vmatpush.msra.mxu1 %v1482_v12 }
  0x56   : > { %356 = vst [vmem:[#allocation2 + $0x220] sm:$0xff] %v3414_v28  ;;  %1622 = vmatpush.msrb.mxu0 %v1491_v42  ;;  %3058 = vmatpush.msra.mxu3 %v3681_v13 }
  0x57   : > { %359 = vst [vmem:[#allocation2 + $0x238] sm:$0xff] %v3414_v28  ;;  %3044 = vmatpush.msra.mxu2 %v3675_v10  ;;  %v382_v28 = vld [vmem:[%s3567_s14 + $0xa0] sm:$0xff] }
  0x58   : > { %1623 = vmatpush.msrb.mxu0 %v1490_v46  ;;  %v384_v46 = vld [vmem:[%s3567_s14 + $0xb0] sm:$0xff] }
  0x59   : > { %3045 = vmatpush.msra.mxu2 %v3678_v11 }
  0x5a   : > { %1624 = vmatpush.msrb.mxu0 %v1489_v52  ;;  %v1555_v52 = vld [vmem:[#allocation9 + $0x270] sm:$0xff] }
  0x5b   : > { %433 = vmatmul.f32.gmra.mxu0 %v363_v17  ;;  %3046 = vmatpush.msra.mxu2 %v3684_v14 }
  0x5c   : > { %1625 = vmatpush.msrb.mxu0 %v1488_v55  ;;  %v1539_v55 = vld [vmem:[#allocation9 + $0x1f0] sm:$0xff] }
  0x5e   : > { %1626 = vmatpush.msrb.mxu0 %v1487_v57 }
  0x60   : > { %1627 = vmatpush.msrb.mxu0 %v1486_v61 }
  0x62   : > { %1628 = vmatpush.msrb.mxu0 %v1485_v3  ;;  %v1553_v3 = vld [vmem:[#allocation9 + $0x260] sm:$0xff] }
  0x63   : > { %436 = vmatmul.f32.gmra.mxu0 %v364_v18  ;;  %v1481_v18 = vld [vmem:[#allocation9 + $0x20] sm:$0xff] }
  0x64   : > { %1629 = vmatpush.msrb.mxu0 %v1484_v6  ;;  %3027 = vmatpush.msra.mxu1 %v1481_v18 }
  0x66   : > { %1630 = vmatpush.msrb.mxu0 %v1483_v8  ;;  %v388_v8 = vld [vmem:[%s3567_s14 + $0xd0] sm:$0xff] }
  0x68   : > { %1631 = vmatpush.msrb.mxu0 %v1482_v12 }
  0x6a   : > { %1632 = vmatpush.msrb.mxu0 %v1481_v18  ;;  %v389_v18 = vld [vmem:[%s3567_s14 + $0xd8] sm:$0xff] }
  0x6b   : > { %439 = vmatmul.f32.gmra.mxu0 %v365_v19  ;;  %v3691_v19 = vld [vmem:[#allocation9 + $0x120] sm:$0xff] }
  0x6c   : > { %3059 = vmatpush.msra.mxu3 %v3691_v19 }
  0x73   : > { %442 = vmatmul.f32.gmra.mxu0 %v366_v20  ;;  %v3694_v20 = vld [vmem:[#allocation9 + $0x80] sm:$0xff] }
  0x74   : > { %3047 = vmatpush.msra.mxu2 %v3694_v20 }
  0x7b   : > { %445 = vmatmul.f32.gmra.mxu0 %v367_v21  ;;  %v1480_v21 = vld [vmem:[#allocation9 + $0x18] sm:$0xff] }
  0x7c   : > { %3028 = vmatpush.msra.mxu1 %v1480_v21  ;;  %1633 = vmatpush.msrb.mxu0 %v1480_v21 }
  0x83   : > { %448 = vmatmul.f32.gmra.mxu0 %v368_v22  ;;  %v3699_v22 = vld [vmem:[#allocation9 + $0x118] sm:$0xff] }
  0x84   : > { %3060 = vmatpush.msra.mxu3 %v3699_v22 }
  0x8b   : > { %451 = vmatmul.f32.gmra.mxu0 %v369_v23  ;;  %v1479_v23 = vld [vmem:[#allocation9 + $0x10] sm:$0xff] }
  0x8c   : > { %3029 = vmatpush.msra.mxu1 %v1479_v23  ;;  %1634 = vmatpush.msrb.mxu0 %v1479_v23 }
  0x93   : > { %454 = vmatmul.f32.gmra.mxu0 %v370_v24  ;;  %v3703_v24 = vld [vmem:[#allocation9 + $0x110] sm:$0xff] }
  0x94   : > { %3061 = vmatpush.msra.mxu3 %v3703_v24 }
  0x9b   : > { %457 = vmatmul.f32.gmra.mxu0 %v371_v25  ;;  %v1478_v25 = vld [vmem:[#allocation9 + $0x8] sm:$0xff] }
  0x9c   : > { %3030 = vmatpush.msra.mxu1 %v1478_v25  ;;  %1635 = vmatpush.msrb.mxu0 %v1478_v25  ;;  %v1536_v25 = vld [vmem:[#allocation9 + $0x1d8] sm:$0xff] }
  0xa3   : > { %460 = vmatmul.f32.gmra.mxu0 %v372_v26  ;;  %v3706_v26 = vld [vmem:[#allocation9 + $0x108] sm:$0xff] }
  0xa4   : > { %3062 = vmatpush.msra.mxu3 %v3706_v26 }
  0xab   : > { %463 = vmatmul.f32.gmra.mxu0 %v373_v27 }
  0xb3   : > { %466 = vmatmul.f32.gmra.mxu0 %v374_v29 }
  0xbb   : > { %469 = vmatmul.f32.gmra.mxu0 %v375_v30  ;;  %v1477_v30 = vld [vmem:[#allocation9] sm:$0xff] }
  0xbc   : > { %3031 = vmatpush.msra.mxu1 %v1477_v30  ;;  %1636 = vmatpush.msrb.mxu0 %v1477_v30  ;;  %v390_v30 = vld [vmem:[%s3567_s14 + $0xe0] sm:$0xff] }
  0xbe   : > { %1734 = vmatpush.msra.mxu0 %v3597_v33 }
  0xc0   : > { %1735 = vmatpush.msra.mxu0 %v3600_v34  ;;  %v385_v34 = vld [vmem:[%s3567_s14 + $0xb8] sm:$0xff] }
  0xc2   : > { %1736 = vmatpush.msra.mxu0 %v3603_v35  ;;  %v1554_v35 = vld [vmem:[#allocation9 + $0x268] sm:$0xff] }
  0xc3   : > { %472 = vmatmul.f32.gmra.mxu0 %v376_v31  ;;  %v3713_v31 = vld [vmem:[#allocation9 + $0x100] sm:$0xff] }
  0xc4   : > { %3063 = vmatpush.msra.mxu3 %v3713_v31  ;;  %1737 = vmatpush.msra.mxu0 %v3607_v39 }
  0xc6   : > { %1738 = vmatpush.msra.mxu0 %v3615_v44  ;;  %v386_v44 = vld [vmem:[%s3567_s14 + $0xc0] sm:$0xff] }
  0xc8   : > { %1739 = vmatpush.msra.mxu0 %v3618_v45 }
  0xca   : > { %1740 = vmatpush.msra.mxu0 %v3624_v48 }
  0xcb   : > { %475 = vmatmul.f32.gmra.mxu0 %v377_v32  ;;  %v1556_v32 = vld [vmem:[#allocation9 + $0x278] sm:$0xff] }
  0xcc   : > { %2073 = vmatpush.msrb.mxu2 %v1556_v32  ;;  %1741 = vmatpush.msra.mxu0 %v3634_v54  ;;  %v1538_v54 = vld [vmem:[#allocation9 + $0x1e8] sm:$0xff] }
  0xce   : > { %2074 = vmatpush.msrb.mxu2 %v1555_v52  ;;  %1742 = vmatpush.msra.mxu0 %v3645_v59 }
  0xd0   : > { %v431_v36 = vpop.f32.mrf.mxu0  ;;  %2075 = vmatpush.msrb.mxu2 %v1554_v35  ;;  %1743 = vmatpush.msra.mxu0 %v3648_v60  ;;  %v387_v60 = vld [vmem:[%s3567_s14 + $0xc8] sm:$0xff] }
  0xd1   : > { %v539_v38 = vmax.f32 %v431_v36, 0.0  ;;  %v1540_v36 = vld [vmem:[#allocation9 + $0x1f8] sm:$0xff] }
  0xd2   : > { %1960 = vmatpush.msrb.mxu1 %v1540_v36  ;;  %1744 = vmatpush.msra.mxu0 %v3654_v63 }
  0xd3   : > { %575 = vst [vmem:[#allocation2 + $0x8] sm:$0xff] %v539_v38  ;;  %478 = vmatmul.f32.gmra.mxu0 %v378_v37  ;;  %v383_v38 = vld [vmem:[%s3567_s14 + $0xa8] sm:$0xff]  ;;  %2076 = vmatpush.msrb.mxu2 %v1553_v3 }
  0xd4   : > { %1961 = vmatpush.msrb.mxu1 %v1539_v55  ;;  %1745 = vmatpush.msra.mxu0 %v3664_v5  ;;  %v1537_v5 = vld [vmem:[#allocation9 + $0x1e0] sm:$0xff] }
  0xd6   : > { %1962 = vmatpush.msrb.mxu1 %v1538_v54  ;;  %1746 = vmatpush.msra.mxu0 %v3675_v10 }
  0xd8   : > { %v3626_v49 = vpop.f32.mrf.mxu0  ;;  %1747 = vmatpush.msra.mxu0 %v3678_v11  ;;  %1963 = vmatpush.msrb.mxu1 %v1537_v5  ;;  %v394_v5 = vld [vmem:[%s3567_s14 + $0x100] sm:$0xff] }
  0xd9   : > { %v540_v51 = vmax.f32 %v3626_v49, 0.0 }
  0xda   : > { %1748 = vmatpush.msra.mxu0 %v3684_v14  ;;  %v1552_v14 = vld [vmem:[#allocation9 + $0x258] sm:$0xff]  ;;  %1964 = vmatpush.msrb.mxu1 %v1536_v25  ;;  %v396_v25 = vld [vmem:[%s3567_s14 + $0x110] sm:$0xff] }
  0xdb   : > { %576 = vst [vmem:[#allocation2 + $0x10] sm:$0xff] %v540_v51  ;;  %481 = vmatmul.f32.gmra.mxu0 %v379_v50  ;;  %2077 = vmatpush.msrb.mxu2 %v1552_v14  ;;  %v395_v14 = vld [vmem:[%s3567_s14 + $0x108] sm:$0xff] }
  0xdc   : > { %1749 = vmatpush.msra.mxu0 %v3694_v20 }
  0xe0   : > { %v3656_v0 = vpop.f32.mrf.mxu0 }
  0xe1   : > { %v541_v2 = vmax.f32 %v3656_v0, 0.0 }
  0xe3   : > { %577 = vst [vmem:[#allocation2 + $0x28] sm:$0xff] %v541_v2  ;;  %484 = vmatmul.f32.gmra.mxu0 %v380_v1 }
  0xe8   : > { %v3686_v15 = vpop.f32.mrf.mxu0 }
  0xe9   : > { %v542_v17 = vmax.f32 %v3686_v15, 0.0 }
  0xeb   : > { %578 = vst [vmem:[#allocation2 + $0x30] sm:$0xff] %v542_v17  ;;  %487 = vmatmul.f32.gmra.mxu0 %v381_v16 }
  0xf0   : > { %v3708_v27 = vpop.f32.mrf.mxu0 }
  0xf1   : > { %v543_v29 = vmax.f32 %v3708_v27, 0.0 }
  0xf3   : > { %579 = vst [vmem:[#allocation2 + $0x48] sm:$0xff] %v543_v29  ;;  %490 = vmatmul.f32.gmra.mxu0 %v382_v28 }
  0xf8   : > { %v446_v37 = vpop.f32.mrf.mxu0 }
  0xf9   : > { %v544_v40 = vmax.f32 %v446_v37, 0.0 }
  0xfb   : > { %580 = vst [vmem:[#allocation2 + $0x50] sm:$0xff] %v544_v40  ;;  %493 = vmatmul.f32.gmra.mxu0 %v383_v38  ;;  %v1551_v38 = vld [vmem:[#allocation9 + $0x250] sm:$0xff] }
  0xfc   : > { %v1535_v40 = vld [vmem:[#allocation9 + $0x1d0] sm:$0xff]  ;;  %2078 = vmatpush.msrb.mxu2 %v1551_v38  ;;  %v397_v38 = vld [vmem:[%s3567_s14 + $0x118] sm:$0xff] }
  0xfd   : > { %1965 = vmatpush.msrb.mxu1 %v1535_v40 }
 0x100   : > { %v449_v42 = vpop.f32.mrf.mxu0 }
 0x101   : > { %v545_v50 = vmax.f32 %v449_v42, 0.0 }
 0x103   : > { %581 = vst [vmem:[#allocation2 + $0x68] sm:$0xff] %v545_v50  ;;  %496 = vmatmul.f32.gmra.mxu0 %v384_v46  ;;  %v391_v46 = vld [vmem:[%s3567_s14 + $0xe8] sm:$0xff] }
 0x108   : > { %v452_v33 = vpop.f32.mrf.mxu0 }
 0x109   : > { %v546_v57 = vmax.f32 %v452_v33, 0.0  ;;  %v1550_v33 = vld [vmem:[#allocation9 + $0x248] sm:$0xff] }
 0x10a   : > { %2079 = vmatpush.msrb.mxu2 %v1550_v33  ;;  %v611_v33 = vld [vmem:[#allocation2 + $0x7] sm:$0xff] }
 0x10b   : > { %582 = vst [vmem:[#allocation2 + $0x70] sm:$0xff] %v546_v57  ;;  %499 = vmatmul.f32.gmra.mxu0 %v385_v34  ;;  %1771 = vmatmul.f32.vlgmr.msra.gmra.mxu2 %v546_v57  ;;  %v392_v57 = vld [vmem:[%s3567_s14 + $0xf0] sm:$0xff] }
 0x110   : > { %v455_v39 = vpop.f32.mrf.mxu0 }
 0x111   : > { %v547_v45 = vmax.f32 %v455_v39, 0.0 }
 0x112   : > { %v618_v61 = vld [vmem:[#allocation2 + $0x6f] sm:$0xff] }
 0x113   : > { %v746_v48 = vld [vmem:[#allocation2 + $0x71] sm:$0xff]  ;;  %583 = vst [vmem:[#allocation2 + $0x88] sm:$0xff] %v547_v45  ;;  %502 = vmatmul.f32.gmra.mxu0 %v386_v44  ;;  %1658 = vmatmul.f32.vlgmr.msra.gmra.mxu1 %v618_v61 }
 0x114   : > { %1884 = vmatmul.f32.vlgmr.msra.gmra.mxu3 %v746_v48  ;;  %1774 = vmatmul.f32.gmra.mxu2 %v547_v45  ;;  %v1534_v45 = vld [vmem:[#allocation9 + $0x1c8] sm:$0xff]  ;;  %v393_v48 = vld [vmem:[%s3567_s14 + $0xf8] sm:$0xff] }
 0x115   : > { %1966 = vmatpush.msrb.mxu1 %v1534_v45 }
 0x118   : > { %v458_v59 = vpop.f32.mrf.mxu0 }
 0x119   : > { %v548_v63 = vmax.f32 %v458_v59, 0.0 }
 0x11a   : > { %v619_v1 = vld [vmem:[#allocation2 + $0x87] sm:$0xff] }
 0x11b   : > { %584 = vst [vmem:[#allocation2 + $0x90] sm:$0xff] %v548_v63  ;;  %505 = vmatmul.f32.gmra.mxu0 %v387_v60  ;;  %1661 = vmatmul.f32.gmra.mxu1 %v619_v1  ;;  %v1533_v1 = vld [vmem:[#allocation9 + $0x1c0] sm:$0xff] }
 0x11c   : > { %1777 = vmatmul.f32.gmra.mxu2 %v548_v63  ;;  %v1549_v63 = vld [vmem:[#allocation9 + $0x240] sm:$0xff]  ;;  %1967 = vmatpush.msrb.mxu1 %v1533_v1 }
 0x11d   : > { %2080 = vmatpush.msrb.mxu2 %v1549_v63  ;;  %v3754_v63 = vld [vmem:[#allocation2 + $0x27] sm:$0xff] }
 0x120   : > { %v461_v6 = vpop.f32.mrf.mxu0 }
 0x121   : > { %v549_v10 = vmax.f32 %v461_v6, 0.0 }
 0x122   : > { %v620_v11 = vld [vmem:[#allocation2 + $0x8f] sm:$0xff] }
 0x123   : > { %v747_v12 = vld [vmem:[#allocation2 + $0x89] sm:$0xff]  ;;  %585 = vst [vmem:[#allocation2 + $0xa8] sm:$0xff] %v549_v10  ;;  %508 = vmatmul.f32.gmra.mxu0 %v388_v8  ;;  %1664 = vmatmul.f32.gmra.mxu1 %v620_v11  ;;  %v748_v23 = vld [vmem:[#allocation2 + $0x91] sm:$0xff] }
 0x124   : > { %1887 = vmatmul.f32.gmra.mxu3 %v747_v12  ;;  %1780 = vmatmul.f32.gmra.mxu2 %v549_v10  ;;  %v1548_v11 = vld [vmem:[#allocation9 + $0x238] sm:$0xff] }
 0x125   : > { %2081 = vmatpush.msrb.mxu2 %v1548_v11  ;;  %v1528_v11 = vld [vmem:[#allocation9 + $0x198] sm:$0xff] }
 0x128   : > { %v464_v16 = vpop.f32.mrf.mxu0 }
 0x129   : > { %v550_v21 = vmax.f32 %v464_v16, 0.0 }
 0x12a   : > { %v621_v20 = vld [vmem:[#allocation2 + $0xa7] sm:$0xff] }
 0x12b   : > { %586 = vst [vmem:[#allocation2 + $0xb0] sm:$0xff] %v550_v21  ;;  %511 = vmatmul.f32.gmra.mxu0 %v389_v18  ;;  %1667 = vmatmul.f32.gmra.mxu1 %v621_v20  ;;  %v1532_v20 = vld [vmem:[#allocation9 + $0x1b8] sm:$0xff] }
 0x12c   : > { %1890 = vmatmul.f32.gmra.mxu3 %v748_v23  ;;  %1783 = vmatmul.f32.gmra.mxu2 %v550_v21 }
 0x12d   : > { %1968 = vmatpush.msrb.mxu1 %v1532_v20 }
 0x130   : > { %v467_v28 = vpop.f32.mrf.mxu0 }
 0x131   : > { %v551_v32 = vmax.f32 %v467_v28, 0.0 }
 0x132   : > { %v622_v36 = vld [vmem:[#allocation2 + $0xaf] sm:$0xff] }
 0x133   : > { %v749_v37 = vld [vmem:[#allocation2 + $0xa9] sm:$0xff]  ;;  %587 = vst [vmem:[#allocation2 + $0xc8] sm:$0xff] %v551_v32  ;;  %514 = vmatmul.f32.gmra.mxu0 %v390_v30  ;;  %1670 = vmatmul.f32.gmra.mxu1 %v622_v36  ;;  %v750_v55 = vld [vmem:[#allocation2 + $0xb1] sm:$0xff] }
 0x134   : > { %1893 = vmatmul.f32.gmra.mxu3 %v749_v37  ;;  %1786 = vmatmul.f32.gmra.mxu2 %v551_v32  ;;  %v1547_v36 = vld [vmem:[#allocation9 + $0x230] sm:$0xff] }
 0x135   : > { %2082 = vmatpush.msrb.mxu2 %v1547_v36 }
 0x138   : > { %v470_v42 = vpop.f32.mrf.mxu0 }
 0x139   : > { %v552_v50 = vmax.f32 %v470_v42, 0.0 }
 0x13a   : > { %v623_v52 = vld [vmem:[#allocation2 + $0xc7] sm:$0xff] }
 0x13b   : > { %588 = vst [vmem:[#allocation2 + $0xd0] sm:$0xff] %v552_v50  ;;  %517 = vmatmul.f32.gmra.mxu0 %v391_v46  ;;  %1673 = vmatmul.f32.gmra.mxu1 %v623_v52 }
 0x13c   : > { %1896 = vmatmul.f32.gmra.mxu3 %v750_v55  ;;  %1789 = vmatmul.f32.gmra.mxu2 %v552_v50  ;;  %v1531_v50 = vld [vmem:[#allocation9 + $0x1b0] sm:$0xff] }
 0x13d   : > { %1969 = vmatpush.msrb.mxu1 %v1531_v50  ;;  %v1542_v50 = vld [vmem:[#allocation9 + $0x208] sm:$0xff] }
 0x140   : > { %v473_v34 = vpop.f32.mrf.mxu0 }
 0x141   : > { %v553_v35 = vmax.f32 %v473_v34, 0.0 }
 0x142   : > { %v624_v39 = vld [vmem:[#allocation2 + $0xcf] sm:$0xff] }
 0x143   : > { %v751_v44 = vld [vmem:[#allocation2 + $0xc9] sm:$0xff]  ;;  %589 = vst [vmem:[#allocation2 + $0xe8] sm:$0xff] %v553_v35  ;;  %520 = vmatmul.f32.gmra.mxu0 %v392_v57  ;;  %1676 = vmatmul.f32.gmra.mxu1 %v624_v39  ;;  %v752_v60 = vld [vmem:[#allocation2 + $0xd1] sm:$0xff] }
 0x144   : > { %1899 = vmatmul.f32.gmra.mxu3 %v751_v44  ;;  %1792 = vmatmul.f32.gmra.mxu2 %v553_v35  ;;  %v1546_v35 = vld [vmem:[#allocation9 + $0x228] sm:$0xff] }
 0x145   : > { %v1530_v39 = vld [vmem:[#allocation9 + $0x1a8] sm:$0xff]  ;;  %2083 = vmatpush.msrb.mxu2 %v1546_v35 }
 0x146   : > { %1970 = vmatpush.msrb.mxu1 %v1530_v39  ;;  %v1526_v35 = vld [vmem:[#allocation9 + $0x188] sm:$0xff] }
 0x148   : > { %v476_v61 = vpop.f32.mrf.mxu0 }
 0x149   : > { %v554_v54 = vmax.f32 %v476_v61, 0.0  ;;  %v612_v61 = vld [vmem:[#allocation2 + $0xf] sm:$0xff] }
 0x14a   : > { %v625_v59 = vld [vmem:[#allocation2 + $0xe7] sm:$0xff] }
 0x14b   : > { %590 = vst [vmem:[#allocation2 + $0xf0] sm:$0xff] %v554_v54  ;;  %523 = vmatmul.f32.gmra.mxu0 %v393_v48  ;;  %1679 = vmatmul.f32.gmra.mxu1 %v625_v59  ;;  %v1572_v59 = vld [vmem:[#allocation9 + $0x2f8] sm:$0xff] }
 0x14c   : > { %1902 = vmatmul.f32.gmra.mxu3 %v752_v60  ;;  %1795 = vmatmul.f32.gmra.mxu2 %v554_v54  ;;  %v1545_v60 = vld [vmem:[#allocation9 + $0x220] sm:$0xff] }
 0x14d   : > { %2186 = vmatpush.msrb.mxu3 %v1572_v59  ;;  %2084 = vmatpush.msrb.mxu2 %v1545_v60  ;;  %v1567_v59 = vld [vmem:[#allocation9 + $0x2d0] sm:$0xff] }
 0x150   : > { %v479_v3 = vpop.f32.mrf.mxu0 }
 0x151   : > { %v555_v6 = vmax.f32 %v479_v3, 0.0  ;;  %v1529_v3 = vld [vmem:[#allocation9 + $0x1a0] sm:$0xff] }
 0x152   : > { %v626_v8 = vld [vmem:[#allocation2 + $0xef] sm:$0xff]  ;;  %1971 = vmatpush.msrb.mxu1 %v1529_v3  ;;  %v1541_v3 = vld [vmem:[#allocation9 + $0x200] sm:$0xff] }
 0x153   : > { %v753_v10 = vld [vmem:[#allocation2 + $0xe9] sm:$0xff]  ;;  %591 = vst [vmem:[#allocation2 + $0x108] sm:$0xff] %v555_v6  ;;  %526 = vmatmul.f32.gmra.mxu0 %v394_v5  ;;  %1682 = vmatmul.f32.gmra.mxu1 %v626_v8  ;;  %v754_v21 = vld [vmem:[#allocation2 + $0xf1] sm:$0xff] }
 0x154   : > { %1905 = vmatmul.f32.gmra.mxu3 %v753_v10  ;;  %1798 = vmatmul.f32.gmra.mxu2 %v555_v6  ;;  %v3761_v5 = vld [vmem:[#allocation2 + $0x2f] sm:$0xff]  ;;  %v1544_v10 = vld [vmem:[#allocation9 + $0x218] sm:$0xff] }
 0x155   : > { %v1571_v8 = vld [vmem:[#allocation9 + $0x2f0] sm:$0xff]  ;;  %2085 = vmatpush.msrb.mxu2 %v1544_v10  ;;  %1972 = vmatpush.msrb.mxu1 %v1528_v11  ;;  %v1525_v10 = vld [vmem:[#allocation9 + $0x180] sm:$0xff]  ;;  %v1564_v11 = vld [vmem:[#allocation9 + $0x2b8] sm:$0xff] }
 0x156   : > { %2187 = vmatpush.msrb.mxu3 %v1571_v8  ;;  %v1565_v8 = vld [vmem:[#allocation9 + $0x2c0] sm:$0xff] }
 0x158   : > { %v482_v12 = vpop.f32.mrf.mxu0 }
 0x159   : > { %v556_v16 = vmax.f32 %v482_v12, 0.0 }
 0x15a   : > { %v627_v18 = vld [vmem:[#allocation2 + $0x107] sm:$0xff] }
 0x15b   : > { %592 = vst [vmem:[#allocation2 + $0x110] sm:$0xff] %v556_v16  ;;  %529 = vmatmul.f32.gmra.mxu0 %v395_v14  ;;  %1685 = vmatmul.f32.gmra.mxu1 %v627_v18  ;;  %v3770_v14 = vld [vmem:[#allocation2 + $0x47] sm:$0xff] }
 0x15c   : > { %1908 = vmatmul.f32.gmra.mxu3 %v754_v21  ;;  %1801 = vmatmul.f32.gmra.mxu2 %v556_v16  ;;  %v1570_v21 = vld [vmem:[#allocation9 + $0x2e8] sm:$0xff] }
 0x15d   : > { %2188 = vmatpush.msrb.mxu3 %v1570_v21 }
 0x160   : > { %v485_v23 = vpop.f32.mrf.mxu0 }
 0x161   : > { %v557_v28 = vmax.f32 %v485_v23, 0.0  ;;  %v1543_v23 = vld [vmem:[#allocation9 + $0x210] sm:$0xff] }
 0x162   : > { %v628_v30 = vld [vmem:[#allocation2 + $0x10f] sm:$0xff]  ;;  %2086 = vmatpush.msrb.mxu2 %v1543_v23 }
 0x163   : > { %v755_v32 = vld [vmem:[#allocation2 + $0x109] sm:$0xff]  ;;  %593 = vst [vmem:[#allocation2 + $0x128] sm:$0xff] %v557_v28  ;;  %532 = vmatmul.f32.gmra.mxu0 %v396_v25  ;;  %1688 = vmatmul.f32.gmra.mxu1 %v628_v30  ;;  %v756_v46 = vld [vmem:[#allocation2 + $0x111] sm:$0xff] }
 0x164   : > { %1911 = vmatmul.f32.gmra.mxu3 %v755_v32  ;;  %1804 = vmatmul.f32.gmra.mxu2 %v557_v28  ;;  %v1527_v32 = vld [vmem:[#allocation9 + $0x190] sm:$0xff] }
 0x165   : > { %1973 = vmatpush.msrb.mxu1 %v1527_v32  ;;  %2087 = vmatpush.msrb.mxu2 %v1542_v50  ;;  %v1560_v32 = vld [vmem:[#allocation9 + $0x298] sm:$0xff]  ;;  %v1559_v50 = vld [vmem:[#allocation9 + $0x290] sm:$0xff] }
 0x167   : > { %1974 = vmatpush.msrb.mxu1 %v1526_v35  ;;  %2088 = vmatpush.msrb.mxu2 %v1541_v3 }
 0x168   : > { %v488_v37 = vpop.f32.mrf.mxu0 }
 0x169   : > { %v558_v40 = vmax.f32 %v488_v37, 0.0  ;;  %1975 = vmatpush.msrb.mxu1 %v1525_v10 }
 0x16a   : > { %v629_v42 = vld [vmem:[#allocation2 + $0x127] sm:$0xff] }
 0x16b   : > { %594 = vst [vmem:[#allocation2 + $0x130] sm:$0xff] %v558_v40  ;;  %535 = vmatmul.f32.gmra.mxu0 %v397_v38  ;;  %1691 = vmatmul.f32.gmra.mxu1 %v629_v42  ;;  %v3783_v38 = vld [vmem:[#allocation2 + $0x67] sm:$0xff] }
 0x16c   : > { %1914 = vmatmul.f32.gmra.mxu3 %v756_v46  ;;  %1807 = vmatmul.f32.gmra.mxu2 %v558_v40  ;;  %v1569_v46 = vld [vmem:[#allocation9 + $0x2e0] sm:$0xff] }
 0x16d   : > { %2189 = vmatpush.msrb.mxu3 %v1569_v46 }
 0x170   : > { %v491_v52 = vpop.f32.mrf.mxu0 }
 0x171   : > { %v559_v55 = vmax.f32 %v491_v52, 0.0 }
 0x172   : > { %v630_v34 = vld [vmem:[#allocation2 + $0x12f] sm:$0xff] }
 0x173   : > { %v757_v57 = vld [vmem:[#allocation2 + $0x129] sm:$0xff]  ;;  %595 = vst [vmem:[#allocation2 + $0x148] sm:$0xff] %v559_v55  ;;  %1637 = vmatmul.f32.vlgmr.msrb.gmra.mxu0 %v611_v33  ;;  %1694 = vmatmul.f32.gmra.mxu1 %v630_v34  ;;  %v758_v54 = vld [vmem:[#allocation2 + $0x131] sm:$0xff] }
 0x174   : > { %1917 = vmatmul.f32.gmra.mxu3 %v757_v57  ;;  %1810 = vmatmul.f32.gmra.mxu2 %v559_v55 }
 0x175   : > { %1847 = vmatpush.msrb.mxu0 %v3610_v41 }
 0x177   : > { %1848 = vmatpush.msrb.mxu0 %v3613_v43 }
 0x178   : > { %v494_v44 = vpop.f32.mrf.mxu0 }
 0x179   : > { %v560_v45 = vmax.f32 %v494_v44, 0.0  ;;  %1849 = vmatpush.msrb.mxu0 %v3621_v47 }
 0x17a   : > { %v631_v48 = vld [vmem:[#allocation2 + $0x147] sm:$0xff] }
 0x17b   : > { %596 = vst [vmem:[#allocation2 + $0x150] sm:$0xff] %v560_v45  ;;  %1640 = vmatmul.f32.gmra.mxu0 %v612_v61  ;;  %1697 = vmatmul.f32.gmra.mxu1 %v631_v48  ;;  %v1568_v48 = vld [vmem:[#allocation9 + $0x2d8] sm:$0xff] }
 0x17c   : > { %1920 = vmatmul.f32.gmra.mxu3 %v758_v54  ;;  %1813 = vmatmul.f32.gmra.mxu2 %v560_v45  ;;  %v675_v45 = vld [vmem:[#allocation2 + $0x8] sm:$0xff] }
 0x17d   : > { %1850 = vmatpush.msrb.mxu0 %v3631_v53  ;;  %2190 = vmatpush.msrb.mxu3 %v1568_v48 }
 0x17f   : > { %1851 = vmatpush.msrb.mxu0 %v3639_v56  ;;  %2191 = vmatpush.msrb.mxu3 %v1567_v59 }
 0x180   : > { %v497_v41 = vpop.f32.mrf.mxu0 }
 0x181   : > { %v561_v43 = vmax.f32 %v497_v41, 0.0  ;;  %1852 = vmatpush.msrb.mxu0 %v3643_v58 }
 0x182   : > { %v632_v1 = vld [vmem:[#allocation2 + $0x14f] sm:$0xff] }
 0x183   : > { %v759_v47 = vld [vmem:[#allocation2 + $0x149] sm:$0xff]  ;;  %597 = vst [vmem:[#allocation2 + $0x168] sm:$0xff] %v561_v43  ;;  %1643 = vmatmul.f32.gmra.mxu0 %v3754_v63  ;;  %1700 = vmatmul.f32.gmra.mxu1 %v632_v1  ;;  %v760_v58 = vld [vmem:[#allocation2 + $0x151] sm:$0xff] }
 0x184   : > { %1923 = vmatmul.f32.gmra.mxu3 %v759_v47  ;;  %1816 = vmatmul.f32.gmra.mxu2 %v561_v43 }
 0x185   : > { %1853 = vmatpush.msrb.mxu0 %v3651_v62 }
 0x187   : > { %1854 = vmatpush.msrb.mxu0 %v3661_v4 }
 0x188   : > { %v500_v53 = vpop.f32.mrf.mxu0 }
 0x189   : > { %v562_v56 = vmax.f32 %v500_v53, 0.0  ;;  %1855 = vmatpush.msrb.mxu0 %v3669_v7  ;;  %v1566_v53 = vld [vmem:[#allocation9 + $0x2c8] sm:$0xff] }
 0x18a   : > { %v633_v6 = vld [vmem:[#allocation2 + $0x167] sm:$0xff]  ;;  %2192 = vmatpush.msrb.mxu3 %v1566_v53 }
 0x18b   : > { %598 = vst [vmem:[#allocation2 + $0x170] sm:$0xff] %v562_v56  ;;  %1646 = vmatmul.f32.gmra.mxu0 %v3761_v5  ;;  %1703 = vmatmul.f32.gmra.mxu1 %v633_v6 }
 0x18c   : > { %1926 = vmatmul.f32.gmra.mxu3 %v760_v58  ;;  %1819 = vmatmul.f32.gmra.mxu2 %v562_v56 }
 0x18d   : > { %1856 = vmatpush.msrb.mxu0 %v3673_v9  ;;  %2193 = vmatpush.msrb.mxu3 %v1565_v8 }
 0x18e   : > { %v3764_v62 = vpop.f32.mrf.mxu2 }
 0x18f   : > { %1857 = vmatpush.msrb.mxu0 %v3681_v13  ;;  %2194 = vmatpush.msrb.mxu3 %v1564_v11 }
 0x190   : > { %v503_v4 = vpop.f32.mrf.mxu0  ;;  %v3767_v7 = vpop.f32.mrf.mxu1 }
 0x191   : > { %v563_v12 = vmax.f32 %v503_v4, 0.0  ;;  %1858 = vmatpush.msrb.mxu0 %v3691_v19  ;;  %v3777_v19 = vld [vmem:[#allocation2 + $0x4f] sm:$0xff] }
 0x192   : > { %v634_v16 = vld [vmem:[#allocation2 + $0x16f] sm:$0xff] }
 0x193   : > { %v761_v18 = vld [vmem:[#allocation2 + $0x169] sm:$0xff]  ;;  %599 = vst [vmem:[#allocation2 + $0x188] sm:$0xff] %v563_v12  ;;  %1649 = vmatmul.f32.gmra.mxu0 %v3770_v14  ;;  %1706 = vmatmul.f32.gmra.mxu1 %v634_v16  ;;  %v762_v30 = vld [vmem:[#allocation2 + $0x171] sm:$0xff] }
 0x194   : > { %1929 = vmatmul.f32.gmra.mxu3 %v761_v18  ;;  %1822 = vmatmul.f32.gmra.mxu2 %v563_v12  ;;  %v1563_v12 = vld [vmem:[#allocation9 + $0x2b0] sm:$0xff] }
 0x195   : > { %1859 = vmatpush.msrb.mxu0 %v3699_v22  ;;  %2195 = vmatpush.msrb.mxu3 %v1563_v12 }
 0x197   : > { %v1775_v9 = vpop.f32.mrf.mxu2  ;;  %1860 = vmatpush.msrb.mxu0 %v3703_v24  ;;  %v3781_v22 = vpop.f32.mrf.mxu3 }
 0x198   : > { %v506_v13 = vpop.f32.mrf.mxu0  ;;  %v1662_v20 = vpop.f32.mrf.mxu1 }
 0x199   : > { %v564_v25 = vmax.f32 %v506_v13, 0.0  ;;  %1861 = vmatpush.msrb.mxu0 %v3706_v26 }
 0x19a   : > { %v635_v28 = vld [vmem:[#allocation2 + $0x187] sm:$0xff] }
 0x19b   : > { %600 = vst [vmem:[#allocation2 + $0x190] sm:$0xff] %v564_v25  ;;  %1652 = vmatmul.f32.gmra.mxu0 %v3777_v19  ;;  %1709 = vmatmul.f32.gmra.mxu1 %v635_v28  ;;  %v1620_v28 = vld [vmem:[#allocation9 + $0x478] sm:$0xff] }
 0x19c   : > { %1932 = vmatmul.f32.gmra.mxu3 %v762_v30  ;;  %1825 = vmatmul.f32.gmra.mxu2 %v564_v25  ;;  %v1561_v25 = vld [vmem:[#allocation9 + $0x2a0] sm:$0xff] }
 0x19d   : > { %1862 = vmatpush.msrb.mxu0 %v3713_v31  ;;  %v1776_v31 = vadd.f32 %v1775_v9, %v1662_v20  ;;  %2525 = vmatpush.msra.mxu2 %v1620_v28 }
 0x19f   : > { %v1778_v24 = vpop.f32.mrf.mxu2 }
 0x1a0   : > { %v509_v36 = vpop.f32.mrf.mxu0  ;;  %v1665_v37 = vpop.f32.mrf.mxu1 }
 0x1a1   : > { %v565_v26 = vmax.f32 %v509_v36, 0.0  ;;  %v1779_v54 = vadd.f32 %v1778_v24, %v1665_v37 }
 0x1a2   : > { %v636_v40 = vld [vmem:[#allocation2 + $0x18f] sm:$0xff] }
 0x1a3   : > { %v763_v42 = vld [vmem:[#allocation2 + $0x189] sm:$0xff]  ;;  %601 = vst [vmem:[#allocation2 + $0x1a8] sm:$0xff] %v565_v26  ;;  %1655 = vmatmul.f32.gmra.mxu0 %v3783_v38  ;;  %1712 = vmatmul.f32.gmra.mxu1 %v636_v40  ;;  %v764_v61 = vld [vmem:[#allocation2 + $0x191] sm:$0xff] }
 0x1a4   : > { %1935 = vmatmul.f32.gmra.mxu3 %v763_v42  ;;  %1828 = vmatmul.f32.gmra.mxu2 %v565_v26  ;;  %v1604_v42 = vld [vmem:[#allocation9 + $0x3f8] sm:$0xff] }
 0x1a5   : > { %2412 = vmatpush.msra.mxu1 %v1604_v42  ;;  %v932_v42 = vld [vmem:[#allocation2 + $0x29] sm:$0xff] }
 0x1a7   : > { %v1888_v52 = vpop.f32.mrf.mxu3  ;;  %v1781_v55 = vpop.f32.mrf.mxu2 }
 0x1a8   : > { %v3786_v33 = vadd.f32 %v1888_v52, %v1776_v31  ;;  %v512_v34 = vpop.f32.mrf.mxu0  ;;  %v1668_v57 = vpop.f32.mrf.mxu1  ;;  %v1558_v31 = vld [vmem:[#allocation9 + $0x288] sm:$0xff] }
 0x1a9   : > { %v566_v39 = vmax.f32 %v512_v34, 0.0  ;;  %v1782_v4 = vadd.f32 %v1781_v55, %v1668_v57  ;;  %v1557_v55 = vld [vmem:[#allocation9 + $0x280] sm:$0xff] }
 0x1aa   : > { %v637_v44 = vld [vmem:[#allocation2 + $0x1a7] sm:$0xff] }
 0x1ab   : > { %602 = vst [vmem:[#allocation2 + $0x1b0] sm:$0xff] %v566_v39  ;;  %1715 = vmatmul.f32.gmra.mxu1 %v637_v44  ;;  %1750 = vmatmul.f32.vlgmr.msra.gmra.mxu0 %v675_v45 }
 0x1ac   : > { %1938 = vmatmul.f32.gmra.mxu3 %v764_v61  ;;  %1831 = vmatmul.f32.gmra.mxu2 %v566_v39 }
 0x1af   : > { %v1891_v60 = vpop.f32.mrf.mxu3  ;;  %v1784_v41 = vpop.f32.mrf.mxu2 }
 0x1b0   : > { %v3788_v43 = vadd.f32 %v1891_v60, %v1779_v54  ;;  %v515_v1 = vpop.f32.mrf.mxu0  ;;  %v1671_v47 = vpop.f32.mrf.mxu1 }
 0x1b1   : > { %v567_v56 = vmax.f32 %v515_v1, 0.0  ;;  %v1785_v30 = vadd.f32 %v1784_v41, %v1671_v47  ;;  %v1603_v47 = vld [vmem:[#allocation9 + $0x3f0] sm:$0xff] }
 0x1b2   : > { %v638_v6 = vld [vmem:[#allocation2 + $0x1af] sm:$0xff]  ;;  %2413 = vmatpush.msra.mxu1 %v1603_v47 }
 0x1b3   : > { %v765_v58 = vld [vmem:[#allocation2 + $0x1a9] sm:$0xff]  ;;  %603 = vst [vmem:[#allocation2 + $0x1c8] sm:$0xff] %v567_v56  ;;  %1718 = vmatmul.f32.gmra.mxu1 %v638_v6  ;;  %1753 = vmatmul.f32.gmra.mxu0 %v540_v51  ;;  %v766_v23 = vld [vmem:[#allocation2 + $0x1b1] sm:$0xff] }
 0x1b4   : > { %1941 = vmatmul.f32.gmra.mxu3 %v765_v58  ;;  %1834 = vmatmul.f32.gmra.mxu2 %v567_v56  ;;  %v1562_v51 = vld [vmem:[#allocation9 + $0x2a8] sm:$0xff]  ;;  %v3806_v56 = vld [vmem:[#allocation2 + $0x50] sm:$0xff] }
 0x1b5   : > { %2196 = vmatpush.msrb.mxu3 %v1562_v51 }
 0x1b7   : > { %v1894_v16 = vpop.f32.mrf.mxu3  ;;  %v1787_v18 = vpop.f32.mrf.mxu2  ;;  %2197 = vmatpush.msrb.mxu3 %v1561_v25  ;;  %v1587_v25 = vld [vmem:[#allocation9 + $0x370] sm:$0xff] }
 0x1b8   : > { %v3792_v21 = vadd.f32 %v1894_v16, %v1782_v4  ;;  %v518_v9 = vpop.f32.mrf.mxu0  ;;  %v1674_v13 = vpop.f32.mrf.mxu1  ;;  %v3811_v16 = vld [vmem:[#allocation2 + $0x68] sm:$0xff] }
 0x1b9   : > { %v568_v20 = vmax.f32 %v518_v9, 0.0  ;;  %2198 = vmatpush.msrb.mxu3 %v1560_v32  ;;  %v1788_v52 = vadd.f32 %v1787_v18, %v1674_v13  ;;  %v869_v9 = vld [vmem:[#allocation2 + $0x30] sm:$0xff]  ;;  %v1618_v13 = vld [vmem:[#allocation9 + $0x468] sm:$0xff] }
 0x1ba   : > { %v639_v49 = vld [vmem:[#allocation2 + $0x1c7] sm:$0xff] }
 0x1bb   : > { %604 = vst [vmem:[#allocation2 + $0x1d0] sm:$0xff] %v568_v20  ;;  %1721 = vmatmul.f32.gmra.mxu1 %v639_v49  ;;  %1756 = vmatmul.f32.gmra.mxu0 %v541_v2 }
 0x1bc   : > { %1944 = vmatmul.f32.gmra.mxu3 %v766_v23  ;;  %1837 = vmatmul.f32.gmra.mxu2 %v568_v20  ;;  %v1588_v20 = vld [vmem:[#allocation9 + $0x378] sm:$0xff] }
 0x1bd   : > { %2199 = vmatpush.msrb.mxu3 %v1559_v50  ;;  %2299 = vmatpush.msra.mxu0 %v1588_v20  ;;  %v1616_v20 = vld [vmem:[#allocation9 + $0x458] sm:$0xff] }
 0x1bf   : > { %v1897_v24 = vpop.f32.mrf.mxu3  ;;  %v1790_v36 = vpop.f32.mrf.mxu2  ;;  %2200 = vmatpush.msrb.mxu3 %v1558_v31  ;;  %2300 = vmatpush.msra.mxu0 %v1587_v25 }
 0x1c0   : > { %v3796_v37 = vadd.f32 %v1897_v24, %v1785_v30  ;;  %v521_v26 = vpop.f32.mrf.mxu0  ;;  %v1677_v40 = vpop.f32.mrf.mxu1  ;;  %v1602_v24 = vld [vmem:[#allocation9 + $0x3e8] sm:$0xff] }
 0x1c1   : > { %v569_v46 = vmax.f32 %v521_v26, 0.0  ;;  %2201 = vmatpush.msrb.mxu3 %v1557_v55  ;;  %v1791_v48 = vadd.f32 %v1790_v36, %v1677_v40  ;;  %v1586_v36 = vld [vmem:[#allocation9 + $0x368] sm:$0xff]  ;;  %2414 = vmatpush.msra.mxu1 %v1602_v24  ;;  %v1585_v40 = vld [vmem:[#allocation9 + $0x360] sm:$0xff] }
 0x1c2   : > { %v640_v0 = vld [vmem:[#allocation2 + $0x1cf] sm:$0xff]  ;;  %2301 = vmatpush.msra.mxu0 %v1586_v36  ;;  %v1600_v36 = vld [vmem:[#allocation9 + $0x3d8] sm:$0xff] }
 0x1c3   : > { %v767_v2 = vld [vmem:[#allocation2 + $0x1c9] sm:$0xff]  ;;  %605 = vst [vmem:[#allocation2 + $0x1e8] sm:$0xff] %v569_v46  ;;  %1724 = vmatmul.f32.gmra.mxu1 %v640_v0  ;;  %1759 = vmatmul.f32.gmra.mxu0 %v542_v17  ;;  %v768_v15 = vld [vmem:[#allocation2 + $0x1d1] sm:$0xff] }
 0x1c4   : > { %1947 = vmatmul.f32.gmra.mxu3 %v767_v2  ;;  %1840 = vmatmul.f32.gmra.mxu2 %v569_v46  ;;  %v1619_v17 = vld [vmem:[#allocation9 + $0x470] sm:$0xff]  ;;  %v870_v46 = vld [vmem:[#allocation2 + $0x48] sm:$0xff]  ;;  %v1584_v0 = vld [vmem:[#allocation9 + $0x358] sm:$0xff] }
 0x1c5   : > { %2526 = vmatpush.msra.mxu2 %v1619_v17  ;;  %2302 = vmatpush.msra.mxu0 %v1585_v40  ;;  %v936_v40 = vld [vmem:[#allocation2 + $0x69] sm:$0xff] }
 0x1c7   : > { %v1900_v34 = vpop.f32.mrf.mxu3  ;;  %v1793_v57 = vpop.f32.mrf.mxu2  ;;  %2527 = vmatpush.msra.mxu2 %v1618_v13  ;;  %2303 = vmatpush.msra.mxu0 %v1584_v0  ;;  %v873_v13 = vld [vmem:[#allocation2 + $0x70] sm:$0xff] }
 0x1c8   : > { %v3800_v35 = vadd.f32 %v1900_v34, %v1788_v52  ;;  %v524_v39 = vpop.f32.mrf.mxu0  ;;  %v1680_v44 = vpop.f32.mrf.mxu1  ;;  %v1583_v52 = vld [vmem:[#allocation9 + $0x350] sm:$0xff] }
 0x1c9   : > { %v570_v45 = vmax.f32 %v524_v39, 0.0  ;;  %v1794_v6 = vadd.f32 %v1793_v57, %v1680_v44  ;;  %2304 = vmatpush.msra.mxu0 %v1583_v52  ;;  %v740_v44 = vld [vmem:[#allocation2 + $0x11] sm:$0xff] }
 0x1ca   : > { %v641_v61 = vld [vmem:[#allocation2 + $0x1e7] sm:$0xff] }
 0x1cb   : > { %606 = vst [vmem:[#allocation2 + $0x1f0] sm:$0xff] %v570_v45  ;;  %1727 = vmatmul.f32.gmra.mxu1 %v641_v61  ;;  %1762 = vmatmul.f32.gmra.mxu0 %v543_v29  ;;  %v868_v29 = vld [vmem:[#allocation2 + $0x28] sm:$0xff]  ;;  %v1581_v61 = vld [vmem:[#allocation9 + $0x340] sm:$0xff] }
 0x1cc   : > { %1950 = vmatmul.f32.gmra.mxu3 %v768_v15  ;;  %1843 = vmatmul.f32.gmra.mxu2 %v570_v45  ;;  %v1582_v45 = vld [vmem:[#allocation9 + $0x348] sm:$0xff]  ;;  %v1617_v15 = vld [vmem:[#allocation9 + $0x460] sm:$0xff] }
 0x1cd   : > { %2305 = vmatpush.msra.mxu0 %v1582_v45  ;;  %2528 = vmatpush.msra.mxu2 %v1617_v15 }
 0x1cf   : > { %v1903_v54 = vpop.f32.mrf.mxu3  ;;  %v1796_v59 = vpop.f32.mrf.mxu2  ;;  %2306 = vmatpush.msra.mxu0 %v1581_v61  ;;  %2529 = vmatpush.msra.mxu2 %v1616_v20 }
 0x1d0   : > { %v3804_v60 = vadd.f32 %v1903_v54, %v1791_v48  ;;  %v527_v41 = vpop.f32.mrf.mxu0  ;;  %v1683_v1 = vpop.f32.mrf.mxu1  ;;  %v1580_v48 = vld [vmem:[#allocation9 + $0x338] sm:$0xff] }
 0x1d1   : > { %v571_v3 = vmax.f32 %v527_v41, 0.0  ;;  %v1797_v49 = vadd.f32 %v1796_v59, %v1683_v1  ;;  %2307 = vmatpush.msra.mxu0 %v1580_v48 }
 0x1d2   : > { %v642_v53 = vld [vmem:[#allocation2 + $0x1ef] sm:$0xff] }
 0x1d3   : > { %v769_v27 = vld [vmem:[#allocation2 + $0x1e9] sm:$0xff]  ;;  %607 = vst [vmem:[#allocation2 + $0x208] sm:$0xff] %v571_v3  ;;  %1730 = vmatmul.f32.gmra.mxu1 %v642_v53  ;;  %1765 = vmatmul.f32.gmra.mxu0 %v3806_v56  ;;  %v770_v18 = vld [vmem:[#allocation2 + $0x1f1] sm:$0xff]  ;;  %v1601_v3 = vld [vmem:[#allocation9 + $0x3e0] sm:$0xff] }
 0x1d4   : > { %1953 = vmatmul.f32.gmra.mxu3 %v769_v27  ;;  %2089 = vmatmul.f32.vlgmr.msrb.gmra.mxu2 %v868_v29  ;;  %v1579_v53 = vld [vmem:[#allocation9 + $0x330] sm:$0xff]  ;;  %v1578_v27 = vld [vmem:[#allocation9 + $0x328] sm:$0xff] }
 0x1d5   : > { %2415 = vmatpush.msra.mxu1 %v1601_v3  ;;  %2308 = vmatpush.msra.mxu0 %v1579_v53  ;;  %v876_v3 = vld [vmem:[#allocation2 + $0xa8] sm:$0xff] }
 0x1d7   : > { %v1906_v58 = vpop.f32.mrf.mxu3  ;;  %v1799_v8 = vpop.f32.mrf.mxu2  ;;  %2309 = vmatpush.msra.mxu0 %v1578_v27  ;;  %2416 = vmatpush.msra.mxu1 %v1600_v36  ;;  %v878_v36 = vld [vmem:[#allocation2 + $0xc8] sm:$0xff] }
 0x1d8   : > { %v3809_v10 = vadd.f32 %v1906_v58, %v1794_v6  ;;  %v530_v11 = vpop.f32.mrf.mxu0  ;;  %v1686_v4 = vpop.f32.mrf.mxu1  ;;  %v1577_v6 = vld [vmem:[#allocation9 + $0x320] sm:$0xff] }
 0x1d9   : > { %v572_v12 = vmax.f32 %v530_v11, 0.0  ;;  %v1800_v2 = vadd.f32 %v1799_v8, %v1686_v4  ;;  %2310 = vmatpush.msra.mxu0 %v1577_v6 }
 0x1db   : > { %608 = vst [vmem:[#allocation2 + $0x210] sm:$0xff] %v572_v12  ;;  %1768 = vmatmul.f32.gmra.mxu0 %v3811_v16  ;;  %1976 = vmatmul.f32.vlgmr.msrb.gmra.mxu1 %v3754_v63  ;;  %v739_v63 = vld [vmem:[#allocation2 + $0x9] sm:$0xff] }
 0x1dc   : > { %1956 = vmatmul.f32.gmra.mxu3 %v770_v18  ;;  %2092 = vmatmul.f32.gmra.mxu2 %v869_v9  ;;  %v1576_v18 = vld [vmem:[#allocation9 + $0x318] sm:$0xff] }
 0x1dd   : > { %v935_v9 = vld [vmem:[#allocation2 + $0x51] sm:$0xff]  ;;  %2311 = vmatpush.msra.mxu0 %v1576_v18 }
 0x1de   : > { %v877_v18 = vld [vmem:[#allocation2 + $0xb0] sm:$0xff] }
 0x1df   : > { %v1909_v51 = vpop.f32.mrf.mxu3  ;;  %v1802_v23 = vpop.f32.mrf.mxu2 }
 0x1e0   : > { %v3815_v28 = vadd.f32 %v1909_v51, %v1797_v49  ;;  %v533_v30 = vpop.f32.mrf.mxu0  ;;  %v1689_v32 = vpop.f32.mrf.mxu1  ;;  %v1574_v51 = vld [vmem:[#allocation9 + $0x308] sm:$0xff] }
 0x1e1   : > { %v573_v26 = vmax.f32 %v533_v30, 0.0  ;;  %v1803_v17 = vadd.f32 %v1802_v23, %v1689_v32 }
 0x1e3   : > { %609 = vst [vmem:[#allocation2 + $0x228] sm:$0xff] %v573_v26  ;;  %1863 = vmatmul.f32.vlgmr.msrb.gmra.mxu0 %v739_v63  ;;  %1979 = vmatmul.f32.gmra.mxu1 %v3761_v5  ;;  %v933_v5 = vld [vmem:[#allocation2 + $0x31] sm:$0xff]  ;;  %v1573_v63 = vld [vmem:[#allocation9 + $0x300] sm:$0xff] }
 0x1e4   : > { %2202 = vmatmul.f32.vlgmr.msrb.gmra.mxu3 %v932_v42  ;;  %2095 = vmatmul.f32.gmra.mxu2 %v870_v46  ;;  %v3837_v26 = vld [vmem:[#allocation2 + $0x6f] sm:$0xff] }
 0x1e7   : > { %v1912_v50 = vpop.f32.mrf.mxu3  ;;  %v1805_v31 = vpop.f32.mrf.mxu2 }
 0x1e8   : > { %v3818_v55 = vadd.f32 %v1912_v50, %v1800_v2  ;;  %v536_v34 = vpop.f32.mrf.mxu0  ;;  %v1692_v57 = vpop.f32.mrf.mxu1 }
 0x1e9   : > { %v574_v39 = vmax.f32 %v536_v34, 0.0  ;;  %v1806_v29 = vadd.f32 %v1805_v31, %v1692_v57  ;;  %v3844_v34 = vld [vmem:[#allocation2 + $0x87] sm:$0xff]  ;;  %v937_v57 = vld [vmem:[#allocation2 + $0x71] sm:$0xff] }
 0x1eb   : > { %610 = vst [vmem:[#allocation2 + $0x230] sm:$0xff] %v574_v39  ;;  %1866 = vmatmul.f32.gmra.mxu0 %v740_v44  ;;  %1982 = vmatmul.f32.gmra.mxu1 %v3770_v14  ;;  %v875_v39 = vld [vmem:[#allocation2 + $0x90] sm:$0xff] }
 0x1ec   : > { %2205 = vmatmul.f32.gmra.mxu3 %v933_v5  ;;  %2098 = vmatmul.f32.gmra.mxu2 %v3806_v56  ;;  %v934_v56 = vld [vmem:[#allocation2 + $0x49] sm:$0xff] }
 0x1ed   : > { %v1615_v44 = vld [vmem:[#allocation9 + $0x450] sm:$0xff] }
 0x1ee   : > { %2530 = vmatpush.msra.mxu2 %v1615_v44 }
 0x1ef   : > { %v1915_v54 = vpop.f32.mrf.mxu3  ;;  %v1808_v59 = vpop.f32.mrf.mxu2 }
 0x1f0   : > { %v3822_v41 = vadd.f32 %v1915_v54, %v1803_v17  ;;  %v3824_v1 = vpop.f32.mrf.mxu0  ;;  %v1695_v47 = vpop.f32.mrf.mxu1  ;;  %v1599_v54 = vld [vmem:[#allocation9 + $0x3d0] sm:$0xff] }
 0x1f1   : > { %v1809_v49 = vadd.f32 %v1808_v59, %v1695_v47  ;;  %2417 = vmatpush.msra.mxu1 %v1599_v54  ;;  %v3851_v59 = vld [vmem:[#allocation2 + $0x8f] sm:$0xff] }
 0x1f2   : > { %v938_v47 = vld [vmem:[#allocation2 + $0x89] sm:$0xff] }
 0x1f3   : > { %1869 = vmatmul.f32.gmra.mxu0 %v932_v42  ;;  %1985 = vmatmul.f32.gmra.mxu1 %v3777_v19  ;;  %v874_v42 = vld [vmem:[#allocation2 + $0x88] sm:$0xff] }
 0x1f4   : > { %2208 = vmatmul.f32.gmra.mxu3 %v934_v56  ;;  %2101 = vmatmul.f32.gmra.mxu2 %v3811_v16  ;;  %v1575_v16 = vld [vmem:[#allocation9 + $0x310] sm:$0xff] }
 0x1f5   : > { %2312 = vmatpush.msra.mxu0 %v1575_v16 }
 0x1f7   : > { %v1918_v58 = vpop.f32.mrf.mxu3  ;;  %v1811_v8 = vpop.f32.mrf.mxu2  ;;  %2313 = vmatpush.msra.mxu0 %v1574_v51 }
 0x1f8   : > { %v3828_v11 = vadd.f32 %v1918_v58, %v1806_v29  ;;  %v3830_v4 = vpop.f32.mrf.mxu0  ;;  %v1698_v12 = vpop.f32.mrf.mxu1 }
 0x1f9   : > { %2314 = vmatpush.msra.mxu0 %v1573_v63  ;;  %v1812_v46 = vadd.f32 %v1811_v8, %v1698_v12  ;;  %v3858_v8 = vld [vmem:[#allocation2 + $0xa7] sm:$0xff]  ;;  %v939_v12 = vld [vmem:[#allocation2 + $0x91] sm:$0xff] }
 0x1fb   : > { %1872 = vmatmul.f32.gmra.mxu0 %v933_v5  ;;  %1988 = vmatmul.f32.gmra.mxu1 %v3783_v38 }
 0x1fc   : > { %2211 = vmatmul.f32.gmra.mxu3 %v935_v9  ;;  %2104 = vmatmul.f32.gmra.mxu2 %v873_v13 }
 0x1ff   : > { %v1921_v23 = vpop.f32.mrf.mxu3  ;;  %v1814_v25 = vpop.f32.mrf.mxu2 }
 0x200   : > { %v3833_v30 = vadd.f32 %v1921_v23, %v1809_v49  ;;  %v3835_v32 = vpop.f32.mrf.mxu0  ;;  %v1701_v24 = vpop.f32.mrf.mxu1 }
 0x201   : > { %v1815_v45 = vadd.f32 %v1814_v25, %v1701_v24  ;;  %v1598_v25 = vld [vmem:[#allocation9 + $0x3c8] sm:$0xff] }
 0x202   : > { %2418 = vmatpush.msra.mxu1 %v1598_v25  ;;  %v3866_v24 = vld [vmem:[#allocation2 + $0xaf] sm:$0xff] }
 0x203   : > { %1875 = vmatmul.f32.gmra.mxu0 %v934_v56  ;;  %1991 = vmatmul.f32.gmra.mxu1 %v3837_v26 }
 0x204   : > { %2214 = vmatmul.f32.gmra.mxu3 %v936_v40  ;;  %2107 = vmatmul.f32.gmra.mxu2 %v874_v42 }
 0x207   : > { %v1924_v0 = vpop.f32.mrf.mxu3  ;;  %v1817_v2 = vpop.f32.mrf.mxu2 }
 0x208   : > { %v3840_v50 = vadd.f32 %v1924_v0, %v1812_v46  ;;  %v3842_v31 = vpop.f32.mrf.mxu0  ;;  %v1704_v52 = vpop.f32.mrf.mxu1 }
 0x209   : > { %v1818_v53 = vadd.f32 %v1817_v2, %v1704_v52  ;;  %v3874_v52 = vld [vmem:[#allocation2 + $0xc7] sm:$0xff] }
 0x20b   : > { %1878 = vmatmul.f32.gmra.mxu0 %v935_v9  ;;  %1994 = vmatmul.f32.gmra.mxu1 %v3844_v34  ;;  %v1614_v9 = vld [vmem:[#allocation9 + $0x448] sm:$0xff] }
 0x20c   : > { %2217 = vmatmul.f32.gmra.mxu3 %v937_v57  ;;  %2110 = vmatmul.f32.gmra.mxu2 %v875_v39  ;;  %v941_v57 = vld [vmem:[#allocation2 + $0xb1] sm:$0xff] }
 0x20d   : > { %2531 = vmatpush.msra.mxu2 %v1614_v9  ;;  %v879_v39 = vld [vmem:[#allocation2 + $0xd0] sm:$0xff] }
 0x20f   : > { %v1927_v5 = vpop.f32.mrf.mxu3  ;;  %v1820_v61 = vpop.f32.mrf.mxu2 }
 0x210   : > { %v3847_v15 = vadd.f32 %v1927_v5, %v1815_v45  ;;  %v3849_v17 = vpop.f32.mrf.mxu0  ;;  %v1707_v48 = vpop.f32.mrf.mxu1 }
 0x211   : > { %v1821_v13 = vadd.f32 %v1820_v61, %v1707_v48 }
 0x213   : > { %1881 = vmatmul.f32.gmra.mxu0 %v936_v40  ;;  %1997 = vmatmul.f32.gmra.mxu1 %v3851_v59 }
 0x214   : > { %2220 = vmatmul.f32.gmra.mxu3 %v938_v47  ;;  %2113 = vmatmul.f32.gmra.mxu2 %v876_v3  ;;  %v1597_v47 = vld [vmem:[#allocation9 + $0x3c0] sm:$0xff]  ;;  %v3882_v3 = vld [vmem:[#allocation2 + $0xcf] sm:$0xff] }
 0x215   : > { %2419 = vmatpush.msra.mxu1 %v1597_v47 }
 0x217   : > { %v1930_v56 = vpop.f32.mrf.mxu3  ;;  %v1823_v27 = vpop.f32.mrf.mxu2 }
 0x218   : > { %v3854_v29 = vadd.f32 %v1930_v56, %v1818_v53  ;;  %v3856_v6 = vpop.f32.mrf.mxu0  ;;  %v1710_v58 = vpop.f32.mrf.mxu1  ;;  %v880_v53 = vld [vmem:[#allocation2 + $0xe8] sm:$0xff] }
 0x219   : > { %v1824_v63 = vadd.f32 %v1823_v27, %v1710_v58 }
 0x21b   : > { %2000 = vmatmul.f32.gmra.mxu1 %v3858_v8  ;;  %2315 = vmatmul.f32.vlgmr.msra.gmra.mxu0 %v3770_v14  ;;  %v940_v14 = vld [vmem:[#allocation2 + $0xa9] sm:$0xff] }
 0x21c   : > { %2223 = vmatmul.f32.gmra.mxu3 %v939_v12  ;;  %2116 = vmatmul.f32.gmra.mxu2 %v877_v18 }
 0x21f   : > { %v1933_v16 = vpop.f32.mrf.mxu3  ;;  %v1826_v20 = vpop.f32.mrf.mxu2 }
 0x220   : > { %v3862_v49 = vadd.f32 %v1933_v16, %v1821_v13  ;;  %v3864_v51 = vpop.f32.mrf.mxu0  ;;  %v1713_v23 = vpop.f32.mrf.mxu1  ;;  %v3893_v13 = vld [vmem:[#allocation2 + $0xe7] sm:$0xff]  ;;  %v3896_v16 = vld [vmem:[#allocation2 + $0xd1] sm:$0xff] }
 0x221   : > { %v1827_v44 = vadd.f32 %v1826_v20, %v1713_v23  ;;  %v1612_v20 = vld [vmem:[#allocation9 + $0x438] sm:$0xff] }
 0x223   : > { %2003 = vmatmul.f32.gmra.mxu1 %v3866_v24  ;;  %2318 = vmatmul.f32.gmra.mxu0 %v3777_v19  ;;  %v1613_v19 = vld [vmem:[#allocation9 + $0x440] sm:$0xff] }
 0x224   : > { %2226 = vmatmul.f32.gmra.mxu3 %v940_v14  ;;  %2119 = vmatmul.f32.gmra.mxu2 %v878_v36 }
 0x225   : > { %2532 = vmatpush.msra.mxu2 %v1613_v19 }
 0x227   : > { %v1936_v40 = vpop.f32.mrf.mxu3  ;;  %v1829_v42 = vpop.f32.mrf.mxu2  ;;  %2533 = vmatpush.msra.mxu2 %v1612_v20 }
 0x228   : > { %v3870_v46 = vadd.f32 %v1936_v40, %v1824_v63  ;;  %v1716_v0 = vpop.f32.mrf.mxu1  ;;  %v3872_v2 = vpop.f32.mrf.mxu0 }
 0x229   : > { %v1830_v56 = vadd.f32 %v1829_v42, %v1716_v0  ;;  %v1596_v42 = vld [vmem:[#allocation9 + $0x3b8] sm:$0xff]  ;;  %v3907_v0 = vld [vmem:[#allocation2 + $0xef] sm:$0xff] }
 0x22a   : > { %2420 = vmatpush.msra.mxu1 %v1596_v42 }
 0x22b   : > { %2006 = vmatmul.f32.gmra.mxu1 %v3874_v52  ;;  %2321 = vmatmul.f32.gmra.mxu0 %v3783_v38  ;;  %v3885_v38 = vld [vmem:[#allocation2 + $0xc9] sm:$0xff] }
 0x22c   : > { %2229 = vmatmul.f32.gmra.mxu3 %v941_v57  ;;  %2122 = vmatmul.f32.gmra.mxu2 %v879_v39  ;;  %v3913_v57 = vld [vmem:[#allocation2 + $0x108] sm:$0xff]  ;;  %v2685_v39 = vld [vmem:[#allocation10 + $0x78] sm:$0xff] }
 0x22d   : > { %4539 = vst [vmem:[#allocation18_spill] sm:$0xff] %v3913_v57  ;;  %2686 = vmatpush.msra.mxu3 %v2685_v39  ;;  %v1595_v39 = vld [vmem:[#allocation9 + $0x3b0] sm:$0xff] }
 0x22e   : > { %2421 = vmatpush.msra.mxu1 %v1595_v39 }
 0x22f   : > { %v1939_v45 = vpop.f32.mrf.mxu3  ;;  %v1832_v5 = vpop.f32.mrf.mxu2 }
 0x230   : > { %v3878_v61 = vadd.f32 %v1939_v45, %v1827_v44  ;;  %v1719_v48 = vpop.f32.mrf.mxu1  ;;  %v3880_v54 = vpop.f32.mrf.mxu0 }
 0x231   : > { %v1833_v23 = vadd.f32 %v1832_v5, %v1719_v48 }
 0x233   : > { %2009 = vmatmul.f32.gmra.mxu1 %v3882_v3  ;;  %2324 = vmatmul.f32.gmra.mxu0 %v3837_v26  ;;  %v3899_v26 = vld [vmem:[#allocation2 + $0xf0] sm:$0xff] }
 0x234   : > { %2232 = vmatmul.f32.gmra.mxu3 %v3885_v38  ;;  %2125 = vmatmul.f32.gmra.mxu2 %v880_v53  ;;  %4538 = vst [vmem:[#allocation17_spill] sm:$0xff] %v3899_v26  ;;  %v3921_v53 = vld [vmem:[#allocation2 + $0x107] sm:$0xff] }
 0x237   : > { %v1942_v27 = vpop.f32.mrf.mxu3  ;;  %v1835_v58 = vpop.f32.mrf.mxu2 }
 0x238   : > { %v3889_v12 = vadd.f32 %v1942_v27, %v1830_v56  ;;  %v1722_v18 = vpop.f32.mrf.mxu1  ;;  %v3891_v9 = vpop.f32.mrf.mxu0  ;;  %v3927_v56 = vld [vmem:[#allocation2 + $0x110] sm:$0xff] }
 0x239   : > { %v1836_v19 = vadd.f32 %v1835_v58, %v1722_v18  ;;  %4541 = vst [vmem:[#allocation20_spill] sm:$0xff] %v3927_v56  ;;  %v1611_v27 = vld [vmem:[#allocation9 + $0x430] sm:$0xff] }
 0x23a   : > { %2534 = vmatpush.msra.mxu2 %v1611_v27 }
 0x23b   : > { %2012 = vmatmul.f32.gmra.mxu1 %v3893_v13  ;;  %2327 = vmatmul.f32.gmra.mxu0 %v3844_v34  ;;  %v3910_v34 = vld [vmem:[#allocation2 + $0xe9] sm:$0xff] }
 0x23c   : > { %2235 = vmatmul.f32.gmra.mxu3 %v3896_v16  ;;  %2128 = vmatmul.f32.gmra.mxu2 %v3899_v26  ;;  %v3963_v26 = vld [vmem:[#allocation2 + $0x12f] sm:$0xff] }
 0x23f   : > { %v1945_v25 = vpop.f32.mrf.mxu3  ;;  %v1838_v14 = vpop.f32.mrf.mxu2 }
 0x240   : > { %v3903_v36 = vadd.f32 %v1945_v25, %v1833_v23  ;;  %v1725_v63 = vpop.f32.mrf.mxu1  ;;  %v3905_v40 = vpop.f32.mrf.mxu0 }
 0x241   : > { %v1839_v58 = vadd.f32 %v1838_v14, %v1725_v63  ;;  %v2684_v14 = vld [vmem:[#allocation10 + $0x70] sm:$0xff] }
 0x242   : > { %2687 = vmatpush.msra.mxu3 %v2684_v14  ;;  %v1752_v14 = vadd.f32 %v3872_v2, %v3824_v1  ;;  %v2683_v1 = vld [vmem:[#allocation10 + $0x68] sm:$0xff] }
 0x243   : > { %2015 = vmatmul.f32.gmra.mxu1 %v3907_v0  ;;  %2330 = vmatmul.f32.gmra.mxu0 %v3851_v59  ;;  %v3924_v59 = vld [vmem:[#allocation2 + $0xf1] sm:$0xff] }
 0x244   : > { %2238 = vmatmul.f32.gmra.mxu3 %v3910_v34  ;;  %2131 = vmatmul.f32.gmra.mxu2 %v3913_v57  ;;  %v3955_v57 = vld [vmem:[#allocation2 + $0x130] sm:$0xff] }
 0x245   : > { %4547 = vst [vmem:[#allocation26_spill] sm:$0xff] %v3955_v57  ;;  %2688 = vmatpush.msra.mxu3 %v2683_v1 }
 0x247   : > { %v1948_v44 = vpop.f32.mrf.mxu3  ;;  %v1841_v45 = vpop.f32.mrf.mxu2 }
 0x248   : > { %v3917_v5 = vadd.f32 %v1948_v44, %v1836_v19  ;;  %v1728_v48 = vpop.f32.mrf.mxu1  ;;  %v3919_v47 = vpop.f32.mrf.mxu0  ;;  %v3935_v19 = vld [vmem:[#allocation2 + $0x10f] sm:$0xff] }
 0x249   : > { %v3941_v44 = vld [vmem:[#allocation2 + $0x128] sm:$0xff]  ;;  %v1842_v63 = vadd.f32 %v1841_v45, %v1728_v48 }
 0x24a   : > { %4540 = vst [vmem:[#allocation19_spill] sm:$0xff] %v3917_v5  ;;  %v1610_v45 = vld [vmem:[#allocation9 + $0x428] sm:$0xff] }
 0x24b   : > { %2018 = vmatmul.f32.gmra.mxu1 %v3921_v53  ;;  %2333 = vmatmul.f32.gmra.mxu0 %v3858_v8  ;;  %v3938_v8 = vld [vmem:[#allocation2 + $0x109] sm:$0xff]  ;;  %4544 = vst [vmem:[#allocation23_spill] sm:$0xff] %v3941_v44 }
 0x24c   : > { %2241 = vmatmul.f32.gmra.mxu3 %v3924_v59  ;;  %2134 = vmatmul.f32.gmra.mxu2 %v3927_v56  ;;  %4543 = vst [vmem:[#allocation22_spill] sm:$0xff] %v3938_v8 }
 0x24d   : > { %2535 = vmatpush.msra.mxu2 %v1610_v45 }
 0x24f   : > { %v1951_v18 = vpop.f32.mrf.mxu3  ;;  %v1844_v20 = vpop.f32.mrf.mxu2 }
 0x250   : > { %v3931_v23 = vadd.f32 %v1951_v18, %v1839_v58  ;;  %v1731_v25 = vpop.f32.mrf.mxu1  ;;  %v3933_v42 = vpop.f32.mrf.mxu0 }
 0x251   : > { %v1845_v48 = vadd.f32 %v1844_v20, %v1731_v25  ;;  %v3969_v20 = vld [vmem:[#allocation2 + $0x148] sm:$0xff]  ;;  %v1755_v25 = vadd.f32 %v3880_v54, %v3830_v4  ;;  %v1609_v4 = vld [vmem:[#allocation9 + $0x420] sm:$0xff] }
 0x252   : > { %4542 = vst [vmem:[#allocation21_spill] sm:$0xff] %v3931_v23  ;;  %v3949_v23 = vld [vmem:[#allocation2 + $0x127] sm:$0xff]  ;;  %2536 = vmatpush.msra.mxu2 %v1609_v4 }
 0x253   : > { %2021 = vmatmul.f32.gmra.mxu1 %v3935_v19  ;;  %2336 = vmatmul.f32.gmra.mxu0 %v3866_v24  ;;  %v3952_v24 = vld [vmem:[#allocation2 + $0x111] sm:$0xff]  ;;  %4548 = vst [vmem:[#allocation27_spill] sm:$0xff] %v3969_v20 }
 0x254   : > { %2244 = vmatmul.f32.gmra.mxu3 %v3938_v8  ;;  %2137 = vmatmul.f32.gmra.mxu2 %v3941_v44  ;;  %4546 = vst [vmem:[#allocation25_spill] sm:$0xff] %v3952_v24  ;;  %v1594_v8 = vld [vmem:[#allocation9 + $0x3a8] sm:$0xff] }
 0x255   : > { %2422 = vmatpush.msra.mxu1 %v1594_v8 }
 0x257   : > { %v1954_v27 = vpop.f32.mrf.mxu3  ;;  %v2090_v58 = vpop.f32.mrf.mxu2 }
 0x258   : > { %v3945_v18 = vadd.f32 %v1954_v27, %v1842_v63  ;;  %v3947_v39 = vpop.f32.mrf.mxu0  ;;  %v1977_v56 = vpop.f32.mrf.mxu1 }
 0x25a   : > { %4545 = vst [vmem:[#allocation24_spill] sm:$0xff] %v3945_v18 }
 0x25b   : > { %2024 = vmatmul.f32.gmra.mxu1 %v3949_v23  ;;  %2339 = vmatmul.f32.gmra.mxu0 %v3874_v52 }
 0x25c   : > { %2247 = vmatmul.f32.gmra.mxu3 %v3952_v24  ;;  %2140 = vmatmul.f32.gmra.mxu2 %v3955_v57  ;;  %v3966_v57 = vld [vmem:[#allocation2 + $0x129] sm:$0xff] }
 0x25f   : > { %v1957_v63 = vpop.f32.mrf.mxu3  ;;  %v2093_v27 = vpop.f32.mrf.mxu2 }
 0x260   : > { %v3961_v44 = vadd.f32 %v1957_v63, %v1845_v48  ;;  %v1864_v18 = vpop.f32.mrf.mxu0  ;;  %v1980_v5 = vpop.f32.mrf.mxu1 }
 0x261   : > { %v1865_v52 = vadd.f32 %v1864_v18, %v1752_v14 }
 0x263   : > { %v1978_v24 = vadd.f32 %v1977_v56, %v1865_v52  ;;  %2027 = vmatmul.f32.gmra.mxu1 %v3963_v26  ;;  %2342 = vmatmul.f32.gmra.mxu0 %v3882_v3  ;;  %v3977_v3 = vld [vmem:[#allocation2 + $0x147] sm:$0xff]  ;;  %v3980_v52 = vld [vmem:[#allocation2 + $0x131] sm:$0xff] }
 0x264   : > { %2250 = vmatmul.f32.gmra.mxu3 %v3966_v57  ;;  %2143 = vmatmul.f32.gmra.mxu2 %v3969_v20 }
 0x265   : > { %v2091_v2 = vadd.f32 %v2090_v58, %v1978_v24  ;;  %v3983_v58 = vld [vmem:[#allocation2 + $0x150] sm:$0xff]  ;;  %v1758_v24 = vadd.f32 %v3891_v9, %v3835_v32  ;;  %v2682_v32 = vld [vmem:[#allocation10 + $0x60] sm:$0xff] }
 0x266   : > { %4549 = vst [vmem:[#allocation28_spill] sm:$0xff] %v3983_v58  ;;  %2689 = vmatpush.msra.mxu3 %v2682_v32 }
 0x267   : > { %v2203_v8 = vpop.f32.mrf.mxu3  ;;  %v2096_v56 = vpop.f32.mrf.mxu2 }
 0x268   : > { %v3975_v18 = vadd.f32 %v2203_v8, %v2091_v2  ;;  %v1867_v45 = vpop.f32.mrf.mxu0  ;;  %v1983_v48 = vpop.f32.mrf.mxu1 }
 0x269   : > { %v1868_v14 = vadd.f32 %v1867_v45, %v1755_v25  ;;  %v1593_v45 = vld [vmem:[#allocation9 + $0x3a0] sm:$0xff] }
 0x26a   : > { %2423 = vmatpush.msra.mxu1 %v1593_v45 }
 0x26b   : > { %v1981_v63 = vadd.f32 %v1980_v5, %v1868_v14  ;;  %2030 = vmatmul.f32.gmra.mxu1 %v3977_v3  ;;  %2345 = vmatmul.f32.gmra.mxu0 %v3893_v13  ;;  %v3991_v14 = vld [vmem:[#allocation2 + $0x14f] sm:$0xff] }
 0x26c   : > { %2253 = vmatmul.f32.gmra.mxu3 %v3980_v52  ;;  %2146 = vmatmul.f32.gmra.mxu2 %v3983_v58  ;;  %v3994_v58 = vld [vmem:[#allocation2 + $0x149] sm:$0xff] }
 0x26d   : > { %v2094_v54 = vadd.f32 %v2093_v27, %v1981_v63  ;;  %v3997_v27 = vld [vmem:[#allocation2 + $0x168] sm:$0xff]  ;;  %v1761_v63 = vadd.f32 %v3905_v40, %v3842_v31  ;;  %v1608_v31 = vld [vmem:[#allocation9 + $0x418] sm:$0xff] }
 0x26e   : > { %4550 = vst [vmem:[#allocation29_spill] sm:$0xff] %v3997_v27  ;;  %2537 = vmatpush.msra.mxu2 %v1608_v31 }
 0x26f   : > { %v2206_v1 = vpop.f32.mrf.mxu3  ;;  %v2099_v5 = vpop.f32.mrf.mxu2 }
 0x270   : > { %v3989_v2 = vadd.f32 %v2206_v1, %v2094_v54  ;;  %v1870_v25 = vpop.f32.mrf.mxu0  ;;  %v1986_v8 = vpop.f32.mrf.mxu1 }
 0x271   : > { %v1871_v13 = vadd.f32 %v1870_v25, %v1758_v24 }
 0x273   : > { %v1984_v20 = vadd.f32 %v1983_v48, %v1871_v13  ;;  %2033 = vmatmul.f32.gmra.mxu1 %v3991_v14  ;;  %2348 = vmatmul.f32.gmra.mxu0 %v3907_v0  ;;  %v4005_v0 = vld [vmem:[#allocation2 + $0x167] sm:$0xff]  ;;  %v4008_v13 = vld [vmem:[#allocation2 + $0x151] sm:$0xff] }
 0x274   : > { %2256 = vmatmul.f32.gmra.mxu3 %v3994_v58  ;;  %2149 = vmatmul.f32.gmra.mxu2 %v3997_v27 }
 0x275   : > { %v2097_v9 = vadd.f32 %v2096_v56, %v1984_v20  ;;  %v4011_v20 = vld [vmem:[#allocation2 + $0x170] sm:$0xff]  ;;  %v1764_v56 = vadd.f32 %v3919_v47, %v3849_v17  ;;  %v2681_v17 = vld [vmem:[#allocation10 + $0x58] sm:$0xff] }
 0x276   : > { %4551 = vst [vmem:[#allocation30_spill] sm:$0xff] %v4011_v20  ;;  %2690 = vmatpush.msra.mxu3 %v2681_v17  ;;  %v1770_v17 = vadd.f32 %v3947_v39, %v3864_v51  ;;  %v4056_v51 = vld [vmem:[#allocation2 + $0x1a8] sm:$0xff]  ;;  %v2680_v39 = vld [vmem:[#allocation10 + $0x50] sm:$0xff] }
 0x277   : > { %v2209_v4 = vpop.f32.mrf.mxu3  ;;  %v2102_v48 = vpop.f32.mrf.mxu2 }
 0x278   : > { %v4003_v54 = vadd.f32 %v2209_v4, %v2097_v9  ;;  %v1873_v24 = vpop.f32.mrf.mxu0  ;;  %v1989_v1 = vpop.f32.mrf.mxu1  ;;  %2691 = vmatpush.msra.mxu3 %v2680_v39  ;;  %v4086_v39 = vld [vmem:[#allocation2 + $0x1c8] sm:$0xff] }
 0x279   : > { %v1874_v25 = vadd.f32 %v1873_v24, %v1761_v63  ;;  %v1592_v24 = vld [vmem:[#allocation9 + $0x398] sm:$0xff] }
 0x27a   : > { %2424 = vmatpush.msra.mxu1 %v1592_v24 }
 0x27b   : > { %v1987_v45 = vadd.f32 %v1986_v8, %v1874_v25  ;;  %2036 = vmatmul.f32.gmra.mxu1 %v4005_v0  ;;  %2351 = vmatmul.f32.gmra.mxu0 %v3921_v53  ;;  %v4019_v25 = vld [vmem:[#allocation2 + $0x16f] sm:$0xff] }
 0x27c   : > { %2259 = vmatmul.f32.gmra.mxu3 %v4008_v13  ;;  %2152 = vmatmul.f32.gmra.mxu2 %v4011_v20  ;;  %v4022_v20 = vld [vmem:[#allocation2 + $0x169] sm:$0xff] }
 0x27d   : > { %v2100_v40 = vadd.f32 %v2099_v5, %v1987_v45  ;;  %v4025_v5 = vld [vmem:[#allocation2 + $0x188] sm:$0xff]  ;;  %v1767_v45 = vadd.f32 %v3933_v42, %v3856_v6  ;;  %v1607_v6 = vld [vmem:[#allocation9 + $0x410] sm:$0xff]  ;;  %v1773_v42 = vadd.f32 %v3764_v62, %v3767_v7 }
 0x27e   : > { %4552 = vst [vmem:[#allocation31_spill] sm:$0xff] %v4025_v5  ;;  %2538 = vmatpush.msra.mxu2 %v1607_v6  ;;  %v4053_v7 = vld [vmem:[#allocation2 + $0x189] sm:$0xff] }
 0x27f   : > { %v2212_v32 = vpop.f32.mrf.mxu3  ;;  %v2105_v8 = vpop.f32.mrf.mxu2 }
 0x280   : > { %v4017_v9 = vadd.f32 %v2212_v32, %v2100_v40  ;;  %v1876_v63 = vpop.f32.mrf.mxu0  ;;  %v1992_v4 = vpop.f32.mrf.mxu1 }
 0x281   : > { %v1877_v53 = vadd.f32 %v1876_v63, %v1764_v56 }
 0x283   : > { %v1990_v27 = vadd.f32 %v1989_v1, %v1877_v53  ;;  %2039 = vmatmul.f32.gmra.mxu1 %v4019_v25  ;;  %2354 = vmatmul.f32.gmra.mxu0 %v3935_v19  ;;  %v4033_v19 = vld [vmem:[#allocation2 + $0x187] sm:$0xff]  ;;  %v4036_v53 = vld [vmem:[#allocation2 + $0x171] sm:$0xff] }
 0x284   : > { %2262 = vmatmul.f32.gmra.mxu3 %v4022_v20  ;;  %2155 = vmatmul.f32.gmra.mxu2 %v4025_v5 }
 0x285   : > { %v2103_v47 = vadd.f32 %v2102_v48, %v1990_v27  ;;  %v4039_v27 = vld [vmem:[#allocation2 + $0x190] sm:$0xff] }
 0x286   : > { %4554 = vst [vmem:[#allocation33_spill] sm:$0xff] %v4039_v27 }
 0x287   : > { %v2215_v31 = vpop.f32.mrf.mxu3  ;;  %v2108_v1 = vpop.f32.mrf.mxu2 }
 0x288   : > { %v4031_v40 = vadd.f32 %v2215_v31, %v2103_v47  ;;  %v1879_v56 = vpop.f32.mrf.mxu0  ;;  %v1995_v32 = vpop.f32.mrf.mxu1 }
 0x289   : > { %v1880_v63 = vadd.f32 %v1879_v56, %v1767_v45 }
 0x28a   : > { %4553 = vst [vmem:[#allocation32_spill] sm:$0xff] %v4031_v40  ;;  %v4050_v40 = vld [vmem:[#allocation2 + $0x18f] sm:$0xff] }
 0x28b   : > { %v1993_v24 = vadd.f32 %v1992_v4, %v1880_v63  ;;  %2042 = vmatmul.f32.gmra.mxu1 %v4033_v19  ;;  %2357 = vmatmul.f32.gmra.mxu0 %v3949_v23  ;;  %v1886_v4 = vadd.f32 %v3781_v22, %v1773_v42  ;;  %v1591_v63 = vld [vmem:[#allocation9 + $0x390] sm:$0xff] }
 0x28c   : > { %2265 = vmatmul.f32.gmra.mxu3 %v4036_v53  ;;  %2158 = vmatmul.f32.gmra.mxu2 %v4039_v27 }
 0x28d   : > { %v2106_v48 = vadd.f32 %v2105_v8, %v1993_v24  ;;  %2425 = vmatpush.msra.mxu1 %v1591_v63  ;;  %v4081_v63 = vld [vmem:[#allocation2 + $0x1a9] sm:$0xff] }
 0x28f   : > { %v2218_v47 = vpop.f32.mrf.mxu3  ;;  %v2111_v45 = vpop.f32.mrf.mxu2 }
 0x290   : > { %v4048_v23 = vadd.f32 %v2218_v47, %v2106_v48  ;;  %v1882_v31 = vpop.f32.mrf.mxu0  ;;  %v1998_v56 = vpop.f32.mrf.mxu1  ;;  %v4063_v48 = vld [vmem:[#allocation2 + $0x1a7] sm:$0xff] }
 0x291   : > { %v1883_v5 = vadd.f32 %v1882_v31, %v1770_v17  ;;  %v1999_v27 = vadd.f32 %v1998_v56, %v1886_v4  ;;  %v4071_v4 = vld [vmem:[#allocation2 + $0x1b0] sm:$0xff]  ;;  %v1590_v31 = vld [vmem:[#allocation9 + $0x388] sm:$0xff] }
 0x292   : > { %2426 = vmatpush.msra.mxu1 %v1590_v31  ;;  %v4104_v31 = vld [vmem:[#allocation2 + $0x1cf] sm:$0xff] }
 0x293   : > { %v1996_v62 = vadd.f32 %v1995_v32, %v1883_v5  ;;  %2045 = vmatmul.f32.gmra.mxu1 %v4050_v40  ;;  %2360 = vmatmul.f32.gmra.mxu0 %v3963_v26  ;;  %v2112_v22 = vadd.f32 %v2111_v45, %v1999_v27  ;;  %v4066_v26 = vld [vmem:[#allocation2 + $0x191] sm:$0xff] }
 0x294   : > { %2268 = vmatmul.f32.gmra.mxu3 %v4053_v7  ;;  %2161 = vmatmul.f32.gmra.mxu2 %v4056_v51 }
 0x295   : > { %v2109_v8 = vadd.f32 %v2108_v1, %v1996_v62  ;;  %v1606_v1 = vld [vmem:[#allocation9 + $0x408] sm:$0xff] }
 0x296   : > { %2539 = vmatpush.msra.mxu2 %v1606_v1  ;;  %v1605_v1 = vld [vmem:[#allocation9 + $0x400] sm:$0xff] }
 0x297   : > { %v2221_v24 = vpop.f32.mrf.mxu3  ;;  %v2114_v6 = vpop.f32.mrf.mxu2 }
 0x298   : > { %v4060_v42 = vadd.f32 %v2221_v24, %v2109_v8  ;;  %v2001_v5 = vpop.f32.mrf.mxu1  ;;  %2540 = vmatpush.msra.mxu2 %v1605_v1  ;;  %v4117_v1 = vld [vmem:[#allocation2 + $0x1e7] sm:$0xff] }
 0x299   : > { %v2002_v32 = vadd.f32 %v2001_v5, %v3786_v33  ;;  %v4094_v5 = vld [vmem:[#allocation2 + $0x1b1] sm:$0xff] }
 0x29b   : > { %2048 = vmatmul.f32.gmra.mxu1 %v4063_v48  ;;  %2363 = vmatmul.f32.gmra.mxu0 %v3977_v3  ;;  %v4069_v27 = vadd.f32 %v2114_v6, %v2002_v32  ;;  %v4078_v3 = vld [vmem:[#allocation2 + $0x1af] sm:$0xff]  ;;  %v4091_v6 = vld [vmem:[#allocation2 + $0x1c7] sm:$0xff] }
 0x29c   : > { %2271 = vmatmul.f32.gmra.mxu3 %v4066_v26  ;;  %2164 = vmatmul.f32.gmra.mxu2 %v4071_v4  ;;  %v4099_v32 = vld [vmem:[#allocation2 + $0x1d0] sm:$0xff] }
 0x29f   : > { %v2224_v17 = vpop.f32.mrf.mxu3  ;;  %v2117_v33 = vpop.f32.mrf.mxu2 }
 0x2a0   : > { %v4075_v47 = vadd.f32 %v2224_v17, %v2112_v22  ;;  %v2004_v45 = vpop.f32.mrf.mxu1  ;;  %v2679_v22 = vld [vmem:[#allocation10 + $0x48] sm:$0xff] }
 0x2a1   : > { %v2005_v56 = vadd.f32 %v2004_v45, %v3788_v43  ;;  %2692 = vmatpush.msra.mxu3 %v2679_v22  ;;  %v4112_v22 = vld [vmem:[#allocation2 + $0x1e8] sm:$0xff] }
 0x2a2   : > { %4556 = vst [vmem:[#allocation35_spill] sm:$0xff] %v4112_v22 }
 0x2a3   : > { %2051 = vmatmul.f32.gmra.mxu1 %v4078_v3  ;;  %2366 = vmatmul.f32.gmra.mxu0 %v3991_v14  ;;  %v4084_v62 = vadd.f32 %v2117_v33, %v2005_v56  ;;  %v1589_v33 = vld [vmem:[#allocation9 + $0x380] sm:$0xff] }
 0x2a4   : > { %2274 = vmatmul.f32.gmra.mxu3 %v4081_v63  ;;  %2167 = vmatmul.f32.gmra.mxu2 %v4086_v39 }
 0x2a5   : > { %2427 = vmatpush.msra.mxu1 %v1589_v33 }
 0x2a7   : > { %v2120_v43 = vpop.f32.mrf.mxu2 }
 0x2a8   : > { %v2007_v8 = vpop.f32.mrf.mxu1 }
 0x2a9   : > { %v2008_v24 = vadd.f32 %v2007_v8, %v3792_v21 }
 0x2ab   : > { %2054 = vmatmul.f32.gmra.mxu1 %v4091_v6  ;;  %2369 = vmatmul.f32.gmra.mxu0 %v4005_v0  ;;  %v4097_v14 = vadd.f32 %v2120_v43, %v2008_v24  ;;  %v4107_v0 = vld [vmem:[#allocation2 + $0x1c9] sm:$0xff]  ;;  %v2678_v43 = vld [vmem:[#allocation10 + $0x40] sm:$0xff] }
 0x2ac   : > { %2277 = vmatmul.f32.gmra.mxu3 %v4094_v5  ;;  %2170 = vmatmul.f32.gmra.mxu2 %v4099_v32 }
 0x2ad   : > { %2693 = vmatpush.msra.mxu3 %v2678_v43  ;;  %v4130_v43 = vld [vmem:[#allocation2 + $0x1ef] sm:$0xff] }
 0x2af   : > { %v2123_v17 = vpop.f32.mrf.mxu2 }
 0x2b0   : > { %v2010_v21 = vpop.f32.mrf.mxu1 }
 0x2b1   : > { %v2011_v45 = vadd.f32 %v2010_v21, %v3796_v37  ;;  %v4120_v21 = vld [vmem:[#allocation2 + $0x1d1] sm:$0xff] }
 0x2b3   : > { %2057 = vmatmul.f32.gmra.mxu1 %v4104_v31  ;;  %2372 = vmatmul.f32.gmra.mxu0 %v4019_v25  ;;  %v4110_v56 = vadd.f32 %v2123_v17, %v2011_v45  ;;  %v4125_v17 = vld [vmem:[#allocation2 + $0x1f0] sm:$0xff] }
 0x2b4   : > { %2280 = vmatmul.f32.gmra.mxu3 %v4107_v0  ;;  %2173 = vmatmul.f32.gmra.mxu2 %v4112_v22  ;;  %4558 = vst [vmem:[#allocation37_spill] sm:$0xff] %v4125_v17  ;;  %v4170_v22 = vld [vmem:[#allocation2 + $0x211] sm:$0xff] }
 0x2b5   : > { %4555 = vst [vmem:[#allocation34_spill] sm:$0xff] %v4110_v56  ;;  %v4146_v56 = vld [vmem:[#allocation2 + $0x1f1] sm:$0xff] }
 0x2b6   : > { %4561 = vst [vmem:[#allocation40_spill] sm:$0xff] %v4146_v56 }
 0x2b7   : > { %v2126_v37 = vpop.f32.mrf.mxu2 }
 0x2b8   : > { %v2013_v8 = vpop.f32.mrf.mxu1 }
 0x2b9   : > { %v2014_v24 = vadd.f32 %v2013_v8, %v3800_v35  ;;  %v4133_v8 = vld [vmem:[#allocation2 + $0x1e9] sm:$0xff] }
 0x2bb   : > { %2060 = vmatmul.f32.gmra.mxu1 %v4117_v1  ;;  %2375 = vmatmul.f32.gmra.mxu0 %v4033_v19  ;;  %v4123_v25 = vadd.f32 %v2126_v37, %v2014_v24  ;;  %v4138_v37 = vld [vmem:[#allocation2 + $0x208] sm:$0xff]  ;;  %v2677_v24 = vld [vmem:[#allocation10 + $0x38] sm:$0xff] }
 0x2bc   : > { %2283 = vmatmul.f32.gmra.mxu3 %v4120_v21  ;;  %2176 = vmatmul.f32.gmra.mxu2 %v4125_v17  ;;  %4560 = vst [vmem:[#allocation39_spill] sm:$0xff] %v4138_v37  ;;  %v4143_v17 = vld [vmem:[#allocation2 + $0x207] sm:$0xff] }
 0x2bd   : > { %4557 = vst [vmem:[#allocation36_spill] sm:$0xff] %v4123_v25  ;;  %2694 = vmatpush.msra.mxu3 %v2677_v24 }
 0x2bf   : > { %v2129_v33 = vpop.f32.mrf.mxu2 }
 0x2c0   : > { %v2016_v45 = vpop.f32.mrf.mxu1 }
 0x2c1   : > { %v2017_v35 = vadd.f32 %v2016_v45, %v3804_v60 }
 0x2c3   : > { %2063 = vmatmul.f32.gmra.mxu1 %v4130_v43  ;;  %2378 = vmatmul.f32.gmra.mxu0 %v4050_v40  ;;  %v4136_v19 = vadd.f32 %v2129_v33, %v2017_v35  ;;  %v4151_v33 = vld [vmem:[#allocation2 + $0x210] sm:$0xff]  ;;  %v4155_v35 = vpop.f32.mrf.mxu0 }
 0x2c4   : > { %2286 = vmatmul.f32.gmra.mxu3 %v4133_v8  ;;  %2179 = vmatmul.f32.gmra.mxu2 %v4138_v37  ;;  %4563 = vst [vmem:[#allocation42_spill] sm:$0xff] %v4151_v33  ;;  %v4161_v37 = vld [vmem:[#allocation2 + $0x209] sm:$0xff] }
 0x2c5   : > { %4559 = vst [vmem:[#allocation38_spill] sm:$0xff] %v4136_v19  ;;  %v4158_v19 = vld [vmem:[#allocation2 + $0x20f] sm:$0xff] }
 0x2c6   : > { %4564 = vst [vmem:[#allocation43_spill] sm:$0xff] %v4161_v37 }
 0x2c7   : > { %v2132_v25 = vpop.f32.mrf.mxu2 }
 0x2c8   : > { %v2019_v60 = vpop.f32.mrf.mxu1 }
 0x2c9   : > { %v2020_v45 = vadd.f32 %v2019_v60, %v3809_v10 }
 0x2cb   : > { %2066 = vmatmul.f32.gmra.mxu1 %v4143_v17  ;;  %2381 = vmatmul.f32.gmra.mxu0 %v4063_v48  ;;  %v4149_v40 = vadd.f32 %v2132_v25, %v2020_v45  ;;  %v1125_v25 = vld [vmem:[#allocation2 + $0x49] sm:$0xff] }
 0x2cc   : > { %2289 = vmatmul.f32.gmra.mxu3 %v4146_v56  ;;  %2182 = vmatmul.f32.gmra.mxu2 %v4151_v33  ;;  %v2676_v45 = vld [vmem:[#allocation10 + $0x30] sm:$0xff]  ;;  %v1061_v56 = vld [vmem:[#allocation2 + $0x48] sm:$0xff] }
 0x2cd   : > { %4562 = vst [vmem:[#allocation41_spill] sm:$0xff] %v4149_v40  ;;  %2695 = vmatpush.msra.mxu3 %v2676_v45  ;;  %v4167_v40 = vpop.f32.mrf.mxu0 }
 0x2cf   : > { %v2135_v24 = vpop.f32.mrf.mxu2 }
 0x2d0   : > { %v2022_v10 = vpop.f32.mrf.mxu1 }
 0x2d1   : > { %v2023_v60 = vadd.f32 %v2022_v10, %v3815_v28 }
 0x2d3   : > { %2069 = vmatmul.f32.gmra.mxu1 %v4158_v19  ;;  %2384 = vmatmul.f32.gmra.mxu0 %v4078_v3  ;;  %v4164_v48 = vadd.f32 %v2135_v24, %v2023_v60  ;;  %v1126_v24 = vld [vmem:[#allocation2 + $0x51] sm:$0xff] }
 0x2d4   : > { %2292 = vmatmul.f32.gmra.mxu3 %v4161_v37  ;;  %2541 = vmatmul.f32.vlgmr.msra.gmra.mxu2 %v1125_v25  ;;  %v1062_v37 = vld [vmem:[#allocation2 + $0x50] sm:$0xff] }
 0x2d5   : > { %4565 = vst [vmem:[#allocation44_spill] sm:$0xff] %v4164_v48  ;;  %v4176_v45 = vpop.f32.mrf.mxu0 }
 0x2d7   : > { %v2138_v33 = vpop.f32.mrf.mxu2 }
 0x2d8   : > { %v2025_v28 = vpop.f32.mrf.mxu1 }
 0x2d9   : > { %v2026_v10 = vadd.f32 %v2025_v28, %v3818_v55 }
 0x2db   : > { %2387 = vmatmul.f32.gmra.mxu0 %v4091_v6  ;;  %2428 = vmatmul.f32.vlgmr.msra.gmra.mxu1 %v1061_v56  ;;  %v4173_v3 = vadd.f32 %v2138_v33, %v2026_v10  ;;  %v1127_v6 = vld [vmem:[#allocation2 + $0x69] sm:$0xff] }
 0x2dc   : > { %2295 = vmatmul.f32.gmra.mxu3 %v4170_v22  ;;  %2544 = vmatmul.f32.gmra.mxu2 %v1126_v24  ;;  %v2675_v56 = vld [vmem:[#allocation10 + $0x28] sm:$0xff] }
 0x2dd   : > { %4566 = vst [vmem:[#allocation45_spill] sm:$0xff] %v4173_v3  ;;  %2696 = vmatpush.msra.mxu3 %v2675_v56  ;;  %v1063_v24 = vld [vmem:[#allocation2 + $0x68] sm:$0xff]  ;;  %v4183_v3 = vpop.f32.mrf.mxu0  ;;  %v2674_v56 = vld [vmem:[#allocation10 + $0x20] sm:$0xff] }
 0x2df   : > { %v2141_v60 = vpop.f32.mrf.mxu2  ;;  %2697 = vmatpush.msra.mxu3 %v2674_v56  ;;  %v1066_v56 = vld [vmem:[#allocation2 + $0x90] sm:$0xff] }
 0x2e0   : > { %v2028_v25 = vpop.f32.mrf.mxu1 }
 0x2e1   : > { %v2029_v48 = vadd.f32 %v2028_v25, %v3822_v41  ;;  %v1064_v25 = vld [vmem:[#allocation2 + $0x70] sm:$0xff] }
 0x2e3   : > { %2390 = vmatmul.f32.gmra.mxu0 %v4104_v31  ;;  %2431 = vmatmul.f32.gmra.mxu1 %v1062_v37  ;;  %v4180_v55 = vadd.f32 %v2141_v60, %v2029_v48  ;;  %v1128_v31 = vld [vmem:[#allocation2 + $0x71] sm:$0xff] }
 0x2e4   : > { %2547 = vmatmul.f32.gmra.mxu2 %v1127_v6 }
 0x2e7   : > { %v2144_v33 = vpop.f32.mrf.mxu2 }
 0x2e8   : > { %v2031_v28 = vpop.f32.mrf.mxu1 }
 0x2e9   : > { %v2032_v10 = vadd.f32 %v2031_v28, %v3828_v11  ;;  %v1129_v11 = vld [vmem:[#allocation2 + $0x89] sm:$0xff]  ;;  %v4192_v28 = vpop.f32.mrf.mxu3 }
 0x2eb   : > { %2393 = vmatmul.f32.gmra.mxu0 %v4117_v1  ;;  %2434 = vmatmul.f32.gmra.mxu1 %v1063_v24  ;;  %v4186_v41 = vadd.f32 %v2144_v33, %v2032_v10  ;;  %v4194_v1 = vpop.f32.mrf.mxu0 }
 0x2ec   : > { %2550 = vmatmul.f32.gmra.mxu2 %v1128_v31  ;;  %v1065_v31 = vld [vmem:[#allocation2 + $0x88] sm:$0xff] }
 0x2ed   : > { %4567 = vst [vmem:[#allocation46_spill] sm:$0xff] %v4186_v41 }
 0x2ef   : > { %v2147_v37 = vpop.f32.mrf.mxu2 }
 0x2f0   : > { %v2034_v48 = vpop.f32.mrf.mxu1 }
 0x2f1   : > { %v2035_v60 = vadd.f32 %v2034_v48, %v3833_v30 }
 0x2f3   : > { %2396 = vmatmul.f32.gmra.mxu0 %v4130_v43  ;;  %2437 = vmatmul.f32.gmra.mxu1 %v1064_v25  ;;  %v4190_v6 = vadd.f32 %v2147_v37, %v2035_v60  ;;  %v1130_v43 = vld [vmem:[#allocation2 + $0x91] sm:$0xff]  ;;  %v4200_v37 = vpop.f32.mrf.mxu3  ;;  %v4202_v48 = vpop.f32.mrf.mxu0 }
 0x2f4   : > { %2553 = vmatmul.f32.gmra.mxu2 %v1129_v11 }
 0x2f5   : > { %4568 = vst [vmem:[#allocation47_spill] sm:$0xff] %v4190_v6  ;;  %v1027_v6 = vld [vmem:[#allocation2 + $0x227] sm:$0xff] }
 0x2f7   : > { %v2150_v33 = vpop.f32.mrf.mxu2 }
 0x2f8   : > { %v2037_v10 = vpop.f32.mrf.mxu1 }
 0x2f9   : > { %v2038_v24 = vadd.f32 %v2037_v10, %v3840_v50  ;;  %v2673_v10 = vld [vmem:[#allocation10 + $0x18] sm:$0xff] }
 0x2fa   : > { %2698 = vmatpush.msra.mxu3 %v2673_v10  ;;  %v1028_v10 = vld [vmem:[#allocation2 + $0x22f] sm:$0xff] }
 0x2fb   : > { %2399 = vmatmul.f32.gmra.mxu0 %v4143_v17  ;;  %2440 = vmatmul.f32.gmra.mxu1 %v1065_v31  ;;  %v4198_v30 = vadd.f32 %v2150_v33, %v2038_v24  ;;  %v1131_v17 = vld [vmem:[#allocation2 + $0xa9] sm:$0xff]  ;;  %v4208_v24 = vpop.f32.mrf.mxu3 }
 0x2fc   : > { %2556 = vmatmul.f32.gmra.mxu2 %v1130_v43  ;;  %v4210_v43 = vpop.f32.mrf.mxu0 }
 0x2fd   : > { %4569 = vst [vmem:[#allocation48_spill] sm:$0xff] %v4198_v30 }
 0x2ff   : > { %v2153_v60 = vpop.f32.mrf.mxu2 }
 0x300   : > { %v2040_v25 = vpop.f32.mrf.mxu1 }
 0x301   : > { %v2041_v11 = vadd.f32 %v2040_v25, %v3847_v15  ;;  %v1067_v15 = vld [vmem:[#allocation2 + $0xa8] sm:$0xff] }
 0x303   : > { %2402 = vmatmul.f32.gmra.mxu0 %v4158_v19  ;;  %2443 = vmatmul.f32.gmra.mxu1 %v1066_v56  ;;  %v4206_v50 = vadd.f32 %v2153_v60, %v2041_v11  ;;  %v1132_v60 = vld [vmem:[#allocation2 + $0xb1] sm:$0xff] }
 0x304   : > { %2559 = vmatmul.f32.gmra.mxu2 %v1131_v17  ;;  %v4216_v17 = vpop.f32.mrf.mxu3  ;;  %v4218_v41 = vpop.f32.mrf.mxu0 }
 0x305   : > { %4570 = vst [vmem:[#allocation49_spill] sm:$0xff] %v4206_v50  ;;  %v1068_v50 = vld [vmem:[#allocation2 + $0xb0] sm:$0xff] }
 0x307   : > { %v2156_v33 = vpop.f32.mrf.mxu2 }
 0x308   : > { %v2043_v31 = vpop.f32.mrf.mxu1 }
 0x309   : > { %v2044_v30 = vadd.f32 %v2043_v31, %v3854_v29 }
 0x30b   : > { %2405 = vmatmul.f32.gmra.mxu0 %v1027_v6  ;;  %2446 = vmatmul.f32.gmra.mxu1 %v1067_v15  ;;  %v4213_v19 = vadd.f32 %v2156_v33, %v2044_v30  ;;  %v2672_v6 = vld [vmem:[#allocation10 + $0x10] sm:$0xff]  ;;  %v1069_v15 = vld [vmem:[#allocation2 + $0xc8] sm:$0xff] }
 0x30c   : > { %2562 = vmatmul.f32.gmra.mxu2 %v1132_v60  ;;  %2699 = vmatpush.msra.mxu3 %v2672_v6  ;;  %v4226_v60 = vpop.f32.mrf.mxu3 }
 0x30f   : > { %v2159_v25 = vpop.f32.mrf.mxu2 }
 0x310   : > { %v2046_v11 = vpop.f32.mrf.mxu1 }
 0x311   : > { %v2047_v56 = vadd.f32 %v2046_v11, %v3862_v49 }
 0x313   : > { %2408 = vmatmul.f32.gmra.mxu0 %v1028_v10  ;;  %2449 = vmatmul.f32.gmra.mxu1 %v1068_v50  ;;  %v4220_v29 = vadd.f32 %v2159_v25, %v2047_v56  ;;  %v1070_v56 = vld [vmem:[#allocation2 + $0xd0] sm:$0xff]  ;;  %v2671_v10 = vld [vmem:[#allocation10 + $0x8] sm:$0xff] }
 0x314   : > { %2565 = vmatmul.f32.gmra.mxu2 %v3885_v38  ;;  %2700 = vmatpush.msra.mxu3 %v2671_v10  ;;  %v4575_v10 = vld [vmem:[#allocation22_spill] sm:$0xff] }
 0x317   : > { %v2162_v30 = vpop.f32.mrf.mxu2 }
 0x318   : > { %v2049_v33 = vpop.f32.mrf.mxu1 }
 0x319   : > { %v2050_v31 = vadd.f32 %v2049_v33, %v3870_v46  ;;  %v4233_v46 = vpop.f32.mrf.mxu3 }
 0x31b   : > { %2452 = vmatmul.f32.gmra.mxu1 %v1069_v15  ;;  %v4224_v49 = vadd.f32 %v2162_v30, %v2050_v31  ;;  %v1071_v31 = vld [vmem:[#allocation2 + $0xe8] sm:$0xff] }
 0x31c   : > { %2568 = vmatmul.f32.gmra.mxu2 %v3896_v16 }
 0x31f   : > { %v2165_v11 = vpop.f32.mrf.mxu2 }
 0x320   : > { %v2052_v50 = vpop.f32.mrf.mxu1 }
 0x321   : > { %v2053_v25 = vadd.f32 %v2052_v50, %v3878_v61  ;;  %v4239_v15 = vpop.f32.mrf.mxu3 }
 0x323   : > { %2455 = vmatmul.f32.gmra.mxu1 %v1070_v56  ;;  %v4230_v38 = vadd.f32 %v2165_v11, %v2053_v25  ;;  %v2670_v56 = vld [vmem:[#allocation10] sm:$0xff] }
 0x324   : > { %2571 = vmatmul.f32.gmra.mxu2 %v3910_v34  ;;  %v4573_v34 = vld [vmem:[#allocation17_spill] sm:$0xff]  ;;  %2701 = vmatpush.msra.mxu3 %v2670_v56 }
 0x325   : > { %4571 = vst [vmem:[#allocation50_spill] sm:$0xff] %v4230_v38  ;;  %v4578_v38 = vld [vmem:[#allocation25_spill] sm:$0xff] }
 0x327   : > { %v2168_v6 = vpop.f32.mrf.mxu2 }
 0x328   : > { %v2055_v30 = vpop.f32.mrf.mxu1 }
 0x329   : > { %v2056_v33 = vadd.f32 %v2055_v30, %v3889_v12 }
 0x32b   : > { %2458 = vmatmul.f32.gmra.mxu1 %v1071_v31  ;;  %v4236_v16 = vadd.f32 %v2168_v6, %v2056_v33  ;;  %v4576_v6 = vld [vmem:[#allocation19_spill] sm:$0xff]  ;;  %v4247_v31 = vpop.f32.mrf.mxu3 }
 0x32c   : > { %2574 = vmatmul.f32.gmra.mxu2 %v3924_v59  ;;  %v4577_v59 = vld [vmem:[#allocation18_spill] sm:$0xff] }
 0x32d   : > { %4572 = vst [vmem:[#allocation51_spill] sm:$0xff] %v4236_v16 }
 0x32f   : > { %v2171_v61 = vpop.f32.mrf.mxu2 }
 0x330   : > { %v2058_v11 = vpop.f32.mrf.mxu1 }
 0x331   : > { %v2059_v50 = vadd.f32 %v2058_v11, %v3903_v36 }
 0x333   : > { %2461 = vmatmul.f32.gmra.mxu1 %v4573_v34  ;;  %v4243_v25 = vadd.f32 %v2171_v61, %v2059_v50  ;;  %v4579_v61 = vld [vmem:[#allocation21_spill] sm:$0xff]  ;;  %v4580_v34 = vld [vmem:[#allocation20_spill] sm:$0xff]  ;;  %v4257_v56 = vpop.f32.mrf.mxu3 }
 0x334   : > { %2577 = vmatmul.f32.gmra.mxu2 %v4575_v10 }
 0x335   : > { %4574 = vst [vmem:[#allocation17_spill] sm:$0xff] %v4243_v25  ;;  %v4581_v25 = vld [vmem:[#allocation24_spill] sm:$0xff] }
 0x337   : > { %v2174_v12 = vpop.f32.mrf.mxu2 }
 0x338   : > { %v2061_v30 = vpop.f32.mrf.mxu1 }
 0x339   : > { %v2062_v33 = vadd.f32 %v2061_v30, %v4576_v6 }
 0x33b   : > { %2464 = vmatmul.f32.gmra.mxu1 %v4577_v59  ;;  %v4250_v16 = vadd.f32 %v2174_v12, %v2062_v33  ;;  %v4582_v12 = vld [vmem:[#allocation23_spill] sm:$0xff] }
 0x33c   : > { %2580 = vmatmul.f32.gmra.mxu2 %v4578_v38  ;;  %v4265_v38 = vpop.f32.mrf.mxu3 }
 0x33f   : > { %v2177_v36 = vpop.f32.mrf.mxu2 }
 0x340   : > { %v2064_v11 = vpop.f32.mrf.mxu1 }
 0x341   : > { %v2065_v50 = vadd.f32 %v2064_v11, %v4579_v61 }
 0x343   : > { %2467 = vmatmul.f32.gmra.mxu1 %v4580_v34  ;;  %v4255_v10 = vadd.f32 %v2177_v36, %v2065_v50  ;;  %v4583_v50 = vld [vmem:[#allocation26_spill] sm:$0xff] }
 0x344   : > { %2583 = vmatmul.f32.gmra.mxu2 %v3966_v57  ;;  %v2317_v57 = vadd.f32 %v4155_v35, %v3975_v18  ;;  %v4585_v18 = vld [vmem:[#allocation28_spill] sm:$0xff] }
 0x347   : > { %v2180_v30 = vpop.f32.mrf.mxu2 }
 0x348   : > { %v2067_v6 = vpop.f32.mrf.mxu1 }
 0x349   : > { %v2068_v59 = vadd.f32 %v2067_v6, %v4581_v25 }
 0x34b   : > { %2470 = vmatmul.f32.gmra.mxu1 %v4582_v12  ;;  %v4262_v33 = vadd.f32 %v2180_v30, %v2068_v59  ;;  %v4274_v30 = vpop.f32.mrf.mxu3  ;;  %v4584_v59 = vld [vmem:[#allocation27_spill] sm:$0xff] }
 0x34c   : > { %2586 = vmatmul.f32.gmra.mxu2 %v3980_v52 }
 0x34f   : > { %v2183_v11 = vpop.f32.mrf.mxu2 }
 0x350   : > { %v2070_v61 = vpop.f32.mrf.mxu1 }
 0x351   : > { %v2071_v36 = vadd.f32 %v2070_v61, %v3961_v44 }
 0x353   : > { %2473 = vmatmul.f32.gmra.mxu1 %v4583_v50  ;;  %v4269_v34 = vadd.f32 %v2183_v11, %v2071_v36  ;;  %v2320_v11 = vadd.f32 %v4167_v40, %v3989_v2  ;;  %v4280_v50 = vpop.f32.mrf.mxu3 }
 0x354   : > { %2589 = vmatmul.f32.gmra.mxu2 %v3994_v58 }
 0x357   : > { %v2542_v25 = vpop.f32.mrf.mxu2 }
 0x358   : > { %v2429_v6 = vpop.f32.mrf.mxu1 }
 0x359   : > { %v2430_v52 = vadd.f32 %v2429_v6, %v2317_v57  ;;  %v4284_v6 = vpop.f32.mrf.mxu0 }
 0x35b   : > { %2476 = vmatmul.f32.gmra.mxu1 %v4584_v59  ;;  %v2543_v12 = vadd.f32 %v2542_v25, %v2430_v52  ;;  %v4586_v52 = vld [vmem:[#allocation29_spill] sm:$0xff] }
 0x35c   : > { %2592 = vmatmul.f32.gmra.mxu2 %v4008_v13  ;;  %v2323_v13 = vadd.f32 %v4176_v45, %v4003_v54 }
 0x35d   : > { %v2638_v44 = vmax.f32 %v2543_v12, 0.0  ;;  %v4289_v12 = vpop.f32.mrf.mxu3 }
 0x35f   : > { %2702 = vmatmul.f32.vlgmr.msra.gmra.mxu3 %v2638_v44  ;;  %v2545_v61 = vpop.f32.mrf.mxu2 }
 0x360   : > { %v2432_v58 = vpop.f32.mrf.mxu1 }
 0x361   : > { %v2433_v36 = vadd.f32 %v2432_v58, %v2320_v11  ;;  %v4587_v58 = vld [vmem:[#allocation30_spill] sm:$0xff] }
 0x363   : > { %2479 = vmatmul.f32.gmra.mxu1 %v4585_v18  ;;  %v2546_v35 = vadd.f32 %v2545_v61, %v2433_v36  ;;  %v4294_v61 = vpop.f32.mrf.mxu0 }
 0x364   : > { %2595 = vmatmul.f32.gmra.mxu2 %v4022_v20  ;;  %v2326_v20 = vadd.f32 %v4183_v3, %v4017_v9 }
 0x365   : > { %v2639_v57 = vmax.f32 %v2546_v35, 0.0  ;;  %v4298_v35 = vpop.f32.mrf.mxu3 }
 0x367   : > { %2705 = vmatmul.f32.gmra.mxu3 %v2639_v57  ;;  %v2548_v25 = vpop.f32.mrf.mxu2  ;;  %v4588_v57 = vld [vmem:[#allocation32_spill] sm:$0xff] }
 0x368   : > { %v2435_v2 = vpop.f32.mrf.mxu1 }
 0x369   : > { %v2436_v40 = vadd.f32 %v2435_v2, %v2323_v13  ;;  %v4589_v2 = vld [vmem:[#allocation31_spill] sm:$0xff] }
 0x36b   : > { %2482 = vmatmul.f32.gmra.mxu1 %v4586_v52  ;;  %v2549_v59 = vadd.f32 %v2548_v25, %v2436_v40  ;;  %v2346_v25 = vpop.f32.mrf.mxu0 }
 0x36c   : > { %2598 = vmatmul.f32.gmra.mxu2 %v4036_v53  ;;  %v2329_v53 = vadd.f32 %v4194_v1, %v4588_v57 }
 0x36d   : > { %v2640_v44 = vmax.f32 %v2549_v59, 0.0 }
 0x36f   : > { %2708 = vmatmul.f32.gmra.mxu3 %v2640_v44  ;;  %v2551_v11 = vpop.f32.mrf.mxu2  ;;  %v4306_v44 = vpop.f32.mrf.mxu3 }
 0x370   : > { %v2438_v54 = vpop.f32.mrf.mxu1 }
 0x371   : > { %v2439_v45 = vadd.f32 %v2438_v54, %v2326_v20 }
 0x373   : > { %2485 = vmatmul.f32.gmra.mxu1 %v4587_v58  ;;  %v2552_v36 = vadd.f32 %v2551_v11, %v2439_v45  ;;  %v4590_v11 = vld [vmem:[#allocation33_spill] sm:$0xff]  ;;  %v2349_v45 = vpop.f32.mrf.mxu0 }
 0x374   : > { %2601 = vmatmul.f32.gmra.mxu2 %v4053_v7  ;;  %v2332_v7 = vadd.f32 %v4202_v48, %v4048_v23 }
 0x375   : > { %v2641_v18 = vmax.f32 %v2552_v36, 0.0 }
 0x377   : > { %2711 = vmatmul.f32.gmra.mxu3 %v2641_v18  ;;  %v2554_v13 = vpop.f32.mrf.mxu2  ;;  %v4312_v48 = vpop.f32.mrf.mxu3 }
 0x378   : > { %v2441_v9 = vpop.f32.mrf.mxu1 }
 0x379   : > { %v2442_v3 = vadd.f32 %v2441_v9, %v2329_v53 }
 0x37b   : > { %2488 = vmatmul.f32.gmra.mxu1 %v4589_v2  ;;  %v2555_v40 = vadd.f32 %v2554_v13, %v2442_v3  ;;  %v2352_v13 = vpop.f32.mrf.mxu0 }
 0x37c   : > { %2604 = vmatmul.f32.gmra.mxu2 %v4066_v26  ;;  %v2335_v26 = vadd.f32 %v4210_v43, %v4060_v42 }
 0x37d   : > { %v2642_v52 = vmax.f32 %v2555_v40, 0.0 }
 0x37f   : > { %2714 = vmatmul.f32.gmra.mxu3 %v2642_v52  ;;  %v2557_v59 = vpop.f32.mrf.mxu2  ;;  %v4319_v2 = vpop.f32.mrf.mxu3 }
 0x380   : > { %v2444_v20 = vpop.f32.mrf.mxu1 }
 0x381   : > { %v2445_v1 = vadd.f32 %v2444_v20, %v2332_v7 }
 0x383   : > { %2491 = vmatmul.f32.gmra.mxu1 %v4590_v11  ;;  %v2558_v54 = vadd.f32 %v2557_v59, %v2445_v1 }
 0x384   : > { %2607 = vmatmul.f32.gmra.mxu2 %v4081_v63  ;;  %v2338_v63 = vadd.f32 %v4218_v41, %v4075_v47  ;;  %v2355_v47 = vpop.f32.mrf.mxu0 }
 0x385   : > { %v2643_v58 = vmax.f32 %v2558_v54, 0.0 }
 0x387   : > { %2717 = vmatmul.f32.gmra.mxu3 %v2643_v58  ;;  %v2560_v36 = vpop.f32.mrf.mxu2  ;;  %v4329_v20 = vpop.f32.mrf.mxu3 }
 0x388   : > { %v2447_v18 = vpop.f32.mrf.mxu1 }
 0x389   : > { %v2448_v23 = vadd.f32 %v2447_v18, %v2335_v26 }
 0x38b   : > { %2494 = vmatmul.f32.gmra.mxu1 %v4056_v51  ;;  %v2561_v57 = vadd.f32 %v2560_v36, %v2448_v23  ;;  %v2228_v51 = vadd.f32 %v4192_v28, %v4069_v27  ;;  %v4591_v36 = vld [vmem:[#allocation35_spill] sm:$0xff] }
 0x38c   : > { %2610 = vmatmul.f32.gmra.mxu2 %v4094_v5  ;;  %v2358_v11 = vpop.f32.mrf.mxu0 }
 0x38d   : > { %v2644_v53 = vmax.f32 %v2561_v57, 0.0  ;;  %v2341_v40 = vadd.f32 %v4284_v6, %v2228_v51  ;;  %v4592_v57 = vld [vmem:[#allocation40_spill] sm:$0xff] }
 0x38e   : > { %v4596_v51 = vld [vmem:[#allocation36_spill] sm:$0xff] }
 0x38f   : > { %2720 = vmatmul.f32.gmra.mxu3 %v2644_v53  ;;  %v2563_v9 = vpop.f32.mrf.mxu2  ;;  %v4336_v58 = vpop.f32.mrf.mxu3 }
 0x390   : > { %v2450_v3 = vpop.f32.mrf.mxu1 }
 0x391   : > { %v2451_v42 = vadd.f32 %v2450_v3, %v2338_v63  ;;  %v4594_v3 = vld [vmem:[#allocation37_spill] sm:$0xff] }
 0x393   : > { %2497 = vmatmul.f32.gmra.mxu1 %v4071_v4  ;;  %v2564_v43 = vadd.f32 %v2563_v9, %v2451_v42  ;;  %v2231_v4 = vadd.f32 %v4200_v37, %v4084_v62 }
 0x394   : > { %2613 = vmatmul.f32.gmra.mxu2 %v4107_v0  ;;  %v2361_v23 = vpop.f32.mrf.mxu0 }
 0x395   : > { %v2645_v5 = vmax.f32 %v2564_v43, 0.0  ;;  %v2344_v27 = vadd.f32 %v4294_v61, %v2231_v4  ;;  %v4595_v43 = vld [vmem:[#allocation43_spill] sm:$0xff] }
 0x397   : > { %2723 = vmatmul.f32.gmra.mxu3 %v2645_v5  ;;  %v2566_v52 = vpop.f32.mrf.mxu2  ;;  %v4342_v9 = vpop.f32.mrf.mxu3  ;;  %v2240_v5 = vadd.f32 %v4226_v60, %v4596_v51  ;;  %v1092_v51 = vld [vmem:[#allocation2 + $0x230] sm:$0xff] }
 0x398   : > { %v2453_v41 = vpop.f32.mrf.mxu1 }
 0x399   : > { %v2454_v7 = vadd.f32 %v2453_v41, %v2341_v40  ;;  %v2353_v41 = vadd.f32 %v2352_v13, %v2240_v5 }
 0x39b   : > { %2500 = vmatmul.f32.gmra.mxu1 %v4086_v39  ;;  %v2567_v59 = vadd.f32 %v2566_v52, %v2454_v7  ;;  %v2234_v39 = vadd.f32 %v4208_v24, %v4097_v14 }
 0x39c   : > { %2616 = vmatmul.f32.gmra.mxu2 %v4120_v21  ;;  %v2364_v52 = vpop.f32.mrf.mxu0 }
 0x39d   : > { %v2646_v0 = vmax.f32 %v2567_v59, 0.0  ;;  %v2347_v62 = vadd.f32 %v2346_v25, %v2234_v39  ;;  %v4597_v59 = vld [vmem:[#allocation39_spill] sm:$0xff] }
 0x39f   : > { %2726 = vmatmul.f32.gmra.mxu3 %v2646_v0  ;;  %v2569_v28 = vpop.f32.mrf.mxu2  ;;  %v4349_v0 = vpop.f32.mrf.mxu3 }
 0x3a0   : > { %v2456_v6 = vpop.f32.mrf.mxu1 }
 0x3a1   : > { %v2457_v1 = vadd.f32 %v2456_v6, %v2344_v27  ;;  %v4598_v27 = vld [vmem:[#allocation38_spill] sm:$0xff] }
 0x3a3   : > { %2503 = vmatmul.f32.gmra.mxu1 %v4099_v32  ;;  %v2570_v54 = vadd.f32 %v2569_v28, %v2457_v1  ;;  %v4593_v32 = vld [vmem:[#allocation34_spill] sm:$0xff]  ;;  %v2243_v28 = vadd.f32 %v4233_v46, %v4598_v27 }
 0x3a4   : > { %2619 = vmatmul.f32.gmra.mxu2 %v4133_v8  ;;  %v2237_v8 = vadd.f32 %v4216_v17, %v4593_v32 }
 0x3a5   : > { %v2647_v21 = vmax.f32 %v2570_v54, 0.0  ;;  %v2356_v1 = vadd.f32 %v2355_v47, %v2243_v28  ;;  %v2367_v54 = vpop.f32.mrf.mxu0  ;;  %v2255_v28 = vadd.f32 %v4265_v38, %v4180_v55 }
 0x3a6   : > { %v2350_v63 = vadd.f32 %v2349_v45, %v2237_v8  ;;  %v1091_v8 = vld [vmem:[#allocation2 + $0x228] sm:$0xff] }
 0x3a7   : > { %2729 = vmatmul.f32.gmra.mxu3 %v2647_v21  ;;  %v2572_v37 = vpop.f32.mrf.mxu2  ;;  %v4599_v21 = vld [vmem:[#allocation42_spill] sm:$0xff] }
 0x3a8   : > { %v2459_v61 = vpop.f32.mrf.mxu1 }
 0x3a9   : > { %v2460_v26 = vadd.f32 %v2459_v61, %v2347_v62  ;;  %v4600_v61 = vld [vmem:[#allocation41_spill] sm:$0xff] }
 0x3ab   : > { %2506 = vmatmul.f32.gmra.mxu1 %v4591_v36  ;;  %v2573_v18 = vadd.f32 %v2572_v37, %v2460_v26  ;;  %v1155_v37 = vld [vmem:[#allocation2 + $0x229] sm:$0xff]  ;;  %v2246_v26 = vadd.f32 %v4239_v15, %v4600_v61 }
 0x3ac   : > { %2622 = vmatmul.f32.gmra.mxu2 %v4592_v57  ;;  %v4603_v61 = vld [vmem:[#allocation46_spill] sm:$0xff] }
 0x3ad   : > { %v2648_v53 = vmax.f32 %v2573_v18, 0.0  ;;  %v2359_v18 = vadd.f32 %v2358_v11, %v2246_v26  ;;  %v2370_v32 = vpop.f32.mrf.mxu0  ;;  %v2258_v26 = vadd.f32 %v4274_v30, %v4603_v61 }
 0x3af   : > { %2732 = vmatmul.f32.gmra.mxu3 %v2648_v53  ;;  %v2575_v14 = vpop.f32.mrf.mxu2 }
 0x3b0   : > { %v2462_v24 = vpop.f32.mrf.mxu1 }
 0x3b1   : > { %v2463_v25 = vadd.f32 %v2462_v24, %v2350_v63  ;;  %v1156_v63 = vld [vmem:[#allocation2 + $0x231] sm:$0xff] }
 0x3b3   : > { %2509 = vmatmul.f32.gmra.mxu1 %v4594_v3  ;;  %v2576_v42 = vadd.f32 %v2575_v14, %v2463_v25  ;;  %v4601_v14 = vld [vmem:[#allocation44_spill] sm:$0xff] }
 0x3b4   : > { %2625 = vmatmul.f32.gmra.mxu2 %v4595_v43  ;;  %v2249_v24 = vadd.f32 %v4247_v31, %v4601_v14  ;;  %v4604_v14 = vld [vmem:[#allocation47_spill] sm:$0xff] }
 0x3b5   : > { %v2649_v40 = vmax.f32 %v2576_v42, 0.0  ;;  %v2261_v30 = vadd.f32 %v4280_v50, %v4604_v14 }
 0x3b6   : > { %v2362_v3 = vadd.f32 %v2361_v23, %v2249_v24 }
 0x3b7   : > { %2735 = vmatmul.f32.gmra.mxu3 %v2649_v40  ;;  %v2578_v17 = vpop.f32.mrf.mxu2  ;;  %v2373_v40 = vpop.f32.mrf.mxu0 }
 0x3b8   : > { %v2465_v45 = vpop.f32.mrf.mxu1 }
 0x3b9   : > { %v2466_v7 = vadd.f32 %v2465_v45, %v2353_v41  ;;  %v4602_v41 = vld [vmem:[#allocation45_spill] sm:$0xff] }
 0x3bb   : > { %2512 = vmatmul.f32.gmra.mxu1 %v4597_v59  ;;  %v2579_v4 = vadd.f32 %v2578_v17, %v2466_v7  ;;  %v2252_v17 = vadd.f32 %v4257_v56, %v4602_v41  ;;  %v3167_v41 = vld [vmem:[%s3567_s14 + $0x20] sm:$0xff] }
 0x3bc   : > { %2628 = vmatmul.f32.gmra.mxu2 %v4170_v22  ;;  %v4357_v22 = vpop.f32.mrf.mxu3 }
 0x3bd   : > { %v2650_v6 = vmax.f32 %v2579_v4, 0.0  ;;  %v2365_v7 = vadd.f32 %v2364_v52, %v2252_v17 }
 0x3bf   : > { %2738 = vmatmul.f32.gmra.mxu3 %v2650_v6  ;;  %v2581_v60 = vpop.f32.mrf.mxu2 }
 0x3c0   : > { %v2468_v13 = vpop.f32.mrf.mxu1 }
 0x3c1   : > { %v2469_v39 = vadd.f32 %v2468_v13, %v2356_v1  ;;  %v2376_v1 = vpop.f32.mrf.mxu0 }
 0x3c3   : > { %2515 = vmatmul.f32.gmra.mxu1 %v4599_v21  ;;  %v2582_v62 = vadd.f32 %v2581_v60, %v2469_v39  ;;  %v2368_v60 = vadd.f32 %v2367_v54, %v2255_v28 }
 0x3c4   : > { %2631 = vmatmul.f32.gmra.mxu2 %v1155_v37  ;;  %v4361_v42 = vpop.f32.mrf.mxu3 }
 0x3c5   : > { %v2651_v36 = vmax.f32 %v2582_v62, 0.0  ;;  %v3165_v62 = vld [vmem:[%s3567_s14 + $0x10] sm:$0xff] }
 0x3c7   : > { %2741 = vmatmul.f32.gmra.mxu3 %v2651_v36  ;;  %v2584_v46 = vpop.f32.mrf.mxu2 }
 0x3c8   : > { %v2471_v47 = vpop.f32.mrf.mxu1 }
 0x3c9   : > { %v2472_v57 = vadd.f32 %v2471_v47, %v2359_v18  ;;  %v2379_v38 = vpop.f32.mrf.mxu0 }
 0x3cb   : > { %2518 = vmatmul.f32.gmra.mxu1 %v1091_v8  ;;  %v2585_v53 = vadd.f32 %v2584_v46, %v2472_v57  ;;  %v2371_v46 = vadd.f32 %v2370_v32, %v2258_v26 }
 0x3cc   : > { %2634 = vmatmul.f32.gmra.mxu2 %v1156_v63  ;;  %v4365_v4 = vpop.f32.mrf.mxu3 }
 0x3cd   : > { %v2652_v25 = vmax.f32 %v2585_v53, 0.0  ;;  %v3166_v53 = vld [vmem:[%s3567_s14 + $0x18] sm:$0xff] }
 0x3cf   : > { %2744 = vmatmul.f32.gmra.mxu3 %v2652_v25  ;;  %v2587_v15 = vpop.f32.mrf.mxu2  ;;  %v2374_v25 = vadd.f32 %v2373_v40, %v2261_v30  ;;  %v3170_v30 = vld [vmem:[%s3567_s14 + $0x38] sm:$0xff] }
 0x3d0   : > { %v2474_v11 = vpop.f32.mrf.mxu1 }
 0x3d1   : > { %v2475_v43 = vadd.f32 %v2474_v11, %v2362_v3 }
 0x3d3   : > { %2521 = vmatmul.f32.gmra.mxu1 %v1092_v51  ;;  %v2588_v5 = vadd.f32 %v2587_v15, %v2475_v43  ;;  %v2382_v43 = vpop.f32.mrf.mxu0 }
 0x3d5   : > { %v2653_v45 = vmax.f32 %v2588_v5, 0.0 }
 0x3d7   : > { %2747 = vmatmul.f32.gmra.mxu3 %v2653_v45  ;;  %v2590_v31 = vpop.f32.mrf.mxu2  ;;  %v4605_v45 = vld [vmem:[#allocation48_spill] sm:$0xff] }
 0x3d8   : > { %v2477_v23 = vpop.f32.mrf.mxu1 }
 0x3d9   : > { %v2478_v59 = vadd.f32 %v2477_v23, %v2365_v7  ;;  %v2264_v7 = vadd.f32 %v4289_v12, %v4605_v45  ;;  %v2276_v45 = vadd.f32 %v4319_v2, %v4224_v49 }
 0x3db   : > { %v2591_v27 = vadd.f32 %v2590_v31, %v2478_v59  ;;  %v2377_v23 = vadd.f32 %v2376_v1, %v2264_v7 }
 0x3dd   : > { %v2654_v6 = vmax.f32 %v2591_v27, 0.0 }
 0x3df   : > { %2750 = vmatmul.f32.gmra.mxu3 %v2654_v6  ;;  %v2593_v13 = vpop.f32.mrf.mxu2 }
 0x3e0   : > { %v2480_v56 = vpop.f32.mrf.mxu1 }
 0x3e1   : > { %v2481_v39 = vadd.f32 %v2480_v56, %v2368_v60  ;;  %v3168_v60 = vld [vmem:[%s3567_s14 + $0x28] sm:$0xff]  ;;  %v2385_v56 = vpop.f32.mrf.mxu0 }
 0x3e2   : > { %v2703_v52 = vpop.f32.mrf.mxu3 }
 0x3e3   : > { %v2594_v21 = vadd.f32 %v2593_v13, %v2481_v39  ;;  %v2704_v37 = vadd.f32 %v3165_v62, %v2703_v52  ;;  %v4606_v39 = vld [vmem:[#allocation49_spill] sm:$0xff] }
 0x3e4   : > { %v2267_v52 = vadd.f32 %v4298_v35, %v4606_v39 }
 0x3e5   : > { %v2655_v36 = vmax.f32 %v2594_v21, 0.0  ;;  %v2799_v18 = vmax.f32 %v2704_v37, 0.0 }
 0x3e6   : > { %v2380_v62 = vadd.f32 %v2379_v38, %v2267_v52 }
 0x3e7   : > { %2831 = vst [vmem:[%s4373_s23] sm:$0xff] %v2799_v18  ;;  %2753 = vmatmul.f32.gmra.mxu3 %v2655_v36  ;;  %v2596_v55 = vpop.f32.mrf.mxu2  ;;  %v3169_v18 = vld [vmem:[%s3567_s14 + $0x30] sm:$0xff] }
 0x3e8   : > { %v2483_v54 = vpop.f32.mrf.mxu1 }
 0x3e9   : > { %v2484_v47 = vadd.f32 %v2483_v54, %v2371_v46  ;;  %v2388_v35 = vpop.f32.mrf.mxu0 }
 0x3ea   : > { %v2706_v57 = vpop.f32.mrf.mxu3 }
 0x3eb   : > { %v2597_v8 = vadd.f32 %v2596_v55, %v2484_v47  ;;  %v2707_v63 = vadd.f32 %v3166_v53, %v2706_v57  ;;  %v2270_v55 = vadd.f32 %v4306_v44, %v4213_v19 }
 0x3ed   : > { %v2656_v24 = vmax.f32 %v2597_v8, 0.0  ;;  %v2800_v32 = vmax.f32 %v2707_v63, 0.0  ;;  %v2383_v57 = vadd.f32 %v2382_v43, %v2270_v55 }
 0x3ef   : > { %2832 = vst [vmem:[%s4373_s23 + $0x8] sm:$0xff] %v2800_v32  ;;  %2756 = vmatmul.f32.gmra.mxu3 %v2656_v24  ;;  %v2599_v3 = vpop.f32.mrf.mxu2  ;;  %v2273_v32 = vadd.f32 %v4312_v48, %v4220_v29  ;;  %v2389_v48 = vadd.f32 %v2388_v35, %v2276_v45 }
 0x3f0   : > { %v2486_v15 = vpop.f32.mrf.mxu1 }
 0x3f1   : > { %v2487_v11 = vadd.f32 %v2486_v15, %v2374_v25  ;;  %v2386_v44 = vadd.f32 %v2385_v56, %v2273_v32  ;;  %v2391_v15 = vpop.f32.mrf.mxu0 }
 0x3f2   : > { %v2709_v51 = vpop.f32.mrf.mxu3 }
 0x3f3   : > { %v2600_v5 = vadd.f32 %v2599_v3, %v2487_v11  ;;  %v2710_v17 = vadd.f32 %v3167_v41, %v2709_v51  ;;  %v3171_v41 = vld [vmem:[%s3567_s14 + $0x40] sm:$0xff] }
 0x3f5   : > { %v2657_v31 = vmax.f32 %v2600_v5, 0.0  ;;  %v2801_v50 = vmax.f32 %v2710_v17, 0.0 }
 0x3f7   : > { %2833 = vst [vmem:[%s4373_s23 + $0x10] sm:$0xff] %v2801_v50  ;;  %2759 = vmatmul.f32.gmra.mxu3 %v2657_v31  ;;  %v2602_v40 = vpop.f32.mrf.mxu2 }
 0x3f8   : > { %v2489_v59 = vpop.f32.mrf.mxu1 }
 0x3f9   : > { %v2490_v27 = vadd.f32 %v2489_v59, %v2377_v23 }
 0x3fa   : > { %v2712_v28 = vpop.f32.mrf.mxu3 }
 0x3fb   : > { %v2603_v6 = vadd.f32 %v2602_v40, %v2490_v27  ;;  %v2713_v13 = vadd.f32 %v3168_v60, %v2712_v28  ;;  %v2394_v40 = vpop.f32.mrf.mxu0  ;;  %v3172_v28 = vld [vmem:[%s3567_s14 + $0x48] sm:$0xff] }
 0x3fc   : > { %v4607_v60 = vld [vmem:[#allocation50_spill] sm:$0xff] }
 0x3fd   : > { %v2658_v21 = vmax.f32 %v2603_v6, 0.0  ;;  %v2802_v12 = vmax.f32 %v2713_v13, 0.0  ;;  %v2279_v13 = vadd.f32 %v4329_v20, %v4607_v60 }
 0x3ff   : > { %2834 = vst [vmem:[%s4373_s23 + $0x18] sm:$0xff] %v2802_v12  ;;  %2762 = vmatmul.f32.gmra.mxu3 %v2658_v21  ;;  %v2605_v1 = vpop.f32.mrf.mxu2  ;;  %v2392_v2 = vadd.f32 %v2391_v15, %v2279_v13  ;;  %v3175_v15 = vld [vmem:[%s3567_s14 + $0x60] sm:$0xff] }
 0x400   : > { %v2492_v37 = vpop.f32.mrf.mxu1 }
 0x401   : > { %v2493_v61 = vadd.f32 %v2492_v37, %v2380_v62 }
 0x402   : > { %v2715_v26 = vpop.f32.mrf.mxu3 }
 0x403   : > { %v2606_v36 = vadd.f32 %v2605_v1, %v2493_v61  ;;  %v2716_v46 = vadd.f32 %v3169_v18, %v2715_v26  ;;  %v3173_v1 = vld [vmem:[%s3567_s14 + $0x50] sm:$0xff]  ;;  %v2397_v61 = vpop.f32.mrf.mxu0 }
 0x404   : > { %v4608_v26 = vld [vmem:[#allocation51_spill] sm:$0xff] }
 0x405   : > { %v2659_v54 = vmax.f32 %v2606_v36, 0.0  ;;  %v2803_v47 = vmax.f32 %v2716_v46, 0.0  ;;  %v2282_v36 = vadd.f32 %v4336_v58, %v4608_v26 }
 0x407   : > { %2835 = vst [vmem:[%s4373_s23 + $0x20] sm:$0xff] %v2803_v47  ;;  %2765 = vmatmul.f32.gmra.mxu3 %v2659_v54  ;;  %v2608_v38 = vpop.f32.mrf.mxu2  ;;  %v2395_v46 = vadd.f32 %v2394_v40, %v2282_v36  ;;  %v2297_v36 = vadd.f32 %v4365_v4, %v4269_v34  ;;  %v3180_v4 = vld [vmem:[%s3567_s14 + $0x88] sm:$0xff] }
 0x408   : > { %v2495_v8 = vpop.f32.mrf.mxu1 }
 0x409   : > { %v2496_v53 = vadd.f32 %v2495_v8, %v2383_v57 }
 0x40a   : > { %v2718_v63 = vpop.f32.mrf.mxu3 }
 0x40b   : > { %v2609_v14 = vadd.f32 %v2608_v38, %v2496_v53  ;;  %v2719_v24 = vadd.f32 %v3170_v30, %v2718_v63  ;;  %v3174_v38 = vld [vmem:[%s3567_s14 + $0x58] sm:$0xff]  ;;  %v4609_v53 = vld [vmem:[#allocation17_spill] sm:$0xff]  ;;  %v2400_v58 = vpop.f32.mrf.mxu0 }
 0x40c   : > { %v2285_v63 = vadd.f32 %v4342_v9, %v4609_v53 }
 0x40d   : > { %v2660_v25 = vmax.f32 %v2609_v14, 0.0  ;;  %v2804_v19 = vmax.f32 %v2719_v24, 0.0 }
 0x40e   : > { %v2398_v24 = vadd.f32 %v2397_v61, %v2285_v63 }
 0x40f   : > { %2836 = vst [vmem:[%s4373_s23 + $0x28] sm:$0xff] %v2804_v19  ;;  %2768 = vmatmul.f32.gmra.mxu3 %v2660_v25  ;;  %v2611_v3 = vpop.f32.mrf.mxu2 }
 0x410   : > { %v2498_v11 = vpop.f32.mrf.mxu1 }
 0x411   : > { %v2499_v43 = vadd.f32 %v2498_v11, %v2386_v44 }
 0x412   : > { %v2721_v51 = vpop.f32.mrf.mxu3 }
 0x413   : > { %v2612_v5 = vadd.f32 %v2611_v3, %v2499_v43  ;;  %v2722_v17 = vadd.f32 %v3171_v41, %v2721_v51  ;;  %v2288_v43 = vadd.f32 %v4349_v0, %v4250_v16 }
 0x415   : > { %v2661_v7 = vmax.f32 %v2612_v5, 0.0  ;;  %v2805_v29 = vmax.f32 %v2722_v17, 0.0  ;;  %v2401_v5 = vadd.f32 %v2400_v58, %v2288_v43  ;;  %v2403_v17 = vpop.f32.mrf.mxu0 }
 0x417   : > { %2837 = vst [vmem:[%s4373_s23 + $0x30] sm:$0xff] %v2805_v29  ;;  %2771 = vmatmul.f32.gmra.mxu3 %v2661_v7  ;;  %v2614_v31 = vpop.f32.mrf.mxu2 }
 0x418   : > { %v2501_v50 = vpop.f32.mrf.mxu1 }
 0x419   : > { %v2502_v23 = vadd.f32 %v2501_v50, %v2389_v48 }
 0x41a   : > { %v2724_v59 = vpop.f32.mrf.mxu3 }
 0x41b   : > { %v2615_v27 = vadd.f32 %v2614_v31, %v2502_v23  ;;  %v2725_v6 = vadd.f32 %v3172_v28, %v2724_v59  ;;  %v3176_v31 = vld [vmem:[%s3567_s14 + $0x68] sm:$0xff]  ;;  %v2291_v23 = vadd.f32 %v4357_v22, %v4255_v10 }
 0x41d   : > { %v2662_v56 = vmax.f32 %v2615_v27, 0.0  ;;  %v2806_v49 = vmax.f32 %v2725_v6, 0.0  ;;  %v2404_v0 = vadd.f32 %v2403_v17, %v2291_v23  ;;  %v2406_v6 = vpop.f32.mrf.mxu0 }
 0x41f   : > { %2838 = vst [vmem:[%s4373_s23 + $0x38] sm:$0xff] %v2806_v49  ;;  %2774 = vmatmul.f32.gmra.mxu3 %v2662_v56  ;;  %v2617_v39 = vpop.f32.mrf.mxu2  ;;  %v3177_v56 = vld [vmem:[%s3567_s14 + $0x70] sm:$0xff] }
 0x420   : > { %v2504_v52 = vpop.f32.mrf.mxu1 }
 0x421   : > { %v2505_v21 = vadd.f32 %v2504_v52, %v2392_v2  ;;  %v2294_v2 = vadd.f32 %v4361_v42, %v4262_v33 }
 0x422   : > { %v2727_v12 = vpop.f32.mrf.mxu3 }
 0x423   : > { %v2618_v62 = vadd.f32 %v2617_v39, %v2505_v21  ;;  %v2728_v37 = vadd.f32 %v3173_v1, %v2727_v12  ;;  %v2407_v22 = vadd.f32 %v2406_v6, %v2294_v2 }
 0x425   : > { %v2663_v18 = vmax.f32 %v2618_v62, 0.0  ;;  %v2807_v20 = vmax.f32 %v2728_v37, 0.0  ;;  %v3178_v37 = vld [vmem:[%s3567_s14 + $0x78] sm:$0xff]  ;;  %v2409_v26 = vpop.f32.mrf.mxu0 }
 0x427   : > { %2839 = vst [vmem:[%s4373_s23 + $0x40] sm:$0xff] %v2807_v20  ;;  %2777 = vmatmul.f32.gmra.mxu3 %v2663_v18  ;;  %v2620_v55 = vpop.f32.mrf.mxu2  ;;  %v2410_v18 = vadd.f32 %v2409_v26, %v2297_v36 }
 0x428   : > { %v2507_v54 = vpop.f32.mrf.mxu1 }
 0x429   : > { %v2508_v47 = vadd.f32 %v2507_v54, %v2395_v46 }
 0x42a   : > { %v2730_v35 = vpop.f32.mrf.mxu3 }
 0x42b   : > { %v2621_v57 = vadd.f32 %v2620_v55, %v2508_v47  ;;  %v2731_v8 = vadd.f32 %v3174_v38, %v2730_v35  ;;  %v3179_v35 = vld [vmem:[%s3567_s14 + $0x80] sm:$0xff] }
 0x42d   : > { %v2664_v14 = vmax.f32 %v2621_v57, 0.0  ;;  %v2808_v30 = vmax.f32 %v2731_v8, 0.0 }
 0x42f   : > { %2840 = vst [vmem:[%s4373_s23 + $0x48] sm:$0xff] %v2808_v30  ;;  %2780 = vmatmul.f32.gmra.mxu3 %v2664_v14  ;;  %v2623_v32 = vpop.f32.mrf.mxu2  ;;  %v3181_v30 = vld [vmem:[%s3567_s14 + $0x90] sm:$0xff] }
 0x430   : > { %v2510_v25 = vpop.f32.mrf.mxu1 }
 0x431   : > { %v2511_v19 = vadd.f32 %v2510_v25, %v2398_v24  ;;  %v3182_v25 = vld [vmem:[%s3567_s14 + $0x98] sm:$0xff] }
 0x432   : > { %v2733_v44 = vpop.f32.mrf.mxu3 }
 0x433   : > { %v2624_v3 = vadd.f32 %v2623_v32, %v2511_v19  ;;  %v2734_v11 = vadd.f32 %v3175_v15, %v2733_v44  ;;  %v3183_v15 = vld [vmem:[%s3567_s14 + $0xa0] sm:$0xff] }
 0x435   : > { %v2665_v51 = vmax.f32 %v2624_v3, 0.0  ;;  %v2809_v9 = vmax.f32 %v2734_v11, 0.0 }
 0x437   : > { %2841 = vst [vmem:[%s4373_s23 + $0x50] sm:$0xff] %v2809_v9  ;;  %2783 = vmatmul.f32.gmra.mxu3 %v2665_v51  ;;  %v2626_v41 = vpop.f32.mrf.mxu2  ;;  %v3184_v9 = vld [vmem:[%s3567_s14 + $0xa8] sm:$0xff] }
 0x438   : > { %v2513_v45 = vpop.f32.mrf.mxu1 }
 0x439   : > { %v2514_v7 = vadd.f32 %v2513_v45, %v2401_v5  ;;  %v3185_v45 = vld [vmem:[%s3567_s14 + $0xb0] sm:$0xff] }
 0x43a   : > { %v2736_v29 = vpop.f32.mrf.mxu3 }
 0x43b   : > { %v2627_v48 = vadd.f32 %v2626_v41, %v2514_v7  ;;  %v2737_v50 = vadd.f32 %v3176_v31, %v2736_v29  ;;  %v3186_v31 = vld [vmem:[%s3567_s14 + $0xb8] sm:$0xff] }
 0x43d   : > { %v2666_v40 = vmax.f32 %v2627_v48, 0.0  ;;  %v2810_v16 = vmax.f32 %v2737_v50, 0.0 }
 0x43f   : > { %2842 = vst [vmem:[%s4373_s23 + $0x58] sm:$0xff] %v2810_v16  ;;  %2786 = vmatmul.f32.gmra.mxu3 %v2666_v40  ;;  %v2629_v59 = vpop.f32.mrf.mxu2  ;;  %v3187_v16 = vld [vmem:[%s3567_s14 + $0xc0] sm:$0xff] }
 0x440   : > { %v2516_v27 = vpop.f32.mrf.mxu1 }
 0x441   : > { %v2517_v28 = vadd.f32 %v2516_v27, %v2404_v0 }
 0x442   : > { %v2739_v60 = vpop.f32.mrf.mxu3 }
 0x443   : > { %v2630_v13 = vadd.f32 %v2629_v59, %v2517_v28  ;;  %v2740_v49 = vadd.f32 %v3177_v56, %v2739_v60  ;;  %v3188_v28 = vld [vmem:[%s3567_s14 + $0xc8] sm:$0xff]  ;;  %v3189_v56 = vld [vmem:[%s3567_s14 + $0xd0] sm:$0xff] }
 0x445   : > { %v2667_v39 = vmax.f32 %v2630_v13, 0.0  ;;  %v2811_v10 = vmax.f32 %v2740_v49, 0.0 }
 0x447   : > { %2843 = vst [vmem:[%s4373_s23 + $0x60] sm:$0xff] %v2811_v10  ;;  %2789 = vmatmul.f32.gmra.mxu3 %v2667_v39  ;;  %v2632_v21 = vpop.f32.mrf.mxu2  ;;  %v3190_v10 = vld [vmem:[%s3567_s14 + $0xd8] sm:$0xff] }
 0x448   : > { %v2519_v52 = vpop.f32.mrf.mxu1 }
 0x449   : > { %v2520_v12 = vadd.f32 %v2519_v52, %v2407_v22 }
 0x44a   : > { %v2742_v62 = vpop.f32.mrf.mxu3 }
 0x44b   : > { %v2633_v1 = vadd.f32 %v2632_v21, %v2520_v12  ;;  %v2743_v61 = vadd.f32 %v3178_v37, %v2742_v62  ;;  %v3191_v12 = vld [vmem:[%s3567_s14 + $0xe0] sm:$0xff] }
 0x44d   : > { %v2668_v33 = vmax.f32 %v2633_v1, 0.0  ;;  %v2812_v42 = vmax.f32 %v2743_v61, 0.0  ;;  %v3192_v61 = vld [vmem:[%s3567_s14 + $0xe8] sm:$0xff] }
 0x44f   : > { %2844 = vst [vmem:[%s4373_s23 + $0x68] sm:$0xff] %v2812_v42  ;;  %2792 = vmatmul.f32.gmra.mxu3 %v2668_v33  ;;  %v2635_v55 = vpop.f32.mrf.mxu2  ;;  %v3193_v42 = vld [vmem:[%s3567_s14 + $0xf0] sm:$0xff] }
 0x450   : > { %v2522_v20 = vpop.f32.mrf.mxu1 }
 0x451   : > { %v2523_v46 = vadd.f32 %v2522_v20, %v2410_v18 }
 0x452   : > { %v2745_v54 = vpop.f32.mrf.mxu3 }
 0x453   : > { %v2636_v47 = vadd.f32 %v2635_v55, %v2523_v46  ;;  %v2746_v57 = vadd.f32 %v3179_v35, %v2745_v54  ;;  %v3194_v55 = vld [vmem:[%s3567_s14 + $0xf8] sm:$0xff] }
 0x455   : > { %v2669_v38 = vmax.f32 %v2636_v47, 0.0  ;;  %v2813_v8 = vmax.f32 %v2746_v57, 0.0  ;;  %v3195_v57 = vld [vmem:[%s3567_s14 + $0x100] sm:$0xff] }
 0x457   : > { %2845 = vst [vmem:[%s4373_s23 + $0x70] sm:$0xff] %v2813_v8  ;;  %2795 = vmatmul.f32.gmra.mxu3 %v2669_v38 }
 0x45a   : > { %v2748_v34 = vpop.f32.mrf.mxu3 }
 0x45b   : > { %v2749_v53 = vadd.f32 %v3180_v4, %v2748_v34  ;;  %v3196_v4 = vld [vmem:[%s3567_s14 + $0x108] sm:$0xff] }
 0x45d   : > { %v2814_v63 = vmax.f32 %v2749_v53, 0.0 }
 0x45f   : > { %2846 = vst [vmem:[%s4373_s23 + $0x78] sm:$0xff] %v2814_v63 }
 0x462   : > { %v2751_v14 = vpop.f32.mrf.mxu3 }
 0x463   : > { %v2752_v58 = vadd.f32 %v3181_v30, %v2751_v14 }
 0x465   : > { %v2815_v24 = vmax.f32 %v2752_v58, 0.0 }
 0x467   : > { %2847 = vst [vmem:[%s4373_s23 + $0x80] sm:$0xff] %v2815_v24 }
 0x46a   : > { %v2754_v32 = vpop.f32.mrf.mxu3 }
 0x46b   : > { %v2755_v19 = vadd.f32 %v3182_v25, %v2754_v32 }
 0x46d   : > { %v2816_v44 = vmax.f32 %v2755_v19, 0.0 }
 0x46f   : > { %2848 = vst [vmem:[%s4373_s23 + $0x88] sm:$0xff] %v2816_v44 }
 0x472   : > { %v2757_v3 = vpop.f32.mrf.mxu3 }
 0x473   : > { %v2758_v11 = vadd.f32 %v3183_v15, %v2757_v3 }
 0x475   : > { %v2817_v43 = vmax.f32 %v2758_v11, 0.0 }
 0x477   : > { %2849 = vst [vmem:[%s4373_s23 + $0x90] sm:$0xff] %v2817_v43 }
 0x47a   : > { %v2760_v51 = vpop.f32.mrf.mxu3 }
 0x47b   : > { %v2761_v5 = vadd.f32 %v3184_v9, %v2760_v51 }
 0x47d   : > { %v2818_v41 = vmax.f32 %v2761_v5, 0.0 }
 0x47f   : > { %2850 = vst [vmem:[%s4373_s23 + $0x98] sm:$0xff] %v2818_v41 }
 0x482   : > { %v2763_v17 = vpop.f32.mrf.mxu3 }
 0x483   : > { %v2764_v7 = vadd.f32 %v3185_v45, %v2763_v17 }
 0x485   : > { %v2819_v29 = vmax.f32 %v2764_v7, 0.0 }
 0x487   : > { %2851 = vst [vmem:[%s4373_s23 + $0xa0] sm:$0xff] %v2819_v29 }
 0x48a   : > { %v2766_v48 = vpop.f32.mrf.mxu3 }
 0x48b   : > { %v2767_v50 = vadd.f32 %v3186_v31, %v2766_v48 }
 0x48d   : > { %v2820_v23 = vmax.f32 %v2767_v50, 0.0 }
 0x48f   : > { %2852 = vst [vmem:[%s4373_s23 + $0xa8] sm:$0xff] %v2820_v23 }
 0x492   : > { %v2769_v40 = vpop.f32.mrf.mxu3 }
 0x493   : > { %v2770_v0 = vadd.f32 %v3187_v16, %v2769_v40 }
 0x495   : > { %v2821_v59 = vmax.f32 %v2770_v0, 0.0 }
 0x497   : > { %2853 = vst [vmem:[%s4373_s23 + $0xb0] sm:$0xff] %v2821_v59 }
 0x49a   : > { %v2772_v27 = vpop.f32.mrf.mxu3 }
 0x49b   : > { %v2773_v6 = vadd.f32 %v3188_v28, %v2772_v27 }
 0x49d   : > { %v2822_v60 = vmax.f32 %v2773_v6, 0.0 }
 0x49f   : > { %2854 = vst [vmem:[%s4373_s23 + $0xb8] sm:$0xff] %v2822_v60 }
 0x4a2   : > { %v2775_v13 = vpop.f32.mrf.mxu3 }
 0x4a3   : > { %v2776_v49 = vadd.f32 %v3189_v56, %v2775_v13 }
 0x4a5   : > { %v2823_v2 = vmax.f32 %v2776_v49, 0.0 }
 0x4a7   : > { %2855 = vst [vmem:[%s4373_s23 + $0xc0] sm:$0xff] %v2823_v2 }
 0x4aa   : > { %v2778_v39 = vpop.f32.mrf.mxu3 }
 0x4ab   : > { %v2779_v22 = vadd.f32 %v3190_v10, %v2778_v39 }
 0x4ad   : > { %v2824_v52 = vmax.f32 %v2779_v22, 0.0 }
 0x4af   : > { %2856 = vst [vmem:[%s4373_s23 + $0xc8] sm:$0xff] %v2824_v52 }
 0x4b2   : > { %v2781_v21 = vpop.f32.mrf.mxu3 }
 0x4b3   : > { %v2782_v62 = vadd.f32 %v3191_v12, %v2781_v21 }
 0x4b5   : > { %v2825_v1 = vmax.f32 %v2782_v62, 0.0 }
 0x4b7   : > { %2857 = vst [vmem:[%s4373_s23 + $0xd0] sm:$0xff] %v2825_v1 }
 0x4ba   : > { %v2784_v37 = vpop.f32.mrf.mxu3 }
 0x4bb   : > { %v2785_v26 = vadd.f32 %v3192_v61, %v2784_v37 }
 0x4bd   : > { %v2826_v36 = vmax.f32 %v2785_v26, 0.0 }
 0x4bf   : > { %2858 = vst [vmem:[%s4373_s23 + $0xd8] sm:$0xff] %v2826_v36 }
 0x4c2   : > { %v2787_v33 = vpop.f32.mrf.mxu3 }
 0x4c3   : > { %v2788_v18 = vadd.f32 %v3193_v42, %v2787_v33 }
 0x4c5   : > { %v2827_v20 = vmax.f32 %v2788_v18, 0.0 }
 0x4c7   : > { %2859 = vst [vmem:[%s4373_s23 + $0xe0] sm:$0xff] %v2827_v20 }
 0x4ca   : > { %v2790_v46 = vpop.f32.mrf.mxu3 }
 0x4cb   : > { %v2791_v54 = vadd.f32 %v3194_v55, %v2790_v46 }
 0x4cd   : > { %v2828_v47 = vmax.f32 %v2791_v54, 0.0 }
 0x4cf   : > { %2860 = vst [vmem:[%s4373_s23 + $0xe8] sm:$0xff] %v2828_v47 }
 0x4d2   : > { %v2793_v35 = vpop.f32.mrf.mxu3 }
 0x4d3   : > { %v2794_v38 = vadd.f32 %v3195_v57, %v2793_v35 }
 0x4d5   : > { %v2829_v8 = vmax.f32 %v2794_v38, 0.0 }
 0x4d7   : > { %2861 = vst [vmem:[%s4373_s23 + $0xf0] sm:$0xff] %v2829_v8 }
 0x4da   : > { %v2796_v34 = vpop.f32.mrf.mxu3 }
 0x4db   : > { %v2797_v53 = vadd.f32 %v3196_v4, %v2796_v34 }
 0x4dd   : > { %v2830_v63 = vmax.f32 %v2797_v53, 0.0 }
 0x4df   : > { %2862 = vst [vmem:[%s4373_s23 + $0xf8] sm:$0xff] %v2830_v63 }
 0x4e0   : > { %3344 = shalt.err (!%p3341_p0)
}
 0x4e1   : > { %s3415_s6 = smov 128   ;;  %s3416_s14 = smov 8  }
 0x4e2   : > { %3081 = dma.vmem_to_hbm [thread:$0]  (%p3542_p5), %s2880_s9, 4096, %s2882_s21, %s2864_s22, %s3415_s6, %s3415_s6, %s3416_s14  }
 0x4e3 PF: > { %s2896_s1 = sand.u32 1, %s3387_s15   ;;  %p3098_p3 = pnand %p3003_p11, %p3491_p6 }
 0x4e4   : > { %s2897_s23 = scalar_lea.sflag [#allocation6], %s2896_s1 }
 0x4e5   : > { %p3099_p7 = pneg %p3098_p3 }
 0x4e7   : > { %3382 = dma.done.wait (%p3099_p7), %s2897_s23, 4096  }
 0x4e8   : > { %3384 = vsyncadd (%p3099_p7), %s2897_s23, 4294963200  ;;  %s22_s20 = sadd.s32 1, %s3407_s20   ;;  %s4610_s15 = smov %s3391_s16 }
 0x4e9   : > { %p19_p9 = scmp.ge.s32.totalorder %s22_s20, 4   ;;  %s4611_s16 = smov %s3395_s17 }
 0x4ea   : > { %s4612_s17 = smov %s3551_s13  ;;  %s4613_s18 = smov %s3403_s19 }
 0x4eb   : > { %s4614_s19 = smov %s4616_s29  ;;  %21 = sbr.rel (!%p19_p9) target bundleno = 10 (0xa), region = 100 }
 0x4f0   :  { %2903 = vsyncpa [#allocation5], 1 }
 0x4f1   :  { %2905 = vsyncpa [#allocation5 + $0x1], 1 }
 0x4f2   :  { %2906 = vsyncpa [#allocation8], 1 }
 0x4f3   :  { %2907 = vsyncpa [#allocation11], 1 }
 0x4f4   :  { %2908 = vsyncpa [#allocation6], 1 }
 0x4f5   :  { %2910 = vsyncpa [#allocation6 + $0x1], 1 }

</bundles_post_ra>
